<compile_context>
chip_gen: v6e
topology: v6e:2x2x1
jax: 0.10.0
libtpu: 0.0.40
codegen_flags: <defaults>
</compile_context>

<pallas_src>
import functools
import math

import numpy as np
import jax
import jax.numpy as jnp
from jax import lax
from jax.experimental import pallas as pl
from jax.experimental.pallas import tpu as pltpu


def _cpp_refine_kernel(
    sd_ref,      # (1, r_blk, T)        VMEM: stardist at destination pixels
    cf_ref,      # (1, r_blk, T)        VMEM: conv_0 confidence at dst pixels
    pair_ref,    # (1, r_blk, 2*Hp, W)  VMEM: [stardist ; confidence] planes
    trig_ref,    # (2, R)               SMEM: row0 = cos, row1 = sin per ray
    w1_ref,      # (K, K)               SMEM: conv_1_confidence weight (1x1)
    b1_ref,      # (K,)                 SMEM: conv_1_confidence bias
    ray_o_ref,   # (1, r_blk, T)        refined ray map
    conf_o_ref,  # (1, K, r_blk, T)     refined (softmaxed) confidence
    *,
    H: int,
    W: int,
    Hp: int,
    erosion_factors: tuple,
    gather_dtype,
):
    K = 1 + len(erosion_factors)
    Ew = len(erosion_factors)
    r_blk = sd_ref.shape[1]
    T = sd_ref.shape[2]

    # ---- destination pixel coordinates from the grid position (no DMA) -----
    t = pl.program_id(2)
    rb = pl.program_id(1)
    lane = lax.broadcasted_iota(jnp.int32, (1, T), 1)
    p_f = (t * T + lane).astype(jnp.float32)          # exact for HW < 2^24
    iy0 = jnp.floor(p_f * (1.0 / W))
    jx0 = p_f - iy0 * W
    # +-1 fix-up so (jx0, iy0) are the exact integer (col, row) of each pixel.
    hi = jx0 >= W
    iy0 = jnp.where(hi, iy0 + 1.0, iy0)
    jx0 = jnp.where(hi, jx0 - W, jx0)
    lo = jx0 < 0.0
    iy0 = jnp.where(lo, iy0 - 1.0, iy0)
    jx0 = jnp.where(lo, jx0 + W, jx0)

    ray0 = sd_ref[0]                                   # (r_blk, T)
    conf0 = cf_ref[0]                                  # (r_blk, T)

    x_iota = lax.broadcasted_iota(jnp.int32, (W, 1), 0)    # source column ids
    y_iota = lax.broadcasted_iota(jnp.int32, (Hp, 1), 0)   # source row ids

    for j in range(r_blk):                             # bounded by ray_block
        k_abs = rb * r_blk + j                         # absolute ray index
        cos_k = trig_ref[0, k_abs]
        sin_k = trig_ref[1, k_abs]

        ray0_j = ray0[j:j + 1, :]                      # (1, T)
        conf0_j = conf0[j:j + 1, :]                    # (1, T)
        ray_vals = [ray0_j]
        conf_vals = [conf0_j]

        if Ew:
            # -- SamplingFeatures: nearest, zero padded; all erosion factors
            #    fused into ONE gather matmul (lane axis = Ew * T). ----------
            d_list, ix_list, iy_list = [], [], []
            for ef in erosion_factors:                 # static -> unrolled
                d = (ray0_j - 1.0) * ef                # base_dist
                xs = (jx0 + cos_k * d) / (W - 1.0) * 2.0 - 1.0
                ys = (iy0 + sin_k * d) / (H - 1.0) * 2.0 - 1.0
                xp = ((xs + 1.0) * W - 1.0) * 0.5      # grid_sample, align_corners=False
                yp = ((ys + 1.0) * H - 1.0) * 0.5
                # TODO(synk): torch nearest uses nearbyint (half-to-even);
                # floor(x+0.5) differs only on exact .5 coordinate ties.
                ix_list.append(jnp.floor(xp + 0.5).astype(jnp.int32))
                iy_list.append(jnp.floor(yp + 0.5).astype(jnp.int32))
                d_list.append(d)
            ixn = jnp.concatenate(ix_list, axis=1)     # (1, Ew*T)
            iyn = jnp.concatenate(iy_list, axis=1)     # (1, Ew*T)
            valid = (ixn >= 0) & (ixn < W) & (iyn >= 0) & (iyn < H)
            oh_x = ((x_iota == ixn) & valid).astype(gather_dtype)   # (W, Ew*T)
            oh_y = (y_iota == iyn).astype(jnp.float32)               # (Hp, Ew*T)
            # one MXU launch gathers columns of BOTH payload planes
            colsel = jnp.dot(pair_ref[0, j], oh_x,
                             preferred_element_type=jnp.float32)     # (2Hp, Ew*T)
            ray_g = jnp.sum(colsel[:Hp] * oh_y, axis=0, keepdims=True)  # (1, Ew*T)
            cnf_g = jnp.sum(colsel[Hp:] * oh_y, axis=0, keepdims=True)  # (1, Ew*T)
            for e in range(Ew):
                sl = slice(e * T, (e + 1) * T)         # lane-aligned (T % 128 == 0)
                ray_vals.append(ray_g[:, sl] + d_list[e])
                conf_vals.append(cnf_g[:, sl])

        # ---- conv_1_confidence (1x1, KxK shared weights): K*K scalar FMAs --
        conv = []
        for o in range(K):
            acc = b1_ref[o] + w1_ref[o, 0] * conf_vals[0]
            for kk in range(1, K):
                acc = acc + w1_ref[o, kk] * conf_vals[kk]
            conv.append(acc)

        # ---- softmax over the K refinement channels + weighted ray sum -----
        m = conv[0]
        for o in range(1, K):
            m = jnp.maximum(m, conv[o])
        ex = [jnp.exp(cv - m) for cv in conv]
        den = ex[0]
        for o in range(1, K):
            den = den + ex[o]
        inv = 1.0 / den        # exact divide: softmax sums to 1 within 1e-5

        ray_out = None
        for o in range(K):
            prob = ex[o] * inv
            conf_o_ref[0, o, j:j + 1, :] = prob
            contrib = prob * ray_vals[o]
            ray_out = contrib if ray_out is None else ray_out + contrib
        ray_o_ref[0, j:j + 1, :] = jnp.maximum(ray_out, 0.0)   # ReLU


def _pick_hw_tile(HW, cap=512):
    # 512 lanes is safe for v7x's 64 MiB VMEM; v5e/v6e (128 MiB) can pass
    # hw_tile=1024..2048 explicitly for better per-step-overhead amortization.
    cap = max(128, cap - cap % 128)
    return min(cap, -(-HW // 128) * 128)


def _pick_ray_block(R, cap=8):
    # block sublane dim must be a multiple of 8 (or the full ray extent)
    for cand in range(min(cap, R) // 8 * 8, 0, -8):
        if R % cand == 0:
            return cand
    return R


def cpp_refine(stardist_map, features, w0, w1, b1, erosion_factors,
               hw_tile=None, ray_block=None, gather_dtype=jnp.float32,
               vmem_limit_bytes=None):
    """stardist_map: (B, R, H, W); features: (B, C, H, W)  (NCHW like PyTorch).

    Returns (ray_refined (B, R, H, W), confidence (B, K, R, H, W))."""
    B, R, H, W = stardist_map.shape
    _, C, _, _ = features.shape
    K = 1 + len(erosion_factors)
    Ew = K - 1
    HW = H * W

    sd = stardist_map.astype(jnp.float32)
    ft = features.astype(jnp.float32)
    w0 = jnp.asarray(w0, jnp.float32).reshape(R, C)
    w1 = jnp.asarray(w1, jnp.float32).reshape(K, K)
    b1 = jnp.asarray(b1, jnp.float32).reshape(K)

    # ---- conv_0_confidence hoisted out of the kernel (one einsum per call) --
    conf = jnp.einsum("rc,bchw->brhw", w0, ft,
                      precision=lax.Precision.HIGHEST)        # (B, R, H, W)

    # ---- gather source planes: [stardist ; confidence], sublane padded ------
    Hp = -(-H // 8) * 8
    if Hp != H:
        zpad = ((0, 0), (0, 0), (0, Hp - H), (0, 0))
        sd_src, cf_src = jnp.pad(sd, zpad), jnp.pad(conf, zpad)
    else:
        sd_src, cf_src = sd, conf
    pair = jnp.concatenate([sd_src, cf_src], axis=2).astype(gather_dtype)  # (B,R,2Hp,W)

    # ---- destination tiles: flattened HW on lanes, padded to the tile -------
    if hw_tile is None:
        hw_tile = _pick_hw_tile(HW)
    assert hw_tile % 128 == 0, "hw_tile must be a multiple of 128 lanes"
    HWp = -(-HW // hw_tile) * hw_tile
    n_t = HWp // hw_tile
    sd_flat = sd.reshape(B, R, HW)
    cf_flat = conf.reshape(B, R, HW)
    if HWp != HW:
        lpad = ((0, 0), (0, 0), (0, HWp - HW))
        sd_flat, cf_flat = jnp.pad(sd_flat, lpad), jnp.pad(cf_flat, lpad)

    # ---- ray blocking: grid axis bounds VMEM / live ranges when R is big ----
    if ray_block is None:
        ray_block = _pick_ray_block(R)
    assert R % ray_block == 0
    assert ray_block % 8 == 0 or ray_block == R
    n_rb = R // ray_block

    # per-ray direction table (cos, sin) read from SMEM with the ray index
    ang = 2.0 * math.pi * np.arange(R, dtype=np.float64) / R
    trig = jnp.asarray(np.stack([np.cos(ang), np.sin(ang)]), jnp.float32)  # (2, R)

    # ---- explicit VMEM budget (pipeline double-buffers every block) ---------
    gbytes = jnp.dtype(gather_dtype).itemsize
    est = (2 * ray_block * 2 * Hp * W * gbytes            # pair source planes
           + 2 * 2 * ray_block * hw_tile * 4              # sd/conf dst tiles
           + 2 * (1 + K) * ray_block * hw_tile * 4        # ray/conf out tiles
           + Ew * hw_tile * (W * gbytes + 3 * Hp * 4)     # oh_x, oh_y, colsel
           + 16 * K * hw_tile * 4)                        # small per-ray rows
    if vmem_limit_bytes is None:
        vmem_limit_bytes = int(min(max(2 * est, 32 * 2 ** 20), 64 * 2 ** 20))

    kernel = functools.partial(
        _cpp_refine_kernel, H=H, W=W, Hp=Hp,
        erosion_factors=tuple(float(e) for e in erosion_factors),
        gather_dtype=gather_dtype)

    smem = pl.BlockSpec(memory_space=pltpu.MemorySpace.SMEM)
    ray_flat, conf_flat = pl.pallas_call(
        kernel,
        grid=(B, n_rb, n_t),
        in_specs=[
            pl.BlockSpec((1, ray_block, hw_tile), lambda b, r, t: (b, r, t)),
            pl.BlockSpec((1, ray_block, hw_tile), lambda b, r, t: (b, r, t)),
            # constant along t: fetched once per (batch, ray-block), then the
            # pipeline skips re-DMA across hw tiles.
            # TODO(synk): pipeline_mode=pl.Buffered(1) would drop its 2nd buffer.
            pl.BlockSpec((1, ray_block, 2 * Hp, W), lambda b, r, t: (b, r, 0, 0)),
            smem, smem, smem,
        ],
        out_specs=(
            pl.BlockSpec((1, ray_block, hw_tile), lambda b, r, t: (b, r, t)),
            pl.BlockSpec((1, K, ray_block, hw_tile), lambda b, r, t: (b, 0, r, t)),
        ),
        out_shape=(
            jax.ShapeDtypeStruct((B, R, HWp), jnp.float32),
            jax.ShapeDtypeStruct((B, K, R, HWp), jnp.float32),
        ),
        compiler_params=pltpu.CompilerParams(
            dimension_semantics=("parallel", "parallel", "parallel"),
            vmem_limit_bytes=vmem_limit_bytes),
    )(sd_flat, cf_flat, pair, trig, w1, b1)

    ray_refined = ray_flat[..., :HW].reshape(B, R, H, W)
    confidence = conf_flat[..., :HW].reshape(B, K, R, H, W)
    return ray_refined, confidence


if __name__ == "__main__":
    B, C, H, W = 2, 4, 16, 16          # batch, in_channels, spatial
    n_rays = 8
    erosion_factors = (0.2, 0.5)
    K = 1 + len(erosion_factors)

    key = jax.random.PRNGKey(0)
    k1, k2, k3, k4 = jax.random.split(key, 4)
    # stardist distances are non-negative in practice
    stardist_map = jax.random.uniform(k1, (B, n_rays, H, W), jnp.float32,
                                      0.0, 6.0)
    features = jax.random.normal(k2, (B, C, H, W), jnp.float32)

    # conv_0_confidence: Conv2d(C, n_rays, k=1, bias=False)
    w0 = jax.random.normal(k3, (n_rays, C), jnp.float32) * 0.1
    # conv_1_confidence: Conv2d(K, K, k=1, bias=True), bias init'd to 1.0
    w1 = jax.random.normal(k4, (K, K), jnp.float32) * 0.1
    b1 = jnp.ones((K,), jnp.float32)

    # hw_tile=128 exercises the multi-tile lane-dense destination axis at this
    # toy size; defaults (512 / ray_block=8) are used for everything else.
    fn = jax.jit(functools.partial(cpp_refine,
                                   erosion_factors=erosion_factors,
                                   hw_tile=128))
    ray_refined, confidence = fn(stardist_map, features, w0, w1, b1)
    jax.block_until_ready((ray_refined, confidence))

    assert ray_refined.shape == (B, n_rays, H, W)
    assert confidence.shape == (B, K, n_rays, H, W)
    assert bool(jnp.all(jnp.isfinite(ray_refined)))
    assert bool(jnp.all(ray_refined >= 0.0))
    assert bool(jnp.allclose(confidence.sum(axis=1), 1.0, atol=1e-5))
    print("KERNEL_OK")
</pallas_src>

<mosaic_0001>
module attributes {stable_mosaic.version = 11 : i64} {
  func.func @_cpp_refine_kernel(%arg0: i32, %arg1: i32, %arg2: i32, %arg3: memref<1x8x128xf32, #tpu.memory_space<vmem>>, %arg4: memref<1x8x128xf32, #tpu.memory_space<vmem>>, %arg5: memref<1x8x32x16xf32, #tpu.memory_space<vmem>>, %arg6: memref<2x8xf32, #tpu.memory_space<smem>>, %arg7: memref<3x3xf32, #tpu.memory_space<smem>>, %arg8: memref<3xf32, #tpu.memory_space<smem>>, %arg9: memref<1x8x128xf32, #tpu.memory_space<vmem>>, %arg10: memref<1x3x8x128xf32, #tpu.memory_space<vmem>>) attributes {dimension_semantics = [#tpu.dimension_semantics<parallel>, #tpu.dimension_semantics<parallel>, #tpu.dimension_semantics<parallel>], iteration_bounds = array<i64: 2, 1, 2>, scalar_prefetch = 0 : i64, scratch_operands = 0 : i64, tpu.core_type = #tpu.core_type<tc>, window_params = [{transform_indices = @transform_0, window_bounds = array<i64: 1, 8, 128>}, {transform_indices = @transform_1, window_bounds = array<i64: 1, 8, 128>}, {transform_indices = @transform_2, window_bounds = array<i64: 1, 8, 32, 16>}, {transform_indices = @transform_3, window_bounds = array<i64: 2, 8>}, {transform_indices = @transform_4, window_bounds = array<i64: 3, 3>}, {transform_indices = @transform_5, window_bounds = array<i64: 3>}, {transform_indices = @transform_6, window_bounds = array<i64: 1, 8, 128>}, {transform_indices = @transform_7, window_bounds = array<i64: 1, 3, 8, 128>}]} {
    %0 = tpu.iota {dimensions = array<i32: 1>} : vector<1x128xi32>
    %c128_i32 = arith.constant 128 : i32
    %1 = arith.muli %arg2, %c128_i32 : i32
    %2 = vector.broadcast %1 : i32 to vector<1x128xi32>
    %3 = arith.addi %2, %0 : vector<1x128xi32>
    %4 = arith.sitofp %3 : vector<1x128xi32> to vector<1x128xf32>
    %cst = arith.constant 6.250000e-02 : f32
    %5 = vector.broadcast %cst : f32 to vector<1x128xf32>
    %6 = arith.mulf %4, %5 : vector<1x128xf32>
    %7 = math.floor %6 : vector<1x128xf32>
    %cst_0 = arith.constant 1.600000e+01 : f32
    %8 = vector.broadcast %cst_0 : f32 to vector<1x128xf32>
    %9 = arith.mulf %7, %8 : vector<1x128xf32>
    %10 = arith.subf %4, %9 : vector<1x128xf32>
    %cst_1 = arith.constant 1.600000e+01 : f32
    %11 = vector.broadcast %cst_1 : f32 to vector<1x128xf32>
    %12 = arith.cmpf oge, %10, %11 : vector<1x128xf32>
    %cst_2 = arith.constant 1.000000e+00 : f32
    %13 = vector.broadcast %cst_2 : f32 to vector<1x128xf32>
    %14 = arith.addf %7, %13 : vector<1x128xf32>
    %15 = arith.select %12, %14, %7 : vector<1x128xi1>, vector<1x128xf32>
    %cst_3 = arith.constant 1.600000e+01 : f32
    %16 = vector.broadcast %cst_3 : f32 to vector<1x128xf32>
    %17 = arith.subf %10, %16 : vector<1x128xf32>
    %18 = arith.select %12, %17, %10 : vector<1x128xi1>, vector<1x128xf32>
    %cst_4 = arith.constant 0.000000e+00 : f32
    %19 = vector.broadcast %cst_4 : f32 to vector<1x128xf32>
    %20 = arith.cmpf olt, %18, %19 : vector<1x128xf32>
    %cst_5 = arith.constant 1.000000e+00 : f32
    %21 = vector.broadcast %cst_5 : f32 to vector<1x128xf32>
    %22 = arith.subf %15, %21 : vector<1x128xf32>
    %23 = arith.select %20, %22, %15 : vector<1x128xi1>, vector<1x128xf32>
    %cst_6 = arith.constant 1.600000e+01 : f32
    %24 = vector.broadcast %cst_6 : f32 to vector<1x128xf32>
    %25 = arith.addf %18, %24 : vector<1x128xf32>
    %26 = arith.select %20, %25, %18 : vector<1x128xi1>, vector<1x128xf32>
    %c0 = arith.constant 0 : index
    %c0_7 = arith.constant 0 : index
    %c0_8 = arith.constant 0 : index
    %27 = vector.load %arg3[%c0, %c0_7, %c0_8] : memref<1x8x128xf32, #tpu.memory_space<vmem>>, vector<1x8x128xf32>
    %28 = vector.shape_cast %27 : vector<1x8x128xf32> to vector<8x128xf32>
    %c0_9 = arith.constant 0 : index
    %c0_10 = arith.constant 0 : index
    %c0_11 = arith.constant 0 : index
    %29 = vector.load %arg4[%c0_9, %c0_10, %c0_11] : memref<1x8x128xf32, #tpu.memory_space<vmem>>, vector<1x8x128xf32>
    %30 = vector.shape_cast %29 : vector<1x8x128xf32> to vector<8x128xf32>
    %31 = tpu.iota {dimensions = array<i32: 0>} : vector<16x1xi32>
    %32 = tpu.iota {dimensions = array<i32: 0>} : vector<16x1xi32>
    %c8_i32 = arith.constant 8 : i32
    %33 = arith.muli %arg1, %c8_i32 : i32
    %c0_i32 = arith.constant 0 : i32
    %34 = arith.addi %33, %c0_i32 : i32
    %c0_12 = arith.constant 0 : index
    %35 = arith.index_cast %34 : i32 to index
    %36 = memref.load %arg6[%c0_12, %35] : memref<2x8xf32, #tpu.memory_space<smem>>
    %c1 = arith.constant 1 : index
    %37 = arith.index_cast %34 : i32 to index
    %38 = memref.load %arg6[%c1, %37] : memref<2x8xf32, #tpu.memory_space<smem>>
    %39 = vector.extract_strided_slice %28 {offsets = [0, 0], sizes = [1, 128], strides = [1, 1]} : vector<8x128xf32> to vector<1x128xf32>
    %40 = vector.extract_strided_slice %30 {offsets = [0, 0], sizes = [1, 128], strides = [1, 1]} : vector<8x128xf32> to vector<1x128xf32>
    %cst_13 = arith.constant 1.000000e+00 : f32
    %41 = vector.broadcast %cst_13 : f32 to vector<1x128xf32>
    %42 = arith.subf %39, %41 : vector<1x128xf32>
    %cst_14 = arith.constant 2.000000e-01 : f32
    %43 = vector.broadcast %cst_14 : f32 to vector<1x128xf32>
    %44 = arith.mulf %42, %43 : vector<1x128xf32>
    %45 = vector.broadcast %36 : f32 to vector<1x128xf32>
    %46 = arith.mulf %45, %44 : vector<1x128xf32>
    %47 = arith.addf %26, %46 : vector<1x128xf32>
    %cst_15 = arith.constant 1.500000e+01 : f32
    %48 = vector.broadcast %cst_15 : f32 to vector<1x128xf32>
    %49 = arith.divf %47, %48 : vector<1x128xf32>
    %cst_16 = arith.constant 2.000000e+00 : f32
    %50 = vector.broadcast %cst_16 : f32 to vector<1x128xf32>
    %51 = arith.mulf %49, %50 : vector<1x128xf32>
    %cst_17 = arith.constant 1.000000e+00 : f32
    %52 = vector.broadcast %cst_17 : f32 to vector<1x128xf32>
    %53 = arith.subf %51, %52 : vector<1x128xf32>
    %54 = vector.broadcast %38 : f32 to vector<1x128xf32>
    %55 = arith.mulf %54, %44 : vector<1x128xf32>
    %56 = arith.addf %23, %55 : vector<1x128xf32>
    %cst_18 = arith.constant 1.500000e+01 : f32
    %57 = vector.broadcast %cst_18 : f32 to vector<1x128xf32>
    %58 = arith.divf %56, %57 : vector<1x128xf32>
    %cst_19 = arith.constant 2.000000e+00 : f32
    %59 = vector.broadcast %cst_19 : f32 to vector<1x128xf32>
    %60 = arith.mulf %58, %59 : vector<1x128xf32>
    %cst_20 = arith.constant 1.000000e+00 : f32
    %61 = vector.broadcast %cst_20 : f32 to vector<1x128xf32>
    %62 = arith.subf %60, %61 : vector<1x128xf32>
    %cst_21 = arith.constant 1.000000e+00 : f32
    %63 = vector.broadcast %cst_21 : f32 to vector<1x128xf32>
    %64 = arith.addf %53, %63 : vector<1x128xf32>
    %cst_22 = arith.constant 1.600000e+01 : f32
    %65 = vector.broadcast %cst_22 : f32 to vector<1x128xf32>
    %66 = arith.mulf %64, %65 : vector<1x128xf32>
    %cst_23 = arith.constant 1.000000e+00 : f32
    %67 = vector.broadcast %cst_23 : f32 to vector<1x128xf32>
    %68 = arith.subf %66, %67 : vector<1x128xf32>
    %cst_24 = arith.constant 5.000000e-01 : f32
    %69 = vector.broadcast %cst_24 : f32 to vector<1x128xf32>
    %70 = arith.mulf %68, %69 : vector<1x128xf32>
    %cst_25 = arith.constant 1.000000e+00 : f32
    %71 = vector.broadcast %cst_25 : f32 to vector<1x128xf32>
    %72 = arith.addf %62, %71 : vector<1x128xf32>
    %cst_26 = arith.constant 1.600000e+01 : f32
    %73 = vector.broadcast %cst_26 : f32 to vector<1x128xf32>
    %74 = arith.mulf %72, %73 : vector<1x128xf32>
    %cst_27 = arith.constant 1.000000e+00 : f32
    %75 = vector.broadcast %cst_27 : f32 to vector<1x128xf32>
    %76 = arith.subf %74, %75 : vector<1x128xf32>
    %cst_28 = arith.constant 5.000000e-01 : f32
    %77 = vector.broadcast %cst_28 : f32 to vector<1x128xf32>
    %78 = arith.mulf %76, %77 : vector<1x128xf32>
    %cst_29 = arith.constant 5.000000e-01 : f32
    %79 = vector.broadcast %cst_29 : f32 to vector<1x128xf32>
    %80 = arith.addf %70, %79 : vector<1x128xf32>
    %81 = math.floor %80 : vector<1x128xf32>
    %82 = arith.fptosi %81 : vector<1x128xf32> to vector<1x128xi32>
    %cst_30 = arith.constant 5.000000e-01 : f32
    %83 = vector.broadcast %cst_30 : f32 to vector<1x128xf32>
    %84 = arith.addf %78, %83 : vector<1x128xf32>
    %85 = math.floor %84 : vector<1x128xf32>
    %86 = arith.fptosi %85 : vector<1x128xf32> to vector<1x128xi32>
    %cst_31 = arith.constant 1.000000e+00 : f32
    %87 = vector.broadcast %cst_31 : f32 to vector<1x128xf32>
    %88 = arith.subf %39, %87 : vector<1x128xf32>
    %cst_32 = arith.constant 5.000000e-01 : f32
    %89 = vector.broadcast %cst_32 : f32 to vector<1x128xf32>
    %90 = arith.mulf %88, %89 : vector<1x128xf32>
    %91 = vector.broadcast %36 : f32 to vector<1x128xf32>
    %92 = arith.mulf %91, %90 : vector<1x128xf32>
    %93 = arith.addf %26, %92 : vector<1x128xf32>
    %cst_33 = arith.constant 1.500000e+01 : f32
    %94 = vector.broadcast %cst_33 : f32 to vector<1x128xf32>
    %95 = arith.divf %93, %94 : vector<1x128xf32>
    %cst_34 = arith.constant 2.000000e+00 : f32
    %96 = vector.broadcast %cst_34 : f32 to vector<1x128xf32>
    %97 = arith.mulf %95, %96 : vector<1x128xf32>
    %cst_35 = arith.constant 1.000000e+00 : f32
    %98 = vector.broadcast %cst_35 : f32 to vector<1x128xf32>
    %99 = arith.subf %97, %98 : vector<1x128xf32>
    %100 = vector.broadcast %38 : f32 to vector<1x128xf32>
    %101 = arith.mulf %100, %90 : vector<1x128xf32>
    %102 = arith.addf %23, %101 : vector<1x128xf32>
    %cst_36 = arith.constant 1.500000e+01 : f32
    %103 = vector.broadcast %cst_36 : f32 to vector<1x128xf32>
    %104 = arith.divf %102, %103 : vector<1x128xf32>
    %cst_37 = arith.constant 2.000000e+00 : f32
    %105 = vector.broadcast %cst_37 : f32 to vector<1x128xf32>
    %106 = arith.mulf %104, %105 : vector<1x128xf32>
    %cst_38 = arith.constant 1.000000e+00 : f32
    %107 = vector.broadcast %cst_38 : f32 to vector<1x128xf32>
    %108 = arith.subf %106, %107 : vector<1x128xf32>
    %cst_39 = arith.constant 1.000000e+00 : f32
    %109 = vector.broadcast %cst_39 : f32 to vector<1x128xf32>
    %110 = arith.addf %99, %109 : vector<1x128xf32>
    %cst_40 = arith.constant 1.600000e+01 : f32
    %111 = vector.broadcast %cst_40 : f32 to vector<1x128xf32>
    %112 = arith.mulf %110, %111 : vector<1x128xf32>
    %cst_41 = arith.constant 1.000000e+00 : f32
    %113 = vector.broadcast %cst_41 : f32 to vector<1x128xf32>
    %114 = arith.subf %112, %113 : vector<1x128xf32>
    %cst_42 = arith.constant 5.000000e-01 : f32
    %115 = vector.broadcast %cst_42 : f32 to vector<1x128xf32>
    %116 = arith.mulf %114, %115 : vector<1x128xf32>
    %cst_43 = arith.constant 1.000000e+00 : f32
    %117 = vector.broadcast %cst_43 : f32 to vector<1x128xf32>
    %118 = arith.addf %108, %117 : vector<1x128xf32>
    %cst_44 = arith.constant 1.600000e+01 : f32
    %119 = vector.broadcast %cst_44 : f32 to vector<1x128xf32>
    %120 = arith.mulf %118, %119 : vector<1x128xf32>
    %cst_45 = arith.constant 1.000000e+00 : f32
    %121 = vector.broadcast %cst_45 : f32 to vector<1x128xf32>
    %122 = arith.subf %120, %121 : vector<1x128xf32>
    %cst_46 = arith.constant 5.000000e-01 : f32
    %123 = vector.broadcast %cst_46 : f32 to vector<1x128xf32>
    %124 = arith.mulf %122, %123 : vector<1x128xf32>
    %cst_47 = arith.constant 5.000000e-01 : f32
    %125 = vector.broadcast %cst_47 : f32 to vector<1x128xf32>
    %126 = arith.addf %116, %125 : vector<1x128xf32>
    %127 = math.floor %126 : vector<1x128xf32>
    %128 = arith.fptosi %127 : vector<1x128xf32> to vector<1x128xi32>
    %cst_48 = arith.constant 5.000000e-01 : f32
    %129 = vector.broadcast %cst_48 : f32 to vector<1x128xf32>
    %130 = arith.addf %124, %129 : vector<1x128xf32>
    %131 = math.floor %130 : vector<1x128xf32>
    %132 = arith.fptosi %131 : vector<1x128xf32> to vector<1x128xi32>
    %133 = tpu.concatenate %82, %128 in 1 : vector<1x128xi32>, vector<1x128xi32> -> vector<1x256xi32>
    %134 = tpu.concatenate %86, %132 in 1 : vector<1x128xi32>, vector<1x128xi32> -> vector<1x256xi32>
    %c0_i32_49 = arith.constant 0 : i32
    %135 = vector.broadcast %c0_i32_49 : i32 to vector<1x256xi32>
    %136 = arith.cmpi sge, %133, %135 : vector<1x256xi32>
    %c16_i32 = arith.constant 16 : i32
    %137 = vector.broadcast %c16_i32 : i32 to vector<1x256xi32>
    %138 = arith.cmpi slt, %133, %137 : vector<1x256xi32>
    %139 = arith.andi %136, %138 : vector<1x256xi1>
    %c0_i32_50 = arith.constant 0 : i32
    %140 = vector.broadcast %c0_i32_50 : i32 to vector<1x256xi32>
    %141 = arith.cmpi sge, %134, %140 : vector<1x256xi32>
    %142 = arith.andi %139, %141 : vector<1x256xi1>
    %c16_i32_51 = arith.constant 16 : i32
    %143 = vector.broadcast %c16_i32_51 : i32 to vector<1x256xi32>
    %144 = arith.cmpi slt, %134, %143 : vector<1x256xi32>
    %145 = arith.andi %142, %144 : vector<1x256xi1>
    %146 = vector.broadcast %31 : vector<16x1xi32> to vector<16x256xi32>
    %147 = vector.broadcast %133 : vector<1x256xi32> to vector<16x256xi32>
    %148 = arith.cmpi eq, %146, %147 : vector<16x256xi32>
    %149 = vector.broadcast %145 : vector<1x256xi1> to vector<16x256xi1>
    %150 = arith.andi %148, %149 : vector<16x256xi1>
    %151 = arith.extui %150 : vector<16x256xi1> to vector<16x256xi32>
    %152 = arith.sitofp %151 : vector<16x256xi32> to vector<16x256xf32>
    %153 = vector.broadcast %32 : vector<16x1xi32> to vector<16x256xi32>
    %154 = vector.broadcast %134 : vector<1x256xi32> to vector<16x256xi32>
    %155 = arith.cmpi eq, %153, %154 : vector<16x256xi32>
    %156 = arith.extui %155 : vector<16x256xi1> to vector<16x256xi32>
    %157 = arith.sitofp %156 : vector<16x256xi32> to vector<16x256xf32>
    %c0_52 = arith.constant 0 : index
    %c0_53 = arith.constant 0 : index
    %c0_54 = arith.constant 0 : index
    %c0_55 = arith.constant 0 : index
    %158 = vector.load %arg5[%c0_52, %c0_53, %c0_54, %c0_55] : memref<1x8x32x16xf32, #tpu.memory_space<vmem>>, vector<1x1x32x16xf32>
    %159 = vector.shape_cast %158 : vector<1x1x32x16xf32> to vector<32x16xf32>
    %cst_56 = arith.constant dense<0.000000e+00> : vector<32x256xf32>
    %160 = tpu.matmul %159, %152, %cst_56 {dimension_numbers = #tpu.dot_dimension_numbers<[1], [0], [0], [1], [0, 0, 1, 1], [], []>} : vector<32x16xf32>, vector<16x256xf32>, vector<32x256xf32> -> vector<32x256xf32>
    %161 = vector.extract_strided_slice %160 {offsets = [0, 0], sizes = [16, 256], strides = [1, 1]} : vector<32x256xf32> to vector<16x256xf32>
    %162 = arith.mulf %161, %157 : vector<16x256xf32>
    %cst_57 = arith.constant dense<0.000000e+00> : vector<256xf32>
    %163 = vector.multi_reduction <add>, %162, %cst_57 [0] : vector<16x256xf32> to vector<256xf32>
    %164 = vector.shape_cast %163 : vector<256xf32> to vector<1x256xf32>
    %165 = vector.extract_strided_slice %160 {offsets = [16, 0], sizes = [16, 256], strides = [1, 1]} : vector<32x256xf32> to vector<16x256xf32>
    %166 = arith.mulf %165, %157 : vector<16x256xf32>
    %cst_58 = arith.constant dense<0.000000e+00> : vector<256xf32>
    %167 = vector.multi_reduction <add>, %166, %cst_58 [0] : vector<16x256xf32> to vector<256xf32>
    %168 = vector.shape_cast %167 : vector<256xf32> to vector<1x256xf32>
    %169 = vector.extract_strided_slice %164 {offsets = [0, 0], sizes = [1, 128], strides = [1, 1]} : vector<1x256xf32> to vector<1x128xf32>
    %170 = arith.addf %169, %44 : vector<1x128xf32>
    %171 = vector.extract_strided_slice %168 {offsets = [0, 0], sizes = [1, 128], strides = [1, 1]} : vector<1x256xf32> to vector<1x128xf32>
    %172 = vector.extract_strided_slice %164 {offsets = [0, 128], sizes = [1, 128], strides = [1, 1]} : vector<1x256xf32> to vector<1x128xf32>
    %173 = arith.addf %172, %90 : vector<1x128xf32>
    %174 = vector.extract_strided_slice %168 {offsets = [0, 128], sizes = [1, 128], strides = [1, 1]} : vector<1x256xf32> to vector<1x128xf32>
    %c0_59 = arith.constant 0 : index
    %175 = memref.load %arg8[%c0_59] : memref<3xf32, #tpu.memory_space<smem>>
    %c0_60 = arith.constant 0 : index
    %c0_61 = arith.constant 0 : index
    %176 = memref.load %arg7[%c0_60, %c0_61] : memref<3x3xf32, #tpu.memory_space<smem>>
    %177 = vector.broadcast %176 : f32 to vector<1x128xf32>
    %178 = arith.mulf %177, %40 : vector<1x128xf32>
    %179 = vector.broadcast %175 : f32 to vector<1x128xf32>
    %180 = arith.addf %179, %178 : vector<1x128xf32>
    %c0_62 = arith.constant 0 : index
    %c1_63 = arith.constant 1 : index
    %181 = memref.load %arg7[%c0_62, %c1_63] : memref<3x3xf32, #tpu.memory_space<smem>>
    %182 = vector.broadcast %181 : f32 to vector<1x128xf32>
    %183 = arith.mulf %182, %171 : vector<1x128xf32>
    %184 = arith.addf %180, %183 : vector<1x128xf32>
    %c0_64 = arith.constant 0 : index
    %c2 = arith.constant 2 : index
    %185 = memref.load %arg7[%c0_64, %c2] : memref<3x3xf32, #tpu.memory_space<smem>>
    %186 = vector.broadcast %185 : f32 to vector<1x128xf32>
    %187 = arith.mulf %186, %174 : vector<1x128xf32>
    %188 = arith.addf %184, %187 : vector<1x128xf32>
    %c1_65 = arith.constant 1 : index
    %189 = memref.load %arg8[%c1_65] : memref<3xf32, #tpu.memory_space<smem>>
    %c1_66 = arith.constant 1 : index
    %c0_67 = arith.constant 0 : index
    %190 = memref.load %arg7[%c1_66, %c0_67] : memref<3x3xf32, #tpu.memory_space<smem>>
    %191 = vector.broadcast %190 : f32 to vector<1x128xf32>
    %192 = arith.mulf %191, %40 : vector<1x128xf32>
    %193 = vector.broadcast %189 : f32 to vector<1x128xf32>
    %194 = arith.addf %193, %192 : vector<1x128xf32>
    %c1_68 = arith.constant 1 : index
    %c1_69 = arith.constant 1 : index
    %195 = memref.load %arg7[%c1_68, %c1_69] : memref<3x3xf32, #tpu.memory_space<smem>>
    %196 = vector.broadcast %195 : f32 to vector<1x128xf32>
    %197 = arith.mulf %196, %171 : vector<1x128xf32>
    %198 = arith.addf %194, %197 : vector<1x128xf32>
    %c1_70 = arith.constant 1 : index
    %c2_71 = arith.constant 2 : index
    %199 = memref.load %arg7[%c1_70, %c2_71] : memref<3x3xf32, #tpu.memory_space<smem>>
    %200 = vector.broadcast %199 : f32 to vector<1x128xf32>
    %201 = arith.mulf %200, %174 : vector<1x128xf32>
    %202 = arith.addf %198, %201 : vector<1x128xf32>
    %c2_72 = arith.constant 2 : index
    %203 = memref.load %arg8[%c2_72] : memref<3xf32, #tpu.memory_space<smem>>
    %c2_73 = arith.constant 2 : index
    %c0_74 = arith.constant 0 : index
    %204 = memref.load %arg7[%c2_73, %c0_74] : memref<3x3xf32, #tpu.memory_space<smem>>
    %205 = vector.broadcast %204 : f32 to vector<1x128xf32>
    %206 = arith.mulf %205, %40 : vector<1x128xf32>
    %207 = vector.broadcast %203 : f32 to vector<1x128xf32>
    %208 = arith.addf %207, %206 : vector<1x128xf32>
    %c2_75 = arith.constant 2 : index
    %c1_76 = arith.constant 1 : index
    %209 = memref.load %arg7[%c2_75, %c1_76] : memref<3x3xf32, #tpu.memory_space<smem>>
    %210 = vector.broadcast %209 : f32 to vector<1x128xf32>
    %211 = arith.mulf %210, %171 : vector<1x128xf32>
    %212 = arith.addf %208, %211 : vector<1x128xf32>
    %c2_77 = arith.constant 2 : index
    %c2_78 = arith.constant 2 : index
    %213 = memref.load %arg7[%c2_77, %c2_78] : memref<3x3xf32, #tpu.memory_space<smem>>
    %214 = vector.broadcast %213 : f32 to vector<1x128xf32>
    %215 = arith.mulf %214, %174 : vector<1x128xf32>
    %216 = arith.addf %212, %215 : vector<1x128xf32>
    %217 = arith.maximumf %188, %202 : vector<1x128xf32>
    %218 = arith.maximumf %217, %216 : vector<1x128xf32>
    %219 = arith.subf %188, %218 : vector<1x128xf32>
    %220 = math.exp %219 : vector<1x128xf32>
    %221 = arith.subf %202, %218 : vector<1x128xf32>
    %222 = math.exp %221 : vector<1x128xf32>
    %223 = arith.subf %216, %218 : vector<1x128xf32>
    %224 = math.exp %223 : vector<1x128xf32>
    %225 = arith.addf %220, %222 : vector<1x128xf32>
    %226 = arith.addf %225, %224 : vector<1x128xf32>
    %cst_79 = arith.constant 1.000000e+00 : f32
    %227 = vector.broadcast %cst_79 : f32 to vector<1x128xf32>
    %228 = arith.divf %227, %226 : vector<1x128xf32>
    %229 = arith.mulf %220, %228 : vector<1x128xf32>
    %c0_80 = arith.constant 0 : index
    %c0_81 = arith.constant 0 : index
    %c0_82 = arith.constant 0 : index
    %c0_83 = arith.constant 0 : index
    %230 = vector.load %arg10[%c0_80, %c0_81, %c0_82, %c0_83] : memref<1x3x8x128xf32, #tpu.memory_space<vmem>>, vector<1x1x1x128xf32>
    %231 = vector.shape_cast %230 : vector<1x1x1x128xf32> to vector<1x128xf32>
    %232 = vector.shape_cast %229 : vector<1x128xf32> to vector<1x1x1x128xf32>
    tpu.vector_store %arg10[%c0_80, %c0_81, %c0_82, %c0_83], %232 {strides = array<i32>} : memref<1x3x8x128xf32, #tpu.memory_space<vmem>>, vector<1x1x1x128xf32>,
    %233 = arith.mulf %229, %39 : vector<1x128xf32>
    %234 = arith.mulf %222, %228 : vector<1x128xf32>
    %c0_84 = arith.constant 0 : index
    %c1_85 = arith.constant 1 : index
    %c0_86 = arith.constant 0 : index
    %c0_87 = arith.constant 0 : index
    %235 = vector.load %arg10[%c0_84, %c1_85, %c0_86, %c0_87] : memref<1x3x8x128xf32, #tpu.memory_space<vmem>>, vector<1x1x1x128xf32>
    %236 = vector.shape_cast %235 : vector<1x1x1x128xf32> to vector<1x128xf32>
    %237 = vector.shape_cast %234 : vector<1x128xf32> to vector<1x1x1x128xf32>
    tpu.vector_store %arg10[%c0_84, %c1_85, %c0_86, %c0_87], %237 {strides = array<i32>} : memref<1x3x8x128xf32, #tpu.memory_space<vmem>>, vector<1x1x1x128xf32>,
    %238 = arith.mulf %234, %170 : vector<1x128xf32>
    %239 = arith.addf %233, %238 : vector<1x128xf32>
    %240 = arith.mulf %224, %228 : vector<1x128xf32>
    %c0_88 = arith.constant 0 : index
    %c2_89 = arith.constant 2 : index
    %c0_90 = arith.constant 0 : index
    %c0_91 = arith.constant 0 : index
    %241 = vector.load %arg10[%c0_88, %c2_89, %c0_90, %c0_91] : memref<1x3x8x128xf32, #tpu.memory_space<vmem>>, vector<1x1x1x128xf32>
    %242 = vector.shape_cast %241 : vector<1x1x1x128xf32> to vector<1x128xf32>
    %243 = vector.shape_cast %240 : vector<1x128xf32> to vector<1x1x1x128xf32>
    tpu.vector_store %arg10[%c0_88, %c2_89, %c0_90, %c0_91], %243 {strides = array<i32>} : memref<1x3x8x128xf32, #tpu.memory_space<vmem>>, vector<1x1x1x128xf32>,
    %244 = arith.mulf %240, %173 : vector<1x128xf32>
    %245 = arith.addf %239, %244 : vector<1x128xf32>
    %cst_92 = arith.constant 0.000000e+00 : f32
    %246 = vector.broadcast %cst_92 : f32 to vector<1x128xf32>
    %247 = arith.maximumf %245, %246 : vector<1x128xf32>
    %c0_93 = arith.constant 0 : index
    %c0_94 = arith.constant 0 : index
    %c0_95 = arith.constant 0 : index
    %248 = vector.load %arg9[%c0_93, %c0_94, %c0_95] : memref<1x8x128xf32, #tpu.memory_space<vmem>>, vector<1x1x128xf32>
    %249 = vector.shape_cast %248 : vector<1x1x128xf32> to vector<1x128xf32>
    %250 = vector.shape_cast %247 : vector<1x128xf32> to vector<1x1x128xf32>
    tpu.vector_store %arg9[%c0_93, %c0_94, %c0_95], %250 {strides = array<i32>} : memref<1x8x128xf32, #tpu.memory_space<vmem>>, vector<1x1x128xf32>,
    %c8_i32_96 = arith.constant 8 : i32
    %251 = arith.muli %arg1, %c8_i32_96 : i32
    %c1_i32 = arith.constant 1 : i32
    %252 = arith.addi %251, %c1_i32 : i32
    %c0_97 = arith.constant 0 : index
    %253 = arith.index_cast %252 : i32 to index
    %254 = memref.load %arg6[%c0_97, %253] : memref<2x8xf32, #tpu.memory_space<smem>>
    %c1_98 = arith.constant 1 : index
    %255 = arith.index_cast %252 : i32 to index
    %256 = memref.load %arg6[%c1_98, %255] : memref<2x8xf32, #tpu.memory_space<smem>>
    %257 = vector.extract_strided_slice %28 {offsets = [1, 0], sizes = [1, 128], strides = [1, 1]} : vector<8x128xf32> to vector<1x128xf32>
    %258 = vector.extract_strided_slice %30 {offsets = [1, 0], sizes = [1, 128], strides = [1, 1]} : vector<8x128xf32> to vector<1x128xf32>
    %cst_99 = arith.constant 1.000000e+00 : f32
    %259 = vector.broadcast %cst_99 : f32 to vector<1x128xf32>
    %260 = arith.subf %257, %259 : vector<1x128xf32>
    %cst_100 = arith.constant 2.000000e-01 : f32
    %261 = vector.broadcast %cst_100 : f32 to vector<1x128xf32>
    %262 = arith.mulf %260, %261 : vector<1x128xf32>
    %263 = vector.broadcast %254 : f32 to vector<1x128xf32>
    %264 = arith.mulf %263, %262 : vector<1x128xf32>
    %265 = arith.addf %26, %264 : vector<1x128xf32>
    %cst_101 = arith.constant 1.500000e+01 : f32
    %266 = vector.broadcast %cst_101 : f32 to vector<1x128xf32>
    %267 = arith.divf %265, %266 : vector<1x128xf32>
    %cst_102 = arith.constant 2.000000e+00 : f32
    %268 = vector.broadcast %cst_102 : f32 to vector<1x128xf32>
    %269 = arith.mulf %267, %268 : vector<1x128xf32>
    %cst_103 = arith.constant 1.000000e+00 : f32
    %270 = vector.broadcast %cst_103 : f32 to vector<1x128xf32>
    %271 = arith.subf %269, %270 : vector<1x128xf32>
    %272 = vector.broadcast %256 : f32 to vector<1x128xf32>
    %273 = arith.mulf %272, %262 : vector<1x128xf32>
    %274 = arith.addf %23, %273 : vector<1x128xf32>
    %cst_104 = arith.constant 1.500000e+01 : f32
    %275 = vector.broadcast %cst_104 : f32 to vector<1x128xf32>
    %276 = arith.divf %274, %275 : vector<1x128xf32>
    %cst_105 = arith.constant 2.000000e+00 : f32
    %277 = vector.broadcast %cst_105 : f32 to vector<1x128xf32>
    %278 = arith.mulf %276, %277 : vector<1x128xf32>
    %cst_106 = arith.constant 1.000000e+00 : f32
    %279 = vector.broadcast %cst_106 : f32 to vector<1x128xf32>
    %280 = arith.subf %278, %279 : vector<1x128xf32>
    %cst_107 = arith.constant 1.000000e+00 : f32
    %281 = vector.broadcast %cst_107 : f32 to vector<1x128xf32>
    %282 = arith.addf %271, %281 : vector<1x128xf32>
    %cst_108 = arith.constant 1.600000e+01 : f32
    %283 = vector.broadcast %cst_108 : f32 to vector<1x128xf32>
    %284 = arith.mulf %282, %283 : vector<1x128xf32>
    %cst_109 = arith.constant 1.000000e+00 : f32
    %285 = vector.broadcast %cst_109 : f32 to vector<1x128xf32>
    %286 = arith.subf %284, %285 : vector<1x128xf32>
    %cst_110 = arith.constant 5.000000e-01 : f32
    %287 = vector.broadcast %cst_110 : f32 to vector<1x128xf32>
    %288 = arith.mulf %286, %287 : vector<1x128xf32>
    %cst_111 = arith.constant 1.000000e+00 : f32
    %289 = vector.broadcast %cst_111 : f32 to vector<1x128xf32>
    %290 = arith.addf %280, %289 : vector<1x128xf32>
    %cst_112 = arith.constant 1.600000e+01 : f32
    %291 = vector.broadcast %cst_112 : f32 to vector<1x128xf32>
    %292 = arith.mulf %290, %291 : vector<1x128xf32>
    %cst_113 = arith.constant 1.000000e+00 : f32
    %293 = vector.broadcast %cst_113 : f32 to vector<1x128xf32>
    %294 = arith.subf %292, %293 : vector<1x128xf32>
    %cst_114 = arith.constant 5.000000e-01 : f32
    %295 = vector.broadcast %cst_114 : f32 to vector<1x128xf32>
    %296 = arith.mulf %294, %295 : vector<1x128xf32>
    %cst_115 = arith.constant 5.000000e-01 : f32
    %297 = vector.broadcast %cst_115 : f32 to vector<1x128xf32>
    %298 = arith.addf %288, %297 : vector<1x128xf32>
    %299 = math.floor %298 : vector<1x128xf32>
    %300 = arith.fptosi %299 : vector<1x128xf32> to vector<1x128xi32>
    %cst_116 = arith.constant 5.000000e-01 : f32
    %301 = vector.broadcast %cst_116 : f32 to vector<1x128xf32>
    %302 = arith.addf %296, %301 : vector<1x128xf32>
    %303 = math.floor %302 : vector<1x128xf32>
    %304 = arith.fptosi %303 : vector<1x128xf32> to vector<1x128xi32>
    %cst_117 = arith.constant 1.000000e+00 : f32
    %305 = vector.broadcast %cst_117 : f32 to vector<1x128xf32>
    %306 = arith.subf %257, %305 : vector<1x128xf32>
    %cst_118 = arith.constant 5.000000e-01 : f32
    %307 = vector.broadcast %cst_118 : f32 to vector<1x128xf32>
    %308 = arith.mulf %306, %307 : vector<1x128xf32>
    %309 = vector.broadcast %254 : f32 to vector<1x128xf32>
    %310 = arith.mulf %309, %308 : vector<1x128xf32>
    %311 = arith.addf %26, %310 : vector<1x128xf32>
    %cst_119 = arith.constant 1.500000e+01 : f32
    %312 = vector.broadcast %cst_119 : f32 to vector<1x128xf32>
    %313 = arith.divf %311, %312 : vector<1x128xf32>
    %cst_120 = arith.constant 2.000000e+00 : f32
    %314 = vector.broadcast %cst_120 : f32 to vector<1x128xf32>
    %315 = arith.mulf %313, %314 : vector<1x128xf32>
    %cst_121 = arith.constant 1.000000e+00 : f32
    %316 = vector.broadcast %cst_121 : f32 to vector<1x128xf32>
    %317 = arith.subf %315, %316 : vector<1x128xf32>
    %318 = vector.broadcast %256 : f32 to vector<1x128xf32>
    %319 = arith.mulf %318, %308 : vector<1x128xf32>
    %320 = arith.addf %23, %319 : vector<1x128xf32>
    %cst_122 = arith.constant 1.500000e+01 : f32
    %321 = vector.broadcast %cst_122 : f32 to vector<1x128xf32>
    %322 = arith.divf %320, %321 : vector<1x128xf32>
    %cst_123 = arith.constant 2.000000e+00 : f32
    %323 = vector.broadcast %cst_123 : f32 to vector<1x128xf32>
    %324 = arith.mulf %322, %323 : vector<1x128xf32>
    %cst_124 = arith.constant 1.000000e+00 : f32
    %325 = vector.broadcast %cst_124 : f32 to vector<1x128xf32>
    %326 = arith.subf %324, %325 : vector<1x128xf32>
    %cst_125 = arith.constant 1.000000e+00 : f32
    %327 = vector.broadcast %cst_125 : f32 to vector<1x128xf32>
    %328 = arith.addf %317, %327 : vector<1x128xf32>
    %cst_126 = arith.constant 1.600000e+01 : f32
    %329 = vector.broadcast %cst_126 : f32 to vector<1x128xf32>
    %330 = arith.mulf %328, %329 : vector<1x128xf32>
    %cst_127 = arith.constant 1.000000e+00 : f32
    %331 = vector.broadcast %cst_127 : f32 to vector<1x128xf32>
    %332 = arith.subf %330, %331 : vector<1x128xf32>
    %cst_128 = arith.constant 5.000000e-01 : f32
    %333 = vector.broadcast %cst_128 : f32 to vector<1x128xf32>
    %334 = arith.mulf %332, %333 : vector<1x128xf32>
    %cst_129 = arith.constant 1.000000e+00 : f32
    %335 = vector.broadcast %cst_129 : f32 to vector<1x128xf32>
    %336 = arith.addf %326, %335 : vector<1x128xf32>
    %cst_130 = arith.constant 1.600000e+01 : f32
    %337 = vector.broadcast %cst_130 : f32 to vector<1x128xf32>
    %338 = arith.mulf %336, %337 : vector<1x128xf32>
    %cst_131 = arith.constant 1.000000e+00 : f32
    %339 = vector.broadcast %cst_131 : f32 to vector<1x128xf32>
    %340 = arith.subf %338, %339 : vector<1x128xf32>
    %cst_132 = arith.constant 5.000000e-01 : f32
    %341 = vector.broadcast %cst_132 : f32 to vector<1x128xf32>
    %342 = arith.mulf %340, %341 : vector<1x128xf32>
    %cst_133 = arith.constant 5.000000e-01 : f32
    %343 = vector.broadcast %cst_133 : f32 to vector<1x128xf32>
    %344 = arith.addf %334, %343 : vector<1x128xf32>
    %345 = math.floor %344 : vector<1x128xf32>
    %346 = arith.fptosi %345 : vector<1x128xf32> to vector<1x128xi32>
    %cst_134 = arith.constant 5.000000e-01 : f32
    %347 = vector.broadcast %cst_134 : f32 to vector<1x128xf32>
    %348 = arith.addf %342, %347 : vector<1x128xf32>
    %349 = math.floor %348 : vector<1x128xf32>
    %350 = arith.fptosi %349 : vector<1x128xf32> to vector<1x128xi32>
    %351 = tpu.concatenate %300, %346 in 1 : vector<1x128xi32>, vector<1x128xi32> -> vector<1x256xi32>
    %352 = tpu.concatenate %304, %350 in 1 : vector<1x128xi32>, vector<1x128xi32> -> vector<1x256xi32>
    %c0_i32_135 = arith.constant 0 : i32
    %353 = vector.broadcast %c0_i32_135 : i32 to vector<1x256xi32>
    %354 = arith.cmpi sge, %351, %353 : vector<1x256xi32>
    %c16_i32_136 = arith.constant 16 : i32
    %355 = vector.broadcast %c16_i32_136 : i32 to vector<1x256xi32>
    %356 = arith.cmpi slt, %351, %355 : vector<1x256xi32>
    %357 = arith.andi %354, %356 : vector<1x256xi1>
    %c0_i32_137 = arith.constant 0 : i32
    %358 = vector.broadcast %c0_i32_137 : i32 to vector<1x256xi32>
    %359 = arith.cmpi sge, %352, %358 : vector<1x256xi32>
    %360 = arith.andi %357, %359 : vector<1x256xi1>
    %c16_i32_138 = arith.constant 16 : i32
    %361 = vector.broadcast %c16_i32_138 : i32 to vector<1x256xi32>
    %362 = arith.cmpi slt, %352, %361 : vector<1x256xi32>
    %363 = arith.andi %360, %362 : vector<1x256xi1>
    %364 = vector.broadcast %31 : vector<16x1xi32> to vector<16x256xi32>
    %365 = vector.broadcast %351 : vector<1x256xi32> to vector<16x256xi32>
    %366 = arith.cmpi eq, %364, %365 : vector<16x256xi32>
    %367 = vector.broadcast %363 : vector<1x256xi1> to vector<16x256xi1>
    %368 = arith.andi %366, %367 : vector<16x256xi1>
    %369 = arith.extui %368 : vector<16x256xi1> to vector<16x256xi32>
    %370 = arith.sitofp %369 : vector<16x256xi32> to vector<16x256xf32>
    %371 = vector.broadcast %32 : vector<16x1xi32> to vector<16x256xi32>
    %372 = vector.broadcast %352 : vector<1x256xi32> to vector<16x256xi32>
    %373 = arith.cmpi eq, %371, %372 : vector<16x256xi32>
    %374 = arith.extui %373 : vector<16x256xi1> to vector<16x256xi32>
    %375 = arith.sitofp %374 : vector<16x256xi32> to vector<16x256xf32>
    %c0_139 = arith.constant 0 : index
    %c1_140 = arith.constant 1 : index
    %c0_141 = arith.constant 0 : index
    %c0_142 = arith.constant 0 : index
    %376 = vector.load %arg5[%c0_139, %c1_140, %c0_141, %c0_142] : memref<1x8x32x16xf32, #tpu.memory_space<vmem>>, vector<1x1x32x16xf32>
    %377 = vector.shape_cast %376 : vector<1x1x32x16xf32> to vector<32x16xf32>
    %cst_143 = arith.constant dense<0.000000e+00> : vector<32x256xf32>
    %378 = tpu.matmul %377, %370, %cst_143 {dimension_numbers = #tpu.dot_dimension_numbers<[1], [0], [0], [1], [0, 0, 1, 1], [], []>} : vector<32x16xf32>, vector<16x256xf32>, vector<32x256xf32> -> vector<32x256xf32>
    %379 = vector.extract_strided_slice %378 {offsets = [0, 0], sizes = [16, 256], strides = [1, 1]} : vector<32x256xf32> to vector<16x256xf32>
    %380 = arith.mulf %379, %375 : vector<16x256xf32>
    %cst_144 = arith.constant dense<0.000000e+00> : vector<256xf32>
    %381 = vector.multi_reduction <add>, %380, %cst_144 [0] : vector<16x256xf32> to vector<256xf32>
    %382 = vector.shape_cast %381 : vector<256xf32> to vector<1x256xf32>
    %383 = vector.extract_strided_slice %378 {offsets = [16, 0], sizes = [16, 256], strides = [1, 1]} : vector<32x256xf32> to vector<16x256xf32>
    %384 = arith.mulf %383, %375 : vector<16x256xf32>
    %cst_145 = arith.constant dense<0.000000e+00> : vector<256xf32>
    %385 = vector.multi_reduction <add>, %384, %cst_145 [0] : vector<16x256xf32> to vector<256xf32>
    %386 = vector.shape_cast %385 : vector<256xf32> to vector<1x256xf32>
    %387 = vector.extract_strided_slice %382 {offsets = [0, 0], sizes = [1, 128], strides = [1, 1]} : vector<1x256xf32> to vector<1x128xf32>
    %388 = arith.addf %387, %262 : vector<1x128xf32>
    %389 = vector.extract_strided_slice %386 {offsets = [0, 0], sizes = [1, 128], strides = [1, 1]} : vector<1x256xf32> to vector<1x128xf32>
    %390 = vector.extract_strided_slice %382 {offsets = [0, 128], sizes = [1, 128], strides = [1, 1]} : vector<1x256xf32> to vector<1x128xf32>
    %391 = arith.addf %390, %308 : vector<1x128xf32>
    %392 = vector.extract_strided_slice %386 {offsets = [0, 128], sizes = [1, 128], strides = [1, 1]} : vector<1x256xf32> to vector<1x128xf32>
    %c0_146 = arith.constant 0 : index
    %393 = memref.load %arg8[%c0_146] : memref<3xf32, #tpu.memory_space<smem>>
    %c0_147 = arith.constant 0 : index
    %c0_148 = arith.constant 0 : index
    %394 = memref.load %arg7[%c0_147, %c0_148] : memref<3x3xf32, #tpu.memory_space<smem>>
    %395 = vector.broadcast %394 : f32 to vector<1x128xf32>
    %396 = arith.mulf %395, %258 : vector<1x128xf32>
    %397 = vector.broadcast %393 : f32 to vector<1x128xf32>
    %398 = arith.addf %397, %396 : vector<1x128xf32>
    %c0_149 = arith.constant 0 : index
    %c1_150 = arith.constant 1 : index
    %399 = memref.load %arg7[%c0_149, %c1_150] : memref<3x3xf32, #tpu.memory_space<smem>>
    %400 = vector.broadcast %399 : f32 to vector<1x128xf32>
    %401 = arith.mulf %400, %389 : vector<1x128xf32>
    %402 = arith.addf %398, %401 : vector<1x128xf32>
    %c0_151 = arith.constant 0 : index
    %c2_152 = arith.constant 2 : index
    %403 = memref.load %arg7[%c0_151, %c2_152] : memref<3x3xf32, #tpu.memory_space<smem>>
    %404 = vector.broadcast %403 : f32 to vector<1x128xf32>
    %405 = arith.mulf %404, %392 : vector<1x128xf32>
    %406 = arith.addf %402, %405 : vector<1x128xf32>
    %c1_153 = arith.constant 1 : index
    %407 = memref.load %arg8[%c1_153] : memref<3xf32, #tpu.memory_space<smem>>
    %c1_154 = arith.constant 1 : index
    %c0_155 = arith.constant 0 : index
    %408 = memref.load %arg7[%c1_154, %c0_155] : memref<3x3xf32, #tpu.memory_space<smem>>
    %409 = vector.broadcast %408 : f32 to vector<1x128xf32>
    %410 = arith.mulf %409, %258 : vector<1x128xf32>
    %411 = vector.broadcast %407 : f32 to vector<1x128xf32>
    %412 = arith.addf %411, %410 : vector<1x128xf32>
    %c1_156 = arith.constant 1 : index
    %c1_157 = arith.constant 1 : index
    %413 = memref.load %arg7[%c1_156, %c1_157] : memref<3x3xf32, #tpu.memory_space<smem>>
    %414 = vector.broadcast %413 : f32 to vector<1x128xf32>
    %415 = arith.mulf %414, %389 : vector<1x128xf32>
    %416 = arith.addf %412, %415 : vector<1x128xf32>
    %c1_158 = arith.constant 1 : index
    %c2_159 = arith.constant 2 : index
    %417 = memref.load %arg7[%c1_158, %c2_159] : memref<3x3xf32, #tpu.memory_space<smem>>
    %418 = vector.broadcast %417 : f32 to vector<1x128xf32>
    %419 = arith.mulf %418, %392 : vector<1x128xf32>
    %420 = arith.addf %416, %419 : vector<1x128xf32>
    %c2_160 = arith.constant 2 : index
    %421 = memref.load %arg8[%c2_160] : memref<3xf32, #tpu.memory_space<smem>>
    %c2_161 = arith.constant 2 : index
    %c0_162 = arith.constant 0 : index
    %422 = memref.load %arg7[%c2_161, %c0_162] : memref<3x3xf32, #tpu.memory_space<smem>>
    %423 = vector.broadcast %422 : f32 to vector<1x128xf32>
    %424 = arith.mulf %423, %258 : vector<1x128xf32>
    %425 = vector.broadcast %421 : f32 to vector<1x128xf32>
    %426 = arith.addf %425, %424 : vector<1x128xf32>
    %c2_163 = arith.constant 2 : index
    %c1_164 = arith.constant 1 : index
    %427 = memref.load %arg7[%c2_163, %c1_164] : memref<3x3xf32, #tpu.memory_space<smem>>
    %428 = vector.broadcast %427 : f32 to vector<1x128xf32>
    %429 = arith.mulf %428, %389 : vector<1x128xf32>
    %430 = arith.addf %426, %429 : vector<1x128xf32>
    %c2_165 = arith.constant 2 : index
    %c2_166 = arith.constant 2 : index
    %431 = memref.load %arg7[%c2_165, %c2_166] : memref<3x3xf32, #tpu.memory_space<smem>>
    %432 = vector.broadcast %431 : f32 to vector<1x128xf32>
    %433 = arith.mulf %432, %392 : vector<1x128xf32>
    %434 = arith.addf %430, %433 : vector<1x128xf32>
    %435 = arith.maximumf %406, %420 : vector<1x128xf32>
    %436 = arith.maximumf %435, %434 : vector<1x128xf32>
    %437 = arith.subf %406, %436 : vector<1x128xf32>
    %438 = math.exp %437 : vector<1x128xf32>
    %439 = arith.subf %420, %436 : vector<1x128xf32>
    %440 = math.exp %439 : vector<1x128xf32>
    %441 = arith.subf %434, %436 : vector<1x128xf32>
    %442 = math.exp %441 : vector<1x128xf32>
    %443 = arith.addf %438, %440 : vector<1x128xf32>
    %444 = arith.addf %443, %442 : vector<1x128xf32>
    %cst_167 = arith.constant 1.000000e+00 : f32
    %445 = vector.broadcast %cst_167 : f32 to vector<1x128xf32>
    %446 = arith.divf %445, %444 : vector<1x128xf32>
    %447 = arith.mulf %438, %446 : vector<1x128xf32>
    %c0_168 = arith.constant 0 : index
    %c0_169 = arith.constant 0 : index
    %c1_170 = arith.constant 1 : index
    %c0_171 = arith.constant 0 : index
    %448 = vector.load %arg10[%c0_168, %c0_169, %c1_170, %c0_171] : memref<1x3x8x128xf32, #tpu.memory_space<vmem>>, vector<1x1x1x128xf32>
    %449 = vector.shape_cast %448 : vector<1x1x1x128xf32> to vector<1x128xf32>
    %450 = vector.shape_cast %447 : vector<1x128xf32> to vector<1x1x1x128xf32>
    tpu.vector_store %arg10[%c0_168, %c0_169, %c1_170, %c0_171], %450 {strides = array<i32>} : memref<1x3x8x128xf32, #tpu.memory_space<vmem>>, vector<1x1x1x128xf32>,
    %451 = arith.mulf %447, %257 : vector<1x128xf32>
    %452 = arith.mulf %440, %446 : vector<1x128xf32>
    %c0_172 = arith.constant 0 : index
    %c1_173 = arith.constant 1 : index
    %c1_174 = arith.constant 1 : index
    %c0_175 = arith.constant 0 : index
    %453 = vector.load %arg10[%c0_172, %c1_173, %c1_174, %c0_175] : memref<1x3x8x128xf32, #tpu.memory_space<vmem>>, vector<1x1x1x128xf32>
    %454 = vector.shape_cast %453 : vector<1x1x1x128xf32> to vector<1x128xf32>
    %455 = vector.shape_cast %452 : vector<1x128xf32> to vector<1x1x1x128xf32>
    tpu.vector_store %arg10[%c0_172, %c1_173, %c1_174, %c0_175], %455 {strides = array<i32>} : memref<1x3x8x128xf32, #tpu.memory_space<vmem>>, vector<1x1x1x128xf32>,
    %456 = arith.mulf %452, %388 : vector<1x128xf32>
    %457 = arith.addf %451, %456 : vector<1x128xf32>
    %458 = arith.mulf %442, %446 : vector<1x128xf32>
    %c0_176 = arith.constant 0 : index
    %c2_177 = arith.constant 2 : index
    %c1_178 = arith.constant 1 : index
    %c0_179 = arith.constant 0 : index
    %459 = vector.load %arg10[%c0_176, %c2_177, %c1_178, %c0_179] : memref<1x3x8x128xf32, #tpu.memory_space<vmem>>, vector<1x1x1x128xf32>
    %460 = vector.shape_cast %459 : vector<1x1x1x128xf32> to vector<1x128xf32>
    %461 = vector.shape_cast %458 : vector<1x128xf32> to vector<1x1x1x128xf32>
    tpu.vector_store %arg10[%c0_176, %c2_177, %c1_178, %c0_179], %461 {strides = array<i32>} : memref<1x3x8x128xf32, #tpu.memory_space<vmem>>, vector<1x1x1x128xf32>,
    %462 = arith.mulf %458, %391 : vector<1x128xf32>
    %463 = arith.addf %457, %462 : vector<1x128xf32>
    %cst_180 = arith.constant 0.000000e+00 : f32
    %464 = vector.broadcast %cst_180 : f32 to vector<1x128xf32>
    %465 = arith.maximumf %463, %464 : vector<1x128xf32>
    %c0_181 = arith.constant 0 : index
    %c1_182 = arith.constant 1 : index
    %c0_183 = arith.constant 0 : index
    %466 = vector.load %arg9[%c0_181, %c1_182, %c0_183] : memref<1x8x128xf32, #tpu.memory_space<vmem>>, vector<1x1x128xf32>
    %467 = vector.shape_cast %466 : vector<1x1x128xf32> to vector<1x128xf32>
    %468 = vector.shape_cast %465 : vector<1x128xf32> to vector<1x1x128xf32>
    tpu.vector_store %arg9[%c0_181, %c1_182, %c0_183], %468 {strides = array<i32>} : memref<1x8x128xf32, #tpu.memory_space<vmem>>, vector<1x1x128xf32>,
    %c8_i32_184 = arith.constant 8 : i32
    %469 = arith.muli %arg1, %c8_i32_184 : i32
    %c2_i32 = arith.constant 2 : i32
    %470 = arith.addi %469, %c2_i32 : i32
    %c0_185 = arith.constant 0 : index
    %471 = arith.index_cast %470 : i32 to index
    %472 = memref.load %arg6[%c0_185, %471] : memref<2x8xf32, #tpu.memory_space<smem>>
    %c1_186 = arith.constant 1 : index
    %473 = arith.index_cast %470 : i32 to index
    %474 = memref.load %arg6[%c1_186, %473] : memref<2x8xf32, #tpu.memory_space<smem>>
    %475 = vector.extract_strided_slice %28 {offsets = [2, 0], sizes = [1, 128], strides = [1, 1]} : vector<8x128xf32> to vector<1x128xf32>
    %476 = vector.extract_strided_slice %30 {offsets = [2, 0], sizes = [1, 128], strides = [1, 1]} : vector<8x128xf32> to vector<1x128xf32>
    %cst_187 = arith.constant 1.000000e+00 : f32
    %477 = vector.broadcast %cst_187 : f32 to vector<1x128xf32>
    %478 = arith.subf %475, %477 : vector<1x128xf32>
    %cst_188 = arith.constant 2.000000e-01 : f32
    %479 = vector.broadcast %cst_188 : f32 to vector<1x128xf32>
    %480 = arith.mulf %478, %479 : vector<1x128xf32>
    %481 = vector.broadcast %472 : f32 to vector<1x128xf32>
    %482 = arith.mulf %481, %480 : vector<1x128xf32>
    %483 = arith.addf %26, %482 : vector<1x128xf32>
    %cst_189 = arith.constant 1.500000e+01 : f32
    %484 = vector.broadcast %cst_189 : f32 to vector<1x128xf32>
    %485 = arith.divf %483, %484 : vector<1x128xf32>
    %cst_190 = arith.constant 2.000000e+00 : f32
    %486 = vector.broadcast %cst_190 : f32 to vector<1x128xf32>
    %487 = arith.mulf %485, %486 : vector<1x128xf32>
    %cst_191 = arith.constant 1.000000e+00 : f32
    %488 = vector.broadcast %cst_191 : f32 to vector<1x128xf32>
    %489 = arith.subf %487, %488 : vector<1x128xf32>
    %490 = vector.broadcast %474 : f32 to vector<1x128xf32>
    %491 = arith.mulf %490, %480 : vector<1x128xf32>
    %492 = arith.addf %23, %491 : vector<1x128xf32>
    %cst_192 = arith.constant 1.500000e+01 : f32
    %493 = vector.broadcast %cst_192 : f32 to vector<1x128xf32>
    %494 = arith.divf %492, %493 : vector<1x128xf32>
    %cst_193 = arith.constant 2.000000e+00 : f32
    %495 = vector.broadcast %cst_193 : f32 to vector<1x128xf32>
    %496 = arith.mulf %494, %495 : vector<1x128xf32>
    %cst_194 = arith.constant 1.000000e+00 : f32
    %497 = vector.broadcast %cst_194 : f32 to vector<1x128xf32>
    %498 = arith.subf %496, %497 : vector<1x128xf32>
    %cst_195 = arith.constant 1.000000e+00 : f32
    %499 = vector.broadcast %cst_195 : f32 to vector<1x128xf32>
    %500 = arith.addf %489, %499 : vector<1x128xf32>
    %cst_196 = arith.constant 1.600000e+01 : f32
    %501 = vector.broadcast %cst_196 : f32 to vector<1x128xf32>
    %502 = arith.mulf %500, %501 : vector<1x128xf32>
    %cst_197 = arith.constant 1.000000e+00 : f32
    %503 = vector.broadcast %cst_197 : f32 to vector<1x128xf32>
    %504 = arith.subf %502, %503 : vector<1x128xf32>
    %cst_198 = arith.constant 5.000000e-01 : f32
    %505 = vector.broadcast %cst_198 : f32 to vector<1x128xf32>
    %506 = arith.mulf %504, %505 : vector<1x128xf32>
    %cst_199 = arith.constant 1.000000e+00 : f32
    %507 = vector.broadcast %cst_199 : f32 to vector<1x128xf32>
    %508 = arith.addf %498, %507 : vector<1x128xf32>
    %cst_200 = arith.constant 1.600000e+01 : f32
    %509 = vector.broadcast %cst_200 : f32 to vector<1x128xf32>
    %510 = arith.mulf %508, %509 : vector<1x128xf32>
    %cst_201 = arith.constant 1.000000e+00 : f32
    %511 = vector.broadcast %cst_201 : f32 to vector<1x128xf32>
    %512 = arith.subf %510, %511 : vector<1x128xf32>
    %cst_202 = arith.constant 5.000000e-01 : f32
    %513 = vector.broadcast %cst_202 : f32 to vector<1x128xf32>
    %514 = arith.mulf %512, %513 : vector<1x128xf32>
    %cst_203 = arith.constant 5.000000e-01 : f32
    %515 = vector.broadcast %cst_203 : f32 to vector<1x128xf32>
    %516 = arith.addf %506, %515 : vector<1x128xf32>
    %517 = math.floor %516 : vector<1x128xf32>
    %518 = arith.fptosi %517 : vector<1x128xf32> to vector<1x128xi32>
    %cst_204 = arith.constant 5.000000e-01 : f32
    %519 = vector.broadcast %cst_204 : f32 to vector<1x128xf32>
    %520 = arith.addf %514, %519 : vector<1x128xf32>
    %521 = math.floor %520 : vector<1x128xf32>
    %522 = arith.fptosi %521 : vector<1x128xf32> to vector<1x128xi32>
    %cst_205 = arith.constant 1.000000e+00 : f32
    %523 = vector.broadcast %cst_205 : f32 to vector<1x128xf32>
    %524 = arith.subf %475, %523 : vector<1x128xf32>
    %cst_206 = arith.constant 5.000000e-01 : f32
    %525 = vector.broadcast %cst_206 : f32 to vector<1x128xf32>
    %526 = arith.mulf %524, %525 : vector<1x128xf32>
    %527 = vector.broadcast %472 : f32 to vector<1x128xf32>
    %528 = arith.mulf %527, %526 : vector<1x128xf32>
    %529 = arith.addf %26, %528 : vector<1x128xf32>
    %cst_207 = arith.constant 1.500000e+01 : f32
    %530 = vector.broadcast %cst_207 : f32 to vector<1x128xf32>
    %531 = arith.divf %529, %530 : vector<1x128xf32>
    %cst_208 = arith.constant 2.000000e+00 : f32
    %532 = vector.broadcast %cst_208 : f32 to vector<1x128xf32>
    %533 = arith.mulf %531, %532 : vector<1x128xf32>
    %cst_209 = arith.constant 1.000000e+00 : f32
    %534 = vector.broadcast %cst_209 : f32 to vector<1x128xf32>
    %535 = arith.subf %533, %534 : vector<1x128xf32>
    %536 = vector.broadcast %474 : f32 to vector<1x128xf32>
    %537 = arith.mulf %536, %526 : vector<1x128xf32>
    %538 = arith.addf %23, %537 : vector<1x128xf32>
    %cst_210 = arith.constant 1.500000e+01 : f32
    %539 = vector.broadcast %cst_210 : f32 to vector<1x128xf32>
    %540 = arith.divf %538, %539 : vector<1x128xf32>
    %cst_211 = arith.constant 2.000000e+00 : f32
    %541 = vector.broadcast %cst_211 : f32 to vector<1x128xf32>
    %542 = arith.mulf %540, %541 : vector<1x128xf32>
    %cst_212 = arith.constant 1.000000e+00 : f32
    %543 = vector.broadcast %cst_212 : f32 to vector<1x128xf32>
    %544 = arith.subf %542, %543 : vector<1x128xf32>
    %cst_213 = arith.constant 1.000000e+00 : f32
    %545 = vector.broadcast %cst_213 : f32 to vector<1x128xf32>
    %546 = arith.addf %535, %545 : vector<1x128xf32>
    %cst_214 = arith.constant 1.600000e+01 : f32
    %547 = vector.broadcast %cst_214 : f32 to vector<1x128xf32>
    %548 = arith.mulf %546, %547 : vector<1x128xf32>
    %cst_215 = arith.constant 1.000000e+00 : f32
    %549 = vector.broadcast %cst_215 : f32 to vector<1x128xf32>
    %550 = arith.subf %548, %549 : vector<1x128xf32>
    %cst_216 = arith.constant 5.000000e-01 : f32
    %551 = vector.broadcast %cst_216 : f32 to vector<1x128xf32>
    %552 = arith.mulf %550, %551 : vector<1x128xf32>
    %cst_217 = arith.constant 1.000000e+00 : f32
    %553 = vector.broadcast %cst_217 : f32 to vector<1x128xf32>
    %554 = arith.addf %544, %553 : vector<1x128xf32>
    %cst_218 = arith.constant 1.600000e+01 : f32
    %555 = vector.broadcast %cst_218 : f32 to vector<1x128xf32>
    %556 = arith.mulf %554, %555 : vector<1x128xf32>
    %cst_219 = arith.constant 1.000000e+00 : f32
    %557 = vector.broadcast %cst_219 : f32 to vector<1x128xf32>
    %558 = arith.subf %556, %557 : vector<1x128xf32>
    %cst_220 = arith.constant 5.000000e-01 : f32
    %559 = vector.broadcast %cst_220 : f32 to vector<1x128xf32>
    %560 = arith.mulf %558, %559 : vector<1x128xf32>
    %cst_221 = arith.constant 5.000000e-01 : f32
    %561 = vector.broadcast %cst_221 : f32 to vector<1x128xf32>
    %562 = arith.addf %552, %561 : vector<1x128xf32>
    %563 = math.floor %562 : vector<1x128xf32>
    %564 = arith.fptosi %563 : vector<1x128xf32> to vector<1x128xi32>
    %cst_222 = arith.constant 5.000000e-01 : f32
    %565 = vector.broadcast %cst_222 : f32 to vector<1x128xf32>
    %566 = arith.addf %560, %565 : vector<1x128xf32>
    %567 = math.floor %566 : vector<1x128xf32>
    %568 = arith.fptosi %567 : vector<1x128xf32> to vector<1x128xi32>
    %569 = tpu.concatenate %518, %564 in 1 : vector<1x128xi32>, vector<1x128xi32> -> vector<1x256xi32>
    %570 = tpu.concatenate %522, %568 in 1 : vector<1x128xi32>, vector<1x128xi32> -> vector<1x256xi32>
    %c0_i32_223 = arith.constant 0 : i32
    %571 = vector.broadcast %c0_i32_223 : i32 to vector<1x256xi32>
    %572 = arith.cmpi sge, %569, %571 : vector<1x256xi32>
    %c16_i32_224 = arith.constant 16 : i32
    %573 = vector.broadcast %c16_i32_224 : i32 to vector<1x256xi32>
    %574 = arith.cmpi slt, %569, %573 : vector<1x256xi32>
    %575 = arith.andi %572, %574 : vector<1x256xi1>
    %c0_i32_225 = arith.constant 0 : i32
    %576 = vector.broadcast %c0_i32_225 : i32 to vector<1x256xi32>
    %577 = arith.cmpi sge, %570, %576 : vector<1x256xi32>
    %578 = arith.andi %575, %577 : vector<1x256xi1>
    %c16_i32_226 = arith.constant 16 : i32
    %579 = vector.broadcast %c16_i32_226 : i32 to vector<1x256xi32>
    %580 = arith.cmpi slt, %570, %579 : vector<1x256xi32>
    %581 = arith.andi %578, %580 : vector<1x256xi1>
    %582 = vector.broadcast %31 : vector<16x1xi32> to vector<16x256xi32>
    %583 = vector.broadcast %569 : vector<1x256xi32> to vector<16x256xi32>
    %584 = arith.cmpi eq, %582, %583 : vector<16x256xi32>
    %585 = vector.broadcast %581 : vector<1x256xi1> to vector<16x256xi1>
    %586 = arith.andi %584, %585 : vector<16x256xi1>
    %587 = arith.extui %586 : vector<16x256xi1> to vector<16x256xi32>
    %588 = arith.sitofp %587 : vector<16x256xi32> to vector<16x256xf32>
    %589 = vector.broadcast %32 : vector<16x1xi32> to vector<16x256xi32>
    %590 = vector.broadcast %570 : vector<1x256xi32> to vector<16x256xi32>
    %591 = arith.cmpi eq, %589, %590 : vector<16x256xi32>
    %592 = arith.extui %591 : vector<16x256xi1> to vector<16x256xi32>
    %593 = arith.sitofp %592 : vector<16x256xi32> to vector<16x256xf32>
    %c0_227 = arith.constant 0 : index
    %c2_228 = arith.constant 2 : index
    %c0_229 = arith.constant 0 : index
    %c0_230 = arith.constant 0 : index
    %594 = vector.load %arg5[%c0_227, %c2_228, %c0_229, %c0_230] : memref<1x8x32x16xf32, #tpu.memory_space<vmem>>, vector<1x1x32x16xf32>
    %595 = vector.shape_cast %594 : vector<1x1x32x16xf32> to vector<32x16xf32>
    %cst_231 = arith.constant dense<0.000000e+00> : vector<32x256xf32>
    %596 = tpu.matmul %595, %588, %cst_231 {dimension_numbers = #tpu.dot_dimension_numbers<[1], [0], [0], [1], [0, 0, 1, 1], [], []>} : vector<32x16xf32>, vector<16x256xf32>, vector<32x256xf32> -> vector<32x256xf32>
    %597 = vector.extract_strided_slice %596 {offsets = [0, 0], sizes = [16, 256], strides = [1, 1]} : vector<32x256xf32> to vector<16x256xf32>
    %598 = arith.mulf %597, %593 : vector<16x256xf32>
    %cst_232 = arith.constant dense<0.000000e+00> : vector<256xf32>
    %599 = vector.multi_reduction <add>, %598, %cst_232 [0] : vector<16x256xf32> to vector<256xf32>
    %600 = vector.shape_cast %599 : vector<256xf32> to vector<1x256xf32>
    %601 = vector.extract_strided_slice %596 {offsets = [16, 0], sizes = [16, 256], strides = [1, 1]} : vector<32x256xf32> to vector<16x256xf32>
    %602 = arith.mulf %601, %593 : vector<16x256xf32>
    %cst_233 = arith.constant dense<0.000000e+00> : vector<256xf32>
    %603 = vector.multi_reduction <add>, %602, %cst_233 [0] : vector<16x256xf32> to vector<256xf32>
    %604 = vector.shape_cast %603 : vector<256xf32> to vector<1x256xf32>
    %605 = vector.extract_strided_slice %600 {offsets = [0, 0], sizes = [1, 128], strides = [1, 1]} : vector<1x256xf32> to vector<1x128xf32>
    %606 = arith.addf %605, %480 : vector<1x128xf32>
    %607 = vector.extract_strided_slice %604 {offsets = [0, 0], sizes = [1, 128], strides = [1, 1]} : vector<1x256xf32> to vector<1x128xf32>
    %608 = vector.extract_strided_slice %600 {offsets = [0, 128], sizes = [1, 128], strides = [1, 1]} : vector<1x256xf32> to vector<1x128xf32>
    %609 = arith.addf %608, %526 : vector<1x128xf32>
    %610 = vector.extract_strided_slice %604 {offsets = [0, 128], sizes = [1, 128], strides = [1, 1]} : vector<1x256xf32> to vector<1x128xf32>
    %c0_234 = arith.constant 0 : index
    %611 = memref.load %arg8[%c0_234] : memref<3xf32, #tpu.memory_space<smem>>
    %c0_235 = arith.constant 0 : index
    %c0_236 = arith.constant 0 : index
    %612 = memref.load %arg7[%c0_235, %c0_236] : memref<3x3xf32, #tpu.memory_space<smem>>
    %613 = vector.broadcast %612 : f32 to vector<1x128xf32>
    %614 = arith.mulf %613, %476 : vector<1x128xf32>
    %615 = vector.broadcast %611 : f32 to vector<1x128xf32>
    %616 = arith.addf %615, %614 : vector<1x128xf32>
    %c0_237 = arith.constant 0 : index
    %c1_238 = arith.constant 1 : index
    %617 = memref.load %arg7[%c0_237, %c1_238] : memref<3x3xf32, #tpu.memory_space<smem>>
    %618 = vector.broadcast %617 : f32 to vector<1x128xf32>
    %619 = arith.mulf %618, %607 : vector<1x128xf32>
    %620 = arith.addf %616, %619 : vector<1x128xf32>
    %c0_239 = arith.constant 0 : index
    %c2_240 = arith.constant 2 : index
    %621 = memref.load %arg7[%c0_239, %c2_240] : memref<3x3xf32, #tpu.memory_space<smem>>
    %622 = vector.broadcast %621 : f32 to vector<1x128xf32>
    %623 = arith.mulf %622, %610 : vector<1x128xf32>
    %624 = arith.addf %620, %623 : vector<1x128xf32>
    %c1_241 = arith.constant 1 : index
    %625 = memref.load %arg8[%c1_241] : memref<3xf32, #tpu.memory_space<smem>>
    %c1_242 = arith.constant 1 : index
    %c0_243 = arith.constant 0 : index
    %626 = memref.load %arg7[%c1_242, %c0_243] : memref<3x3xf32, #tpu.memory_space<smem>>
    %627 = vector.broadcast %626 : f32 to vector<1x128xf32>
    %628 = arith.mulf %627, %476 : vector<1x128xf32>
    %629 = vector.broadcast %625 : f32 to vector<1x128xf32>
    %630 = arith.addf %629, %628 : vector<1x128xf32>
    %c1_244 = arith.constant 1 : index
    %c1_245 = arith.constant 1 : index
    %631 = memref.load %arg7[%c1_244, %c1_245] : memref<3x3xf32, #tpu.memory_space<smem>>
    %632 = vector.broadcast %631 : f32 to vector<1x128xf32>
    %633 = arith.mulf %632, %607 : vector<1x128xf32>
    %634 = arith.addf %630, %633 : vector<1x128xf32>
    %c1_246 = arith.constant 1 : index
    %c2_247 = arith.constant 2 : index
    %635 = memref.load %arg7[%c1_246, %c2_247] : memref<3x3xf32, #tpu.memory_space<smem>>
    %636 = vector.broadcast %635 : f32 to vector<1x128xf32>
    %637 = arith.mulf %636, %610 : vector<1x128xf32>
    %638 = arith.addf %634, %637 : vector<1x128xf32>
    %c2_248 = arith.constant 2 : index
    %639 = memref.load %arg8[%c2_248] : memref<3xf32, #tpu.memory_space<smem>>
    %c2_249 = arith.constant 2 : index
    %c0_250 = arith.constant 0 : index
    %640 = memref.load %arg7[%c2_249, %c0_250] : memref<3x3xf32, #tpu.memory_space<smem>>
    %641 = vector.broadcast %640 : f32 to vector<1x128xf32>
    %642 = arith.mulf %641, %476 : vector<1x128xf32>
    %643 = vector.broadcast %639 : f32 to vector<1x128xf32>
    %644 = arith.addf %643, %642 : vector<1x128xf32>
    %c2_251 = arith.constant 2 : index
    %c1_252 = arith.constant 1 : index
    %645 = memref.load %arg7[%c2_251, %c1_252] : memref<3x3xf32, #tpu.memory_space<smem>>
    %646 = vector.broadcast %645 : f32 to vector<1x128xf32>
    %647 = arith.mulf %646, %607 : vector<1x128xf32>
    %648 = arith.addf %644, %647 : vector<1x128xf32>
    %c2_253 = arith.constant 2 : index
    %c2_254 = arith.constant 2 : index
    %649 = memref.load %arg7[%c2_253, %c2_254] : memref<3x3xf32, #tpu.memory_space<smem>>
    %650 = vector.broadcast %649 : f32 to vector<1x128xf32>
    %651 = arith.mulf %650, %610 : vector<1x128xf32>
    %652 = arith.addf %648, %651 : vector<1x128xf32>
    %653 = arith.maximumf %624, %638 : vector<1x128xf32>
    %654 = arith.maximumf %653, %652 : vector<1x128xf32>
    %655 = arith.subf %624, %654 : vector<1x128xf32>
    %656 = math.exp %655 : vector<1x128xf32>
    %657 = arith.subf %638, %654 : vector<1x128xf32>
    %658 = math.exp %657 : vector<1x128xf32>
    %659 = arith.subf %652, %654 : vector<1x128xf32>
    %660 = math.exp %659 : vector<1x128xf32>
    %661 = arith.addf %656, %658 : vector<1x128xf32>
    %662 = arith.addf %661, %660 : vector<1x128xf32>
    %cst_255 = arith.constant 1.000000e+00 : f32
    %663 = vector.broadcast %cst_255 : f32 to vector<1x128xf32>
    %664 = arith.divf %663, %662 : vector<1x128xf32>
    %665 = arith.mulf %656, %664 : vector<1x128xf32>
    %c0_256 = arith.constant 0 : index
    %c0_257 = arith.constant 0 : index
    %c2_258 = arith.constant 2 : index
    %c0_259 = arith.constant 0 : index
    %666 = vector.load %arg10[%c0_256, %c0_257, %c2_258, %c0_259] : memref<1x3x8x128xf32, #tpu.memory_space<vmem>>, vector<1x1x1x128xf32>
    %667 = vector.shape_cast %666 : vector<1x1x1x128xf32> to vector<1x128xf32>
    %668 = vector.shape_cast %665 : vector<1x128xf32> to vector<1x1x1x128xf32>
    tpu.vector_store %arg10[%c0_256, %c0_257, %c2_258, %c0_259], %668 {strides = array<i32>} : memref<1x3x8x128xf32, #tpu.memory_space<vmem>>, vector<1x1x1x128xf32>,
    %669 = arith.mulf %665, %475 : vector<1x128xf32>
    %670 = arith.mulf %658, %664 : vector<1x128xf32>
    %c0_260 = arith.constant 0 : index
    %c1_261 = arith.constant 1 : index
    %c2_262 = arith.constant 2 : index
    %c0_263 = arith.constant 0 : index
    %671 = vector.load %arg10[%c0_260, %c1_261, %c2_262, %c0_263] : memref<1x3x8x128xf32, #tpu.memory_space<vmem>>, vector<1x1x1x128xf32>
    %672 = vector.shape_cast %671 : vector<1x1x1x128xf32> to vector<1x128xf32>
    %673 = vector.shape_cast %670 : vector<1x128xf32> to vector<1x1x1x128xf32>
    tpu.vector_store %arg10[%c0_260, %c1_261, %c2_262, %c0_263], %673 {strides = array<i32>} : memref<1x3x8x128xf32, #tpu.memory_space<vmem>>, vector<1x1x1x128xf32>,
    %674 = arith.mulf %670, %606 : vector<1x128xf32>
    %675 = arith.addf %669, %674 : vector<1x128xf32>
    %676 = arith.mulf %660, %664 : vector<1x128xf32>
    %c0_264 = arith.constant 0 : index
    %c2_265 = arith.constant 2 : index
    %c2_266 = arith.constant 2 : index
    %c0_267 = arith.constant 0 : index
    %677 = vector.load %arg10[%c0_264, %c2_265, %c2_266, %c0_267] : memref<1x3x8x128xf32, #tpu.memory_space<vmem>>, vector<1x1x1x128xf32>
    %678 = vector.shape_cast %677 : vector<1x1x1x128xf32> to vector<1x128xf32>
    %679 = vector.shape_cast %676 : vector<1x128xf32> to vector<1x1x1x128xf32>
    tpu.vector_store %arg10[%c0_264, %c2_265, %c2_266, %c0_267], %679 {strides = array<i32>} : memref<1x3x8x128xf32, #tpu.memory_space<vmem>>, vector<1x1x1x128xf32>,
    %680 = arith.mulf %676, %609 : vector<1x128xf32>
    %681 = arith.addf %675, %680 : vector<1x128xf32>
    %cst_268 = arith.constant 0.000000e+00 : f32
    %682 = vector.broadcast %cst_268 : f32 to vector<1x128xf32>
    %683 = arith.maximumf %681, %682 : vector<1x128xf32>
    %c0_269 = arith.constant 0 : index
    %c2_270 = arith.constant 2 : index
    %c0_271 = arith.constant 0 : index
    %684 = vector.load %arg9[%c0_269, %c2_270, %c0_271] : memref<1x8x128xf32, #tpu.memory_space<vmem>>, vector<1x1x128xf32>
    %685 = vector.shape_cast %684 : vector<1x1x128xf32> to vector<1x128xf32>
    %686 = vector.shape_cast %683 : vector<1x128xf32> to vector<1x1x128xf32>
    tpu.vector_store %arg9[%c0_269, %c2_270, %c0_271], %686 {strides = array<i32>} : memref<1x8x128xf32, #tpu.memory_space<vmem>>, vector<1x1x128xf32>,
    %c8_i32_272 = arith.constant 8 : i32
    %687 = arith.muli %arg1, %c8_i32_272 : i32
    %c3_i32 = arith.constant 3 : i32
    %688 = arith.addi %687, %c3_i32 : i32
    %c0_273 = arith.constant 0 : index
    %689 = arith.index_cast %688 : i32 to index
    %690 = memref.load %arg6[%c0_273, %689] : memref<2x8xf32, #tpu.memory_space<smem>>
    %c1_274 = arith.constant 1 : index
    %691 = arith.index_cast %688 : i32 to index
    %692 = memref.load %arg6[%c1_274, %691] : memref<2x8xf32, #tpu.memory_space<smem>>
    %693 = vector.extract_strided_slice %28 {offsets = [3, 0], sizes = [1, 128], strides = [1, 1]} : vector<8x128xf32> to vector<1x128xf32>
    %694 = vector.extract_strided_slice %30 {offsets = [3, 0], sizes = [1, 128], strides = [1, 1]} : vector<8x128xf32> to vector<1x128xf32>
    %cst_275 = arith.constant 1.000000e+00 : f32
    %695 = vector.broadcast %cst_275 : f32 to vector<1x128xf32>
    %696 = arith.subf %693, %695 : vector<1x128xf32>
    %cst_276 = arith.constant 2.000000e-01 : f32
    %697 = vector.broadcast %cst_276 : f32 to vector<1x128xf32>
    %698 = arith.mulf %696, %697 : vector<1x128xf32>
    %699 = vector.broadcast %690 : f32 to vector<1x128xf32>
    %700 = arith.mulf %699, %698 : vector<1x128xf32>
    %701 = arith.addf %26, %700 : vector<1x128xf32>
    %cst_277 = arith.constant 1.500000e+01 : f32
    %702 = vector.broadcast %cst_277 : f32 to vector<1x128xf32>
    %703 = arith.divf %701, %702 : vector<1x128xf32>
    %cst_278 = arith.constant 2.000000e+00 : f32
    %704 = vector.broadcast %cst_278 : f32 to vector<1x128xf32>
    %705 = arith.mulf %703, %704 : vector<1x128xf32>
    %cst_279 = arith.constant 1.000000e+00 : f32
    %706 = vector.broadcast %cst_279 : f32 to vector<1x128xf32>
    %707 = arith.subf %705, %706 : vector<1x128xf32>
    %708 = vector.broadcast %692 : f32 to vector<1x128xf32>
    %709 = arith.mulf %708, %698 : vector<1x128xf32>
    %710 = arith.addf %23, %709 : vector<1x128xf32>
    %cst_280 = arith.constant 1.500000e+01 : f32
    %711 = vector.broadcast %cst_280 : f32 to vector<1x128xf32>
    %712 = arith.divf %710, %711 : vector<1x128xf32>
    %cst_281 = arith.constant 2.000000e+00 : f32
    %713 = vector.broadcast %cst_281 : f32 to vector<1x128xf32>
    %714 = arith.mulf %712, %713 : vector<1x128xf32>
    %cst_282 = arith.constant 1.000000e+00 : f32
    %715 = vector.broadcast %cst_282 : f32 to vector<1x128xf32>
    %716 = arith.subf %714, %715 : vector<1x128xf32>
    %cst_283 = arith.constant 1.000000e+00 : f32
    %717 = vector.broadcast %cst_283 : f32 to vector<1x128xf32>
    %718 = arith.addf %707, %717 : vector<1x128xf32>
    %cst_284 = arith.constant 1.600000e+01 : f32
    %719 = vector.broadcast %cst_284 : f32 to vector<1x128xf32>
    %720 = arith.mulf %718, %719 : vector<1x128xf32>
    %cst_285 = arith.constant 1.000000e+00 : f32
    %721 = vector.broadcast %cst_285 : f32 to vector<1x128xf32>
    %722 = arith.subf %720, %721 : vector<1x128xf32>
    %cst_286 = arith.constant 5.000000e-01 : f32
    %723 = vector.broadcast %cst_286 : f32 to vector<1x128xf32>
    %724 = arith.mulf %722, %723 : vector<1x128xf32>
    %cst_287 = arith.constant 1.000000e+00 : f32
    %725 = vector.broadcast %cst_287 : f32 to vector<1x128xf32>
    %726 = arith.addf %716, %725 : vector<1x128xf32>
    %cst_288 = arith.constant 1.600000e+01 : f32
    %727 = vector.broadcast %cst_288 : f32 to vector<1x128xf32>
    %728 = arith.mulf %726, %727 : vector<1x128xf32>
    %cst_289 = arith.constant 1.000000e+00 : f32
    %729 = vector.broadcast %cst_289 : f32 to vector<1x128xf32>
    %730 = arith.subf %728, %729 : vector<1x128xf32>
    %cst_290 = arith.constant 5.000000e-01 : f32
    %731 = vector.broadcast %cst_290 : f32 to vector<1x128xf32>
    %732 = arith.mulf %730, %731 : vector<1x128xf32>
    %cst_291 = arith.constant 5.000000e-01 : f32
    %733 = vector.broadcast %cst_291 : f32 to vector<1x128xf32>
    %734 = arith.addf %724, %733 : vector<1x128xf32>
    %735 = math.floor %734 : vector<1x128xf32>
    %736 = arith.fptosi %735 : vector<1x128xf32> to vector<1x128xi32>
    %cst_292 = arith.constant 5.000000e-01 : f32
    %737 = vector.broadcast %cst_292 : f32 to vector<1x128xf32>
    %738 = arith.addf %732, %737 : vector<1x128xf32>
    %739 = math.floor %738 : vector<1x128xf32>
    %740 = arith.fptosi %739 : vector<1x128xf32> to vector<1x128xi32>
    %cst_293 = arith.constant 1.000000e+00 : f32
    %741 = vector.broadcast %cst_293 : f32 to vector<1x128xf32>
    %742 = arith.subf %693, %741 : vector<1x128xf32>
    %cst_294 = arith.constant 5.000000e-01 : f32
    %743 = vector.broadcast %cst_294 : f32 to vector<1x128xf32>
    %744 = arith.mulf %742, %743 : vector<1x128xf32>
    %745 = vector.broadcast %690 : f32 to vector<1x128xf32>
    %746 = arith.mulf %745, %744 : vector<1x128xf32>
    %747 = arith.addf %26, %746 : vector<1x128xf32>
    %cst_295 = arith.constant 1.500000e+01 : f32
    %748 = vector.broadcast %cst_295 : f32 to vector<1x128xf32>
    %749 = arith.divf %747, %748 : vector<1x128xf32>
    %cst_296 = arith.constant 2.000000e+00 : f32
    %750 = vector.broadcast %cst_296 : f32 to vector<1x128xf32>
    %751 = arith.mulf %749, %750 : vector<1x128xf32>
    %cst_297 = arith.constant 1.000000e+00 : f32
    %752 = vector.broadcast %cst_297 : f32 to vector<1x128xf32>
    %753 = arith.subf %751, %752 : vector<1x128xf32>
    %754 = vector.broadcast %692 : f32 to vector<1x128xf32>
    %755 = arith.mulf %754, %744 : vector<1x128xf32>
    %756 = arith.addf %23, %755 : vector<1x128xf32>
    %cst_298 = arith.constant 1.500000e+01 : f32
    %757 = vector.broadcast %cst_298 : f32 to vector<1x128xf32>
    %758 = arith.divf %756, %757 : vector<1x128xf32>
    %cst_299 = arith.constant 2.000000e+00 : f32
    %759 = vector.broadcast %cst_299 : f32 to vector<1x128xf32>
    %760 = arith.mulf %758, %759 : vector<1x128xf32>
    %cst_300 = arith.constant 1.000000e+00 : f32
    %761 = vector.broadcast %cst_300 : f32 to vector<1x128xf32>
    %762 = arith.subf %760, %761 : vector<1x128xf32>
    %cst_301 = arith.constant 1.000000e+00 : f32
    %763 = vector.broadcast %cst_301 : f32 to vector<1x128xf32>
    %764 = arith.addf %753, %763 : vector<1x128xf32>
    %cst_302 = arith.constant 1.600000e+01 : f32
    %765 = vector.broadcast %cst_302 : f32 to vector<1x128xf32>
    %766 = arith.mulf %764, %765 : vector<1x128xf32>
    %cst_303 = arith.constant 1.000000e+00 : f32
    %767 = vector.broadcast %cst_303 : f32 to vector<1x128xf32>
    %768 = arith.subf %766, %767 : vector<1x128xf32>
    %cst_304 = arith.constant 5.000000e-01 : f32
    %769 = vector.broadcast %cst_304 : f32 to vector<1x128xf32>
    %770 = arith.mulf %768, %769 : vector<1x128xf32>
    %cst_305 = arith.constant 1.000000e+00 : f32
    %771 = vector.broadcast %cst_305 : f32 to vector<1x128xf32>
    %772 = arith.addf %762, %771 : vector<1x128xf32>
    %cst_306 = arith.constant 1.600000e+01 : f32
    %773 = vector.broadcast %cst_306 : f32 to vector<1x128xf32>
    %774 = arith.mulf %772, %773 : vector<1x128xf32>
    %cst_307 = arith.constant 1.000000e+00 : f32
    %775 = vector.broadcast %cst_307 : f32 to vector<1x128xf32>
    %776 = arith.subf %774, %775 : vector<1x128xf32>
    %cst_308 = arith.constant 5.000000e-01 : f32
    %777 = vector.broadcast %cst_308 : f32 to vector<1x128xf32>
    %778 = arith.mulf %776, %777 : vector<1x128xf32>
    %cst_309 = arith.constant 5.000000e-01 : f32
    %779 = vector.broadcast %cst_309 : f32 to vector<1x128xf32>
    %780 = arith.addf %770, %779 : vector<1x128xf32>
    %781 = math.floor %780 : vector<1x128xf32>
    %782 = arith.fptosi %781 : vector<1x128xf32> to vector<1x128xi32>
    %cst_310 = arith.constant 5.000000e-01 : f32
    %783 = vector.broadcast %cst_310 : f32 to vector<1x128xf32>
    %784 = arith.addf %778, %783 : vector<1x128xf32>
    %785 = math.floor %784 : vector<1x128xf32>
    %786 = arith.fptosi %785 : vector<1x128xf32> to vector<1x128xi32>
    %787 = tpu.concatenate %736, %782 in 1 : vector<1x128xi32>, vector<1x128xi32> -> vector<1x256xi32>
    %788 = tpu.concatenate %740, %786 in 1 : vector<1x128xi32>, vector<1x128xi32> -> vector<1x256xi32>
    %c0_i32_311 = arith.constant 0 : i32
    %789 = vector.broadcast %c0_i32_311 : i32 to vector<1x256xi32>
    %790 = arith.cmpi sge, %787, %789 : vector<1x256xi32>
    %c16_i32_312 = arith.constant 16 : i32
    %791 = vector.broadcast %c16_i32_312 : i32 to vector<1x256xi32>
    %792 = arith.cmpi slt, %787, %791 : vector<1x256xi32>
    %793 = arith.andi %790, %792 : vector<1x256xi1>
    %c0_i32_313 = arith.constant 0 : i32
    %794 = vector.broadcast %c0_i32_313 : i32 to vector<1x256xi32>
    %795 = arith.cmpi sge, %788, %794 : vector<1x256xi32>
    %796 = arith.andi %793, %795 : vector<1x256xi1>
    %c16_i32_314 = arith.constant 16 : i32
    %797 = vector.broadcast %c16_i32_314 : i32 to vector<1x256xi32>
    %798 = arith.cmpi slt, %788, %797 : vector<1x256xi32>
    %799 = arith.andi %796, %798 : vector<1x256xi1>
    %800 = vector.broadcast %31 : vector<16x1xi32> to vector<16x256xi32>
    %801 = vector.broadcast %787 : vector<1x256xi32> to vector<16x256xi32>
    %802 = arith.cmpi eq, %800, %801 : vector<16x256xi32>
    %803 = vector.broadcast %799 : vector<1x256xi1> to vector<16x256xi1>
    %804 = arith.andi %802, %803 : vector<16x256xi1>
    %805 = arith.extui %804 : vector<16x256xi1> to vector<16x256xi32>
    %806 = arith.sitofp %805 : vector<16x256xi32> to vector<16x256xf32>
    %807 = vector.broadcast %32 : vector<16x1xi32> to vector<16x256xi32>
    %808 = vector.broadcast %788 : vector<1x256xi32> to vector<16x256xi32>
    %809 = arith.cmpi eq, %807, %808 : vector<16x256xi32>
    %810 = arith.extui %809 : vector<16x256xi1> to vector<16x256xi32>
    %811 = arith.sitofp %810 : vector<16x256xi32> to vector<16x256xf32>
    %c0_315 = arith.constant 0 : index
    %c3 = arith.constant 3 : index
    %c0_316 = arith.constant 0 : index
    %c0_317 = arith.constant 0 : index
    %812 = vector.load %arg5[%c0_315, %c3, %c0_316, %c0_317] : memref<1x8x32x16xf32, #tpu.memory_space<vmem>>, vector<1x1x32x16xf32>
    %813 = vector.shape_cast %812 : vector<1x1x32x16xf32> to vector<32x16xf32>
    %cst_318 = arith.constant dense<0.000000e+00> : vector<32x256xf32>
    %814 = tpu.matmul %813, %806, %cst_318 {dimension_numbers = #tpu.dot_dimension_numbers<[1], [0], [0], [1], [0, 0, 1, 1], [], []>} : vector<32x16xf32>, vector<16x256xf32>, vector<32x256xf32> -> vector<32x256xf32>
    %815 = vector.extract_strided_slice %814 {offsets = [0, 0], sizes = [16, 256], strides = [1, 1]} : vector<32x256xf32> to vector<16x256xf32>
    %816 = arith.mulf %815, %811 : vector<16x256xf32>
    %cst_319 = arith.constant dense<0.000000e+00> : vector<256xf32>
    %817 = vector.multi_reduction <add>, %816, %cst_319 [0] : vector<16x256xf32> to vector<256xf32>
    %818 = vector.shape_cast %817 : vector<256xf32> to vector<1x256xf32>
    %819 = vector.extract_strided_slice %814 {offsets = [16, 0], sizes = [16, 256], strides = [1, 1]} : vector<32x256xf32> to vector<16x256xf32>
    %820 = arith.mulf %819, %811 : vector<16x256xf32>
    %cst_320 = arith.constant dense<0.000000e+00> : vector<256xf32>
    %821 = vector.multi_reduction <add>, %820, %cst_320 [0] : vector<16x256xf32> to vector<256xf32>
    %822 = vector.shape_cast %821 : vector<256xf32> to vector<1x256xf32>
    %823 = vector.extract_strided_slice %818 {offsets = [0, 0], sizes = [1, 128], strides = [1, 1]} : vector<1x256xf32> to vector<1x128xf32>
    %824 = arith.addf %823, %698 : vector<1x128xf32>
    %825 = vector.extract_strided_slice %822 {offsets = [0, 0], sizes = [1, 128], strides = [1, 1]} : vector<1x256xf32> to vector<1x128xf32>
    %826 = vector.extract_strided_slice %818 {offsets = [0, 128], sizes = [1, 128], strides = [1, 1]} : vector<1x256xf32> to vector<1x128xf32>
    %827 = arith.addf %826, %744 : vector<1x128xf32>
    %828 = vector.extract_strided_slice %822 {offsets = [0, 128], sizes = [1, 128], strides = [1, 1]} : vector<1x256xf32> to vector<1x128xf32>
    %c0_321 = arith.constant 0 : index
    %829 = memref.load %arg8[%c0_321] : memref<3xf32, #tpu.memory_space<smem>>
    %c0_322 = arith.constant 0 : index
    %c0_323 = arith.constant 0 : index
    %830 = memref.load %arg7[%c0_322, %c0_323] : memref<3x3xf32, #tpu.memory_space<smem>>
    %831 = vector.broadcast %830 : f32 to vector<1x128xf32>
    %832 = arith.mulf %831, %694 : vector<1x128xf32>
    %833 = vector.broadcast %829 : f32 to vector<1x128xf32>
    %834 = arith.addf %833, %832 : vector<1x128xf32>
    %c0_324 = arith.constant 0 : index
    %c1_325 = arith.constant 1 : index
    %835 = memref.load %arg7[%c0_324, %c1_325] : memref<3x3xf32, #tpu.memory_space<smem>>
    %836 = vector.broadcast %835 : f32 to vector<1x128xf32>
    %837 = arith.mulf %836, %825 : vector<1x128xf32>
    %838 = arith.addf %834, %837 : vector<1x128xf32>
    %c0_326 = arith.constant 0 : index
    %c2_327 = arith.constant 2 : index
    %839 = memref.load %arg7[%c0_326, %c2_327] : memref<3x3xf32, #tpu.memory_space<smem>>
    %840 = vector.broadcast %839 : f32 to vector<1x128xf32>
    %841 = arith.mulf %840, %828 : vector<1x128xf32>
    %842 = arith.addf %838, %841 : vector<1x128xf32>
    %c1_328 = arith.constant 1 : index
    %843 = memref.load %arg8[%c1_328] : memref<3xf32, #tpu.memory_space<smem>>
    %c1_329 = arith.constant 1 : index
    %c0_330 = arith.constant 0 : index
    %844 = memref.load %arg7[%c1_329, %c0_330] : memref<3x3xf32, #tpu.memory_space<smem>>
    %845 = vector.broadcast %844 : f32 to vector<1x128xf32>
    %846 = arith.mulf %845, %694 : vector<1x128xf32>
    %847 = vector.broadcast %843 : f32 to vector<1x128xf32>
    %848 = arith.addf %847, %846 : vector<1x128xf32>
    %c1_331 = arith.constant 1 : index
    %c1_332 = arith.constant 1 : index
    %849 = memref.load %arg7[%c1_331, %c1_332] : memref<3x3xf32, #tpu.memory_space<smem>>
    %850 = vector.broadcast %849 : f32 to vector<1x128xf32>
    %851 = arith.mulf %850, %825 : vector<1x128xf32>
    %852 = arith.addf %848, %851 : vector<1x128xf32>
    %c1_333 = arith.constant 1 : index
    %c2_334 = arith.constant 2 : index
    %853 = memref.load %arg7[%c1_333, %c2_334] : memref<3x3xf32, #tpu.memory_space<smem>>
    %854 = vector.broadcast %853 : f32 to vector<1x128xf32>
    %855 = arith.mulf %854, %828 : vector<1x128xf32>
    %856 = arith.addf %852, %855 : vector<1x128xf32>
    %c2_335 = arith.constant 2 : index
    %857 = memref.load %arg8[%c2_335] : memref<3xf32, #tpu.memory_space<smem>>
    %c2_336 = arith.constant 2 : index
    %c0_337 = arith.constant 0 : index
    %858 = memref.load %arg7[%c2_336, %c0_337] : memref<3x3xf32, #tpu.memory_space<smem>>
    %859 = vector.broadcast %858 : f32 to vector<1x128xf32>
    %860 = arith.mulf %859, %694 : vector<1x128xf32>
    %861 = vector.broadcast %857 : f32 to vector<1x128xf32>
    %862 = arith.addf %861, %860 : vector<1x128xf32>
    %c2_338 = arith.constant 2 : index
    %c1_339 = arith.constant 1 : index
    %863 = memref.load %arg7[%c2_338, %c1_339] : memref<3x3xf32, #tpu.memory_space<smem>>
    %864 = vector.broadcast %863 : f32 to vector<1x128xf32>
    %865 = arith.mulf %864, %825 : vector<1x128xf32>
    %866 = arith.addf %862, %865 : vector<1x128xf32>
    %c2_340 = arith.constant 2 : index
    %c2_341 = arith.constant 2 : index
    %867 = memref.load %arg7[%c2_340, %c2_341] : memref<3x3xf32, #tpu.memory_space<smem>>
    %868 = vector.broadcast %867 : f32 to vector<1x128xf32>
    %869 = arith.mulf %868, %828 : vector<1x128xf32>
    %870 = arith.addf %866, %869 : vector<1x128xf32>
    %871 = arith.maximumf %842, %856 : vector<1x128xf32>
    %872 = arith.maximumf %871, %870 : vector<1x128xf32>
    %873 = arith.subf %842, %872 : vector<1x128xf32>
    %874 = math.exp %873 : vector<1x128xf32>
    %875 = arith.subf %856, %872 : vector<1x128xf32>
    %876 = math.exp %875 : vector<1x128xf32>
    %877 = arith.subf %870, %872 : vector<1x128xf32>
    %878 = math.exp %877 : vector<1x128xf32>
    %879 = arith.addf %874, %876 : vector<1x128xf32>
    %880 = arith.addf %879, %878 : vector<1x128xf32>
    %cst_342 = arith.constant 1.000000e+00 : f32
    %881 = vector.broadcast %cst_342 : f32 to vector<1x128xf32>
    %882 = arith.divf %881, %880 : vector<1x128xf32>
    %883 = arith.mulf %874, %882 : vector<1x128xf32>
    %c0_343 = arith.constant 0 : index
    %c0_344 = arith.constant 0 : index
    %c3_345 = arith.constant 3 : index
    %c0_346 = arith.constant 0 : index
    %884 = vector.load %arg10[%c0_343, %c0_344, %c3_345, %c0_346] : memref<1x3x8x128xf32, #tpu.memory_space<vmem>>, vector<1x1x1x128xf32>
    %885 = vector.shape_cast %884 : vector<1x1x1x128xf32> to vector<1x128xf32>
    %886 = vector.shape_cast %883 : vector<1x128xf32> to vector<1x1x1x128xf32>
    tpu.vector_store %arg10[%c0_343, %c0_344, %c3_345, %c0_346], %886 {strides = array<i32>} : memref<1x3x8x128xf32, #tpu.memory_space<vmem>>, vector<1x1x1x128xf32>,
    %887 = arith.mulf %883, %693 : vector<1x128xf32>
    %888 = arith.mulf %876, %882 : vector<1x128xf32>
    %c0_347 = arith.constant 0 : index
    %c1_348 = arith.constant 1 : index
    %c3_349 = arith.constant 3 : index
    %c0_350 = arith.constant 0 : index
    %889 = vector.load %arg10[%c0_347, %c1_348, %c3_349, %c0_350] : memref<1x3x8x128xf32, #tpu.memory_space<vmem>>, vector<1x1x1x128xf32>
    %890 = vector.shape_cast %889 : vector<1x1x1x128xf32> to vector<1x128xf32>
    %891 = vector.shape_cast %888 : vector<1x128xf32> to vector<1x1x1x128xf32>
    tpu.vector_store %arg10[%c0_347, %c1_348, %c3_349, %c0_350], %891 {strides = array<i32>} : memref<1x3x8x128xf32, #tpu.memory_space<vmem>>, vector<1x1x1x128xf32>,
    %892 = arith.mulf %888, %824 : vector<1x128xf32>
    %893 = arith.addf %887, %892 : vector<1x128xf32>
    %894 = arith.mulf %878, %882 : vector<1x128xf32>
    %c0_351 = arith.constant 0 : index
    %c2_352 = arith.constant 2 : index
    %c3_353 = arith.constant 3 : index
    %c0_354 = arith.constant 0 : index
    %895 = vector.load %arg10[%c0_351, %c2_352, %c3_353, %c0_354] : memref<1x3x8x128xf32, #tpu.memory_space<vmem>>, vector<1x1x1x128xf32>
    %896 = vector.shape_cast %895 : vector<1x1x1x128xf32> to vector<1x128xf32>
    %897 = vector.shape_cast %894 : vector<1x128xf32> to vector<1x1x1x128xf32>
    tpu.vector_store %arg10[%c0_351, %c2_352, %c3_353, %c0_354], %897 {strides = array<i32>} : memref<1x3x8x128xf32, #tpu.memory_space<vmem>>, vector<1x1x1x128xf32>,
    %898 = arith.mulf %894, %827 : vector<1x128xf32>
    %899 = arith.addf %893, %898 : vector<1x128xf32>
    %cst_355 = arith.constant 0.000000e+00 : f32
    %900 = vector.broadcast %cst_355 : f32 to vector<1x128xf32>
    %901 = arith.maximumf %899, %900 : vector<1x128xf32>
    %c0_356 = arith.constant 0 : index
    %c3_357 = arith.constant 3 : index
    %c0_358 = arith.constant 0 : index
    %902 = vector.load %arg9[%c0_356, %c3_357, %c0_358] : memref<1x8x128xf32, #tpu.memory_space<vmem>>, vector<1x1x128xf32>
    %903 = vector.shape_cast %902 : vector<1x1x128xf32> to vector<1x128xf32>
    %904 = vector.shape_cast %901 : vector<1x128xf32> to vector<1x1x128xf32>
    tpu.vector_store %arg9[%c0_356, %c3_357, %c0_358], %904 {strides = array<i32>} : memref<1x8x128xf32, #tpu.memory_space<vmem>>, vector<1x1x128xf32>,
    %c8_i32_359 = arith.constant 8 : i32
    %905 = arith.muli %arg1, %c8_i32_359 : i32
    %c4_i32 = arith.constant 4 : i32
    %906 = arith.addi %905, %c4_i32 : i32
    %c0_360 = arith.constant 0 : index
    %907 = arith.index_cast %906 : i32 to index
    %908 = memref.load %arg6[%c0_360, %907] : memref<2x8xf32, #tpu.memory_space<smem>>
    %c1_361 = arith.constant 1 : index
    %909 = arith.index_cast %906 : i32 to index
    %910 = memref.load %arg6[%c1_361, %909] : memref<2x8xf32, #tpu.memory_space<smem>>
    %911 = vector.extract_strided_slice %28 {offsets = [4, 0], sizes = [1, 128], strides = [1, 1]} : vector<8x128xf32> to vector<1x128xf32>
    %912 = vector.extract_strided_slice %30 {offsets = [4, 0], sizes = [1, 128], strides = [1, 1]} : vector<8x128xf32> to vector<1x128xf32>
    %cst_362 = arith.constant 1.000000e+00 : f32
    %913 = vector.broadcast %cst_362 : f32 to vector<1x128xf32>
    %914 = arith.subf %911, %913 : vector<1x128xf32>
    %cst_363 = arith.constant 2.000000e-01 : f32
    %915 = vector.broadcast %cst_363 : f32 to vector<1x128xf32>
    %916 = arith.mulf %914, %915 : vector<1x128xf32>
    %917 = vector.broadcast %908 : f32 to vector<1x128xf32>
    %918 = arith.mulf %917, %916 : vector<1x128xf32>
    %919 = arith.addf %26, %918 : vector<1x128xf32>
    %cst_364 = arith.constant 1.500000e+01 : f32
    %920 = vector.broadcast %cst_364 : f32 to vector<1x128xf32>
    %921 = arith.divf %919, %920 : vector<1x128xf32>
    %cst_365 = arith.constant 2.000000e+00 : f32
    %922 = vector.broadcast %cst_365 : f32 to vector<1x128xf32>
    %923 = arith.mulf %921, %922 : vector<1x128xf32>
    %cst_366 = arith.constant 1.000000e+00 : f32
    %924 = vector.broadcast %cst_366 : f32 to vector<1x128xf32>
    %925 = arith.subf %923, %924 : vector<1x128xf32>
    %926 = vector.broadcast %910 : f32 to vector<1x128xf32>
    %927 = arith.mulf %926, %916 : vector<1x128xf32>
    %928 = arith.addf %23, %927 : vector<1x128xf32>
    %cst_367 = arith.constant 1.500000e+01 : f32
    %929 = vector.broadcast %cst_367 : f32 to vector<1x128xf32>
    %930 = arith.divf %928, %929 : vector<1x128xf32>
    %cst_368 = arith.constant 2.000000e+00 : f32
    %931 = vector.broadcast %cst_368 : f32 to vector<1x128xf32>
    %932 = arith.mulf %930, %931 : vector<1x128xf32>
    %cst_369 = arith.constant 1.000000e+00 : f32
    %933 = vector.broadcast %cst_369 : f32 to vector<1x128xf32>
    %934 = arith.subf %932, %933 : vector<1x128xf32>
    %cst_370 = arith.constant 1.000000e+00 : f32
    %935 = vector.broadcast %cst_370 : f32 to vector<1x128xf32>
    %936 = arith.addf %925, %935 : vector<1x128xf32>
    %cst_371 = arith.constant 1.600000e+01 : f32
    %937 = vector.broadcast %cst_371 : f32 to vector<1x128xf32>
    %938 = arith.mulf %936, %937 : vector<1x128xf32>
    %cst_372 = arith.constant 1.000000e+00 : f32
    %939 = vector.broadcast %cst_372 : f32 to vector<1x128xf32>
    %940 = arith.subf %938, %939 : vector<1x128xf32>
    %cst_373 = arith.constant 5.000000e-01 : f32
    %941 = vector.broadcast %cst_373 : f32 to vector<1x128xf32>
    %942 = arith.mulf %940, %941 : vector<1x128xf32>
    %cst_374 = arith.constant 1.000000e+00 : f32
    %943 = vector.broadcast %cst_374 : f32 to vector<1x128xf32>
    %944 = arith.addf %934, %943 : vector<1x128xf32>
    %cst_375 = arith.constant 1.600000e+01 : f32
    %945 = vector.broadcast %cst_375 : f32 to vector<1x128xf32>
    %946 = arith.mulf %944, %945 : vector<1x128xf32>
    %cst_376 = arith.constant 1.000000e+00 : f32
    %947 = vector.broadcast %cst_376 : f32 to vector<1x128xf32>
    %948 = arith.subf %946, %947 : vector<1x128xf32>
    %cst_377 = arith.constant 5.000000e-01 : f32
    %949 = vector.broadcast %cst_377 : f32 to vector<1x128xf32>
    %950 = arith.mulf %948, %949 : vector<1x128xf32>
    %cst_378 = arith.constant 5.000000e-01 : f32
    %951 = vector.broadcast %cst_378 : f32 to vector<1x128xf32>
    %952 = arith.addf %942, %951 : vector<1x128xf32>
    %953 = math.floor %952 : vector<1x128xf32>
    %954 = arith.fptosi %953 : vector<1x128xf32> to vector<1x128xi32>
    %cst_379 = arith.constant 5.000000e-01 : f32
    %955 = vector.broadcast %cst_379 : f32 to vector<1x128xf32>
    %956 = arith.addf %950, %955 : vector<1x128xf32>
    %957 = math.floor %956 : vector<1x128xf32>
    %958 = arith.fptosi %957 : vector<1x128xf32> to vector<1x128xi32>
    %cst_380 = arith.constant 1.000000e+00 : f32
    %959 = vector.broadcast %cst_380 : f32 to vector<1x128xf32>
    %960 = arith.subf %911, %959 : vector<1x128xf32>
    %cst_381 = arith.constant 5.000000e-01 : f32
    %961 = vector.broadcast %cst_381 : f32 to vector<1x128xf32>
    %962 = arith.mulf %960, %961 : vector<1x128xf32>
    %963 = vector.broadcast %908 : f32 to vector<1x128xf32>
    %964 = arith.mulf %963, %962 : vector<1x128xf32>
    %965 = arith.addf %26, %964 : vector<1x128xf32>
    %cst_382 = arith.constant 1.500000e+01 : f32
    %966 = vector.broadcast %cst_382 : f32 to vector<1x128xf32>
    %967 = arith.divf %965, %966 : vector<1x128xf32>
    %cst_383 = arith.constant 2.000000e+00 : f32
    %968 = vector.broadcast %cst_383 : f32 to vector<1x128xf32>
    %969 = arith.mulf %967, %968 : vector<1x128xf32>
    %cst_384 = arith.constant 1.000000e+00 : f32
    %970 = vector.broadcast %cst_384 : f32 to vector<1x128xf32>
    %971 = arith.subf %969, %970 : vector<1x128xf32>
    %972 = vector.broadcast %910 : f32 to vector<1x128xf32>
    %973 = arith.mulf %972, %962 : vector<1x128xf32>
    %974 = arith.addf %23, %973 : vector<1x128xf32>
    %cst_385 = arith.constant 1.500000e+01 : f32
    %975 = vector.broadcast %cst_385 : f32 to vector<1x128xf32>
    %976 = arith.divf %974, %975 : vector<1x128xf32>
    %cst_386 = arith.constant 2.000000e+00 : f32
    %977 = vector.broadcast %cst_386 : f32 to vector<1x128xf32>
    %978 = arith.mulf %976, %977 : vector<1x128xf32>
    %cst_387 = arith.constant 1.000000e+00 : f32
    %979 = vector.broadcast %cst_387 : f32 to vector<1x128xf32>
    %980 = arith.subf %978, %979 : vector<1x128xf32>
    %cst_388 = arith.constant 1.000000e+00 : f32
    %981 = vector.broadcast %cst_388 : f32 to vector<1x128xf32>
    %982 = arith.addf %971, %981 : vector<1x128xf32>
    %cst_389 = arith.constant 1.600000e+01 : f32
    %983 = vector.broadcast %cst_389 : f32 to vector<1x128xf32>
    %984 = arith.mulf %982, %983 : vector<1x128xf32>
    %cst_390 = arith.constant 1.000000e+00 : f32
    %985 = vector.broadcast %cst_390 : f32 to vector<1x128xf32>
    %986 = arith.subf %984, %985 : vector<1x128xf32>
    %cst_391 = arith.constant 5.000000e-01 : f32
    %987 = vector.broadcast %cst_391 : f32 to vector<1x128xf32>
    %988 = arith.mulf %986, %987 : vector<1x128xf32>
    %cst_392 = arith.constant 1.000000e+00 : f32
    %989 = vector.broadcast %cst_392 : f32 to vector<1x128xf32>
    %990 = arith.addf %980, %989 : vector<1x128xf32>
    %cst_393 = arith.constant 1.600000e+01 : f32
    %991 = vector.broadcast %cst_393 : f32 to vector<1x128xf32>
    %992 = arith.mulf %990, %991 : vector<1x128xf32>
    %cst_394 = arith.constant 1.000000e+00 : f32
    %993 = vector.broadcast %cst_394 : f32 to vector<1x128xf32>
    %994 = arith.subf %992, %993 : vector<1x128xf32>
    %cst_395 = arith.constant 5.000000e-01 : f32
    %995 = vector.broadcast %cst_395 : f32 to vector<1x128xf32>
    %996 = arith.mulf %994, %995 : vector<1x128xf32>
    %cst_396 = arith.constant 5.000000e-01 : f32
    %997 = vector.broadcast %cst_396 : f32 to vector<1x128xf32>
    %998 = arith.addf %988, %997 : vector<1x128xf32>
    %999 = math.floor %998 : vector<1x128xf32>
    %1000 = arith.fptosi %999 : vector<1x128xf32> to vector<1x128xi32>
    %cst_397 = arith.constant 5.000000e-01 : f32
    %1001 = vector.broadcast %cst_397 : f32 to vector<1x128xf32>
    %1002 = arith.addf %996, %1001 : vector<1x128xf32>
    %1003 = math.floor %1002 : vector<1x128xf32>
    %1004 = arith.fptosi %1003 : vector<1x128xf32> to vector<1x128xi32>
    %1005 = tpu.concatenate %954, %1000 in 1 : vector<1x128xi32>, vector<1x128xi32> -> vector<1x256xi32>
    %1006 = tpu.concatenate %958, %1004 in 1 : vector<1x128xi32>, vector<1x128xi32> -> vector<1x256xi32>
    %c0_i32_398 = arith.constant 0 : i32
    %1007 = vector.broadcast %c0_i32_398 : i32 to vector<1x256xi32>
    %1008 = arith.cmpi sge, %1005, %1007 : vector<1x256xi32>
    %c16_i32_399 = arith.constant 16 : i32
    %1009 = vector.broadcast %c16_i32_399 : i32 to vector<1x256xi32>
    %1010 = arith.cmpi slt, %1005, %1009 : vector<1x256xi32>
    %1011 = arith.andi %1008, %1010 : vector<1x256xi1>
    %c0_i32_400 = arith.constant 0 : i32
    %1012 = vector.broadcast %c0_i32_400 : i32 to vector<1x256xi32>
    %1013 = arith.cmpi sge, %1006, %1012 : vector<1x256xi32>
    %1014 = arith.andi %1011, %1013 : vector<1x256xi1>
    %c16_i32_401 = arith.constant 16 : i32
    %1015 = vector.broadcast %c16_i32_401 : i32 to vector<1x256xi32>
    %1016 = arith.cmpi slt, %1006, %1015 : vector<1x256xi32>
    %1017 = arith.andi %1014, %1016 : vector<1x256xi1>
    %1018 = vector.broadcast %31 : vector<16x1xi32> to vector<16x256xi32>
    %1019 = vector.broadcast %1005 : vector<1x256xi32> to vector<16x256xi32>
    %1020 = arith.cmpi eq, %1018, %1019 : vector<16x256xi32>
    %1021 = vector.broadcast %1017 : vector<1x256xi1> to vector<16x256xi1>
    %1022 = arith.andi %1020, %1021 : vector<16x256xi1>
    %1023 = arith.extui %1022 : vector<16x256xi1> to vector<16x256xi32>
    %1024 = arith.sitofp %1023 : vector<16x256xi32> to vector<16x256xf32>
    %1025 = vector.broadcast %32 : vector<16x1xi32> to vector<16x256xi32>
    %1026 = vector.broadcast %1006 : vector<1x256xi32> to vector<16x256xi32>
    %1027 = arith.cmpi eq, %1025, %1026 : vector<16x256xi32>
    %1028 = arith.extui %1027 : vector<16x256xi1> to vector<16x256xi32>
    %1029 = arith.sitofp %1028 : vector<16x256xi32> to vector<16x256xf32>
    %c0_402 = arith.constant 0 : index
    %c4 = arith.constant 4 : index
    %c0_403 = arith.constant 0 : index
    %c0_404 = arith.constant 0 : index
    %1030 = vector.load %arg5[%c0_402, %c4, %c0_403, %c0_404] : memref<1x8x32x16xf32, #tpu.memory_space<vmem>>, vector<1x1x32x16xf32>
    %1031 = vector.shape_cast %1030 : vector<1x1x32x16xf32> to vector<32x16xf32>
    %cst_405 = arith.constant dense<0.000000e+00> : vector<32x256xf32>
    %1032 = tpu.matmul %1031, %1024, %cst_405 {dimension_numbers = #tpu.dot_dimension_numbers<[1], [0], [0], [1], [0, 0, 1, 1], [], []>} : vector<32x16xf32>, vector<16x256xf32>, vector<32x256xf32> -> vector<32x256xf32>
    %1033 = vector.extract_strided_slice %1032 {offsets = [0, 0], sizes = [16, 256], strides = [1, 1]} : vector<32x256xf32> to vector<16x256xf32>
    %1034 = arith.mulf %1033, %1029 : vector<16x256xf32>
    %cst_406 = arith.constant dense<0.000000e+00> : vector<256xf32>
    %1035 = vector.multi_reduction <add>, %1034, %cst_406 [0] : vector<16x256xf32> to vector<256xf32>
    %1036 = vector.shape_cast %1035 : vector<256xf32> to vector<1x256xf32>
    %1037 = vector.extract_strided_slice %1032 {offsets = [16, 0], sizes = [16, 256], strides = [1, 1]} : vector<32x256xf32> to vector<16x256xf32>
    %1038 = arith.mulf %1037, %1029 : vector<16x256xf32>
    %cst_407 = arith.constant dense<0.000000e+00> : vector<256xf32>
    %1039 = vector.multi_reduction <add>, %1038, %cst_407 [0] : vector<16x256xf32> to vector<256xf32>
    %1040 = vector.shape_cast %1039 : vector<256xf32> to vector<1x256xf32>
    %1041 = vector.extract_strided_slice %1036 {offsets = [0, 0], sizes = [1, 128], strides = [1, 1]} : vector<1x256xf32> to vector<1x128xf32>
    %1042 = arith.addf %1041, %916 : vector<1x128xf32>
    %1043 = vector.extract_strided_slice %1040 {offsets = [0, 0], sizes = [1, 128], strides = [1, 1]} : vector<1x256xf32> to vector<1x128xf32>
    %1044 = vector.extract_strided_slice %1036 {offsets = [0, 128], sizes = [1, 128], strides = [1, 1]} : vector<1x256xf32> to vector<1x128xf32>
    %1045 = arith.addf %1044, %962 : vector<1x128xf32>
    %1046 = vector.extract_strided_slice %1040 {offsets = [0, 128], sizes = [1, 128], strides = [1, 1]} : vector<1x256xf32> to vector<1x128xf32>
    %c0_408 = arith.constant 0 : index
    %1047 = memref.load %arg8[%c0_408] : memref<3xf32, #tpu.memory_space<smem>>
    %c0_409 = arith.constant 0 : index
    %c0_410 = arith.constant 0 : index
    %1048 = memref.load %arg7[%c0_409, %c0_410] : memref<3x3xf32, #tpu.memory_space<smem>>
    %1049 = vector.broadcast %1048 : f32 to vector<1x128xf32>
    %1050 = arith.mulf %1049, %912 : vector<1x128xf32>
    %1051 = vector.broadcast %1047 : f32 to vector<1x128xf32>
    %1052 = arith.addf %1051, %1050 : vector<1x128xf32>
    %c0_411 = arith.constant 0 : index
    %c1_412 = arith.constant 1 : index
    %1053 = memref.load %arg7[%c0_411, %c1_412] : memref<3x3xf32, #tpu.memory_space<smem>>
    %1054 = vector.broadcast %1053 : f32 to vector<1x128xf32>
    %1055 = arith.mulf %1054, %1043 : vector<1x128xf32>
    %1056 = arith.addf %1052, %1055 : vector<1x128xf32>
    %c0_413 = arith.constant 0 : index
    %c2_414 = arith.constant 2 : index
    %1057 = memref.load %arg7[%c0_413, %c2_414] : memref<3x3xf32, #tpu.memory_space<smem>>
    %1058 = vector.broadcast %1057 : f32 to vector<1x128xf32>
    %1059 = arith.mulf %1058, %1046 : vector<1x128xf32>
    %1060 = arith.addf %1056, %1059 : vector<1x128xf32>
    %c1_415 = arith.constant 1 : index
    %1061 = memref.load %arg8[%c1_415] : memref<3xf32, #tpu.memory_space<smem>>
    %c1_416 = arith.constant 1 : index
    %c0_417 = arith.constant 0 : index
    %1062 = memref.load %arg7[%c1_416, %c0_417] : memref<3x3xf32, #tpu.memory_space<smem>>
    %1063 = vector.broadcast %1062 : f32 to vector<1x128xf32>
    %1064 = arith.mulf %1063, %912 : vector<1x128xf32>
    %1065 = vector.broadcast %1061 : f32 to vector<1x128xf32>
    %1066 = arith.addf %1065, %1064 : vector<1x128xf32>
    %c1_418 = arith.constant 1 : index
    %c1_419 = arith.constant 1 : index
    %1067 = memref.load %arg7[%c1_418, %c1_419] : memref<3x3xf32, #tpu.memory_space<smem>>
    %1068 = vector.broadcast %1067 : f32 to vector<1x128xf32>
    %1069 = arith.mulf %1068, %1043 : vector<1x128xf32>
    %1070 = arith.addf %1066, %1069 : vector<1x128xf32>
    %c1_420 = arith.constant 1 : index
    %c2_421 = arith.constant 2 : index
    %1071 = memref.load %arg7[%c1_420, %c2_421] : memref<3x3xf32, #tpu.memory_space<smem>>
    %1072 = vector.broadcast %1071 : f32 to vector<1x128xf32>
    %1073 = arith.mulf %1072, %1046 : vector<1x128xf32>
    %1074 = arith.addf %1070, %1073 : vector<1x128xf32>
    %c2_422 = arith.constant 2 : index
    %1075 = memref.load %arg8[%c2_422] : memref<3xf32, #tpu.memory_space<smem>>
    %c2_423 = arith.constant 2 : index
    %c0_424 = arith.constant 0 : index
    %1076 = memref.load %arg7[%c2_423, %c0_424] : memref<3x3xf32, #tpu.memory_space<smem>>
    %1077 = vector.broadcast %1076 : f32 to vector<1x128xf32>
    %1078 = arith.mulf %1077, %912 : vector<1x128xf32>
    %1079 = vector.broadcast %1075 : f32 to vector<1x128xf32>
    %1080 = arith.addf %1079, %1078 : vector<1x128xf32>
    %c2_425 = arith.constant 2 : index
    %c1_426 = arith.constant 1 : index
    %1081 = memref.load %arg7[%c2_425, %c1_426] : memref<3x3xf32, #tpu.memory_space<smem>>
    %1082 = vector.broadcast %1081 : f32 to vector<1x128xf32>
    %1083 = arith.mulf %1082, %1043 : vector<1x128xf32>
    %1084 = arith.addf %1080, %1083 : vector<1x128xf32>
    %c2_427 = arith.constant 2 : index
    %c2_428 = arith.constant 2 : index
    %1085 = memref.load %arg7[%c2_427, %c2_428] : memref<3x3xf32, #tpu.memory_space<smem>>
    %1086 = vector.broadcast %1085 : f32 to vector<1x128xf32>
    %1087 = arith.mulf %1086, %1046 : vector<1x128xf32>
    %1088 = arith.addf %1084, %1087 : vector<1x128xf32>
    %1089 = arith.maximumf %1060, %1074 : vector<1x128xf32>
    %1090 = arith.maximumf %1089, %1088 : vector<1x128xf32>
    %1091 = arith.subf %1060, %1090 : vector<1x128xf32>
    %1092 = math.exp %1091 : vector<1x128xf32>
    %1093 = arith.subf %1074, %1090 : vector<1x128xf32>
    %1094 = math.exp %1093 : vector<1x128xf32>
    %1095 = arith.subf %1088, %1090 : vector<1x128xf32>
    %1096 = math.exp %1095 : vector<1x128xf32>
    %1097 = arith.addf %1092, %1094 : vector<1x128xf32>
    %1098 = arith.addf %1097, %1096 : vector<1x128xf32>
    %cst_429 = arith.constant 1.000000e+00 : f32
    %1099 = vector.broadcast %cst_429 : f32 to vector<1x128xf32>
    %1100 = arith.divf %1099, %1098 : vector<1x128xf32>
    %1101 = arith.mulf %1092, %1100 : vector<1x128xf32>
    %c0_430 = arith.constant 0 : index
    %c0_431 = arith.constant 0 : index
    %c4_432 = arith.constant 4 : index
    %c0_433 = arith.constant 0 : index
    %1102 = vector.load %arg10[%c0_430, %c0_431, %c4_432, %c0_433] : memref<1x3x8x128xf32, #tpu.memory_space<vmem>>, vector<1x1x1x128xf32>
    %1103 = vector.shape_cast %1102 : vector<1x1x1x128xf32> to vector<1x128xf32>
    %1104 = vector.shape_cast %1101 : vector<1x128xf32> to vector<1x1x1x128xf32>
    tpu.vector_store %arg10[%c0_430, %c0_431, %c4_432, %c0_433], %1104 {strides = array<i32>} : memref<1x3x8x128xf32, #tpu.memory_space<vmem>>, vector<1x1x1x128xf32>,
    %1105 = arith.mulf %1101, %911 : vector<1x128xf32>
    %1106 = arith.mulf %1094, %1100 : vector<1x128xf32>
    %c0_434 = arith.constant 0 : index
    %c1_435 = arith.constant 1 : index
    %c4_436 = arith.constant 4 : index
    %c0_437 = arith.constant 0 : index
    %1107 = vector.load %arg10[%c0_434, %c1_435, %c4_436, %c0_437] : memref<1x3x8x128xf32, #tpu.memory_space<vmem>>, vector<1x1x1x128xf32>
    %1108 = vector.shape_cast %1107 : vector<1x1x1x128xf32> to vector<1x128xf32>
    %1109 = vector.shape_cast %1106 : vector<1x128xf32> to vector<1x1x1x128xf32>
    tpu.vector_store %arg10[%c0_434, %c1_435, %c4_436, %c0_437], %1109 {strides = array<i32>} : memref<1x3x8x128xf32, #tpu.memory_space<vmem>>, vector<1x1x1x128xf32>,
    %1110 = arith.mulf %1106, %1042 : vector<1x128xf32>
    %1111 = arith.addf %1105, %1110 : vector<1x128xf32>
    %1112 = arith.mulf %1096, %1100 : vector<1x128xf32>
    %c0_438 = arith.constant 0 : index
    %c2_439 = arith.constant 2 : index
    %c4_440 = arith.constant 4 : index
    %c0_441 = arith.constant 0 : index
    %1113 = vector.load %arg10[%c0_438, %c2_439, %c4_440, %c0_441] : memref<1x3x8x128xf32, #tpu.memory_space<vmem>>, vector<1x1x1x128xf32>
    %1114 = vector.shape_cast %1113 : vector<1x1x1x128xf32> to vector<1x128xf32>
    %1115 = vector.shape_cast %1112 : vector<1x128xf32> to vector<1x1x1x128xf32>
    tpu.vector_store %arg10[%c0_438, %c2_439, %c4_440, %c0_441], %1115 {strides = array<i32>} : memref<1x3x8x128xf32, #tpu.memory_space<vmem>>, vector<1x1x1x128xf32>,
    %1116 = arith.mulf %1112, %1045 : vector<1x128xf32>
    %1117 = arith.addf %1111, %1116 : vector<1x128xf32>
    %cst_442 = arith.constant 0.000000e+00 : f32
    %1118 = vector.broadcast %cst_442 : f32 to vector<1x128xf32>
    %1119 = arith.maximumf %1117, %1118 : vector<1x128xf32>
    %c0_443 = arith.constant 0 : index
    %c4_444 = arith.constant 4 : index
    %c0_445 = arith.constant 0 : index
    %1120 = vector.load %arg9[%c0_443, %c4_444, %c0_445] : memref<1x8x128xf32, #tpu.memory_space<vmem>>, vector<1x1x128xf32>
    %1121 = vector.shape_cast %1120 : vector<1x1x128xf32> to vector<1x128xf32>
    %1122 = vector.shape_cast %1119 : vector<1x128xf32> to vector<1x1x128xf32>
    tpu.vector_store %arg9[%c0_443, %c4_444, %c0_445], %1122 {strides = array<i32>} : memref<1x8x128xf32, #tpu.memory_space<vmem>>, vector<1x1x128xf32>,
    %c8_i32_446 = arith.constant 8 : i32
    %1123 = arith.muli %arg1, %c8_i32_446 : i32
    %c5_i32 = arith.constant 5 : i32
    %1124 = arith.addi %1123, %c5_i32 : i32
    %c0_447 = arith.constant 0 : index
    %1125 = arith.index_cast %1124 : i32 to index
    %1126 = memref.load %arg6[%c0_447, %1125] : memref<2x8xf32, #tpu.memory_space<smem>>
    %c1_448 = arith.constant 1 : index
    %1127 = arith.index_cast %1124 : i32 to index
    %1128 = memref.load %arg6[%c1_448, %1127] : memref<2x8xf32, #tpu.memory_space<smem>>
    %1129 = vector.extract_strided_slice %28 {offsets = [5, 0], sizes = [1, 128], strides = [1, 1]} : vector<8x128xf32> to vector<1x128xf32>
    %1130 = vector.extract_strided_slice %30 {offsets = [5, 0], sizes = [1, 128], strides = [1, 1]} : vector<8x128xf32> to vector<1x128xf32>
    %cst_449 = arith.constant 1.000000e+00 : f32
    %1131 = vector.broadcast %cst_449 : f32 to vector<1x128xf32>
    %1132 = arith.subf %1129, %1131 : vector<1x128xf32>
    %cst_450 = arith.constant 2.000000e-01 : f32
    %1133 = vector.broadcast %cst_450 : f32 to vector<1x128xf32>
    %1134 = arith.mulf %1132, %1133 : vector<1x128xf32>
    %1135 = vector.broadcast %1126 : f32 to vector<1x128xf32>
    %1136 = arith.mulf %1135, %1134 : vector<1x128xf32>
    %1137 = arith.addf %26, %1136 : vector<1x128xf32>
    %cst_451 = arith.constant 1.500000e+01 : f32
    %1138 = vector.broadcast %cst_451 : f32 to vector<1x128xf32>
    %1139 = arith.divf %1137, %1138 : vector<1x128xf32>
    %cst_452 = arith.constant 2.000000e+00 : f32
    %1140 = vector.broadcast %cst_452 : f32 to vector<1x128xf32>
    %1141 = arith.mulf %1139, %1140 : vector<1x128xf32>
    %cst_453 = arith.constant 1.000000e+00 : f32
    %1142 = vector.broadcast %cst_453 : f32 to vector<1x128xf32>
    %1143 = arith.subf %1141, %1142 : vector<1x128xf32>
    %1144 = vector.broadcast %1128 : f32 to vector<1x128xf32>
    %1145 = arith.mulf %1144, %1134 : vector<1x128xf32>
    %1146 = arith.addf %23, %1145 : vector<1x128xf32>
    %cst_454 = arith.constant 1.500000e+01 : f32
    %1147 = vector.broadcast %cst_454 : f32 to vector<1x128xf32>
    %1148 = arith.divf %1146, %1147 : vector<1x128xf32>
    %cst_455 = arith.constant 2.000000e+00 : f32
    %1149 = vector.broadcast %cst_455 : f32 to vector<1x128xf32>
    %1150 = arith.mulf %1148, %1149 : vector<1x128xf32>
    %cst_456 = arith.constant 1.000000e+00 : f32
    %1151 = vector.broadcast %cst_456 : f32 to vector<1x128xf32>
    %1152 = arith.subf %1150, %1151 : vector<1x128xf32>
    %cst_457 = arith.constant 1.000000e+00 : f32
    %1153 = vector.broadcast %cst_457 : f32 to vector<1x128xf32>
    %1154 = arith.addf %1143, %1153 : vector<1x128xf32>
    %cst_458 = arith.constant 1.600000e+01 : f32
    %1155 = vector.broadcast %cst_458 : f32 to vector<1x128xf32>
    %1156 = arith.mulf %1154, %1155 : vector<1x128xf32>
    %cst_459 = arith.constant 1.000000e+00 : f32
    %1157 = vector.broadcast %cst_459 : f32 to vector<1x128xf32>
    %1158 = arith.subf %1156, %1157 : vector<1x128xf32>
    %cst_460 = arith.constant 5.000000e-01 : f32
    %1159 = vector.broadcast %cst_460 : f32 to vector<1x128xf32>
    %1160 = arith.mulf %1158, %1159 : vector<1x128xf32>
    %cst_461 = arith.constant 1.000000e+00 : f32
    %1161 = vector.broadcast %cst_461 : f32 to vector<1x128xf32>
    %1162 = arith.addf %1152, %1161 : vector<1x128xf32>
    %cst_462 = arith.constant 1.600000e+01 : f32
    %1163 = vector.broadcast %cst_462 : f32 to vector<1x128xf32>
    %1164 = arith.mulf %1162, %1163 : vector<1x128xf32>
    %cst_463 = arith.constant 1.000000e+00 : f32
    %1165 = vector.broadcast %cst_463 : f32 to vector<1x128xf32>
    %1166 = arith.subf %1164, %1165 : vector<1x128xf32>
    %cst_464 = arith.constant 5.000000e-01 : f32
    %1167 = vector.broadcast %cst_464 : f32 to vector<1x128xf32>
    %1168 = arith.mulf %1166, %1167 : vector<1x128xf32>
    %cst_465 = arith.constant 5.000000e-01 : f32
    %1169 = vector.broadcast %cst_465 : f32 to vector<1x128xf32>
    %1170 = arith.addf %1160, %1169 : vector<1x128xf32>
    %1171 = math.floor %1170 : vector<1x128xf32>
    %1172 = arith.fptosi %1171 : vector<1x128xf32> to vector<1x128xi32>
    %cst_466 = arith.constant 5.000000e-01 : f32
    %1173 = vector.broadcast %cst_466 : f32 to vector<1x128xf32>
    %1174 = arith.addf %1168, %1173 : vector<1x128xf32>
    %1175 = math.floor %1174 : vector<1x128xf32>
    %1176 = arith.fptosi %1175 : vector<1x128xf32> to vector<1x128xi32>
    %cst_467 = arith.constant 1.000000e+00 : f32
    %1177 = vector.broadcast %cst_467 : f32 to vector<1x128xf32>
    %1178 = arith.subf %1129, %1177 : vector<1x128xf32>
    %cst_468 = arith.constant 5.000000e-01 : f32
    %1179 = vector.broadcast %cst_468 : f32 to vector<1x128xf32>
    %1180 = arith.mulf %1178, %1179 : vector<1x128xf32>
    %1181 = vector.broadcast %1126 : f32 to vector<1x128xf32>
    %1182 = arith.mulf %1181, %1180 : vector<1x128xf32>
    %1183 = arith.addf %26, %1182 : vector<1x128xf32>
    %cst_469 = arith.constant 1.500000e+01 : f32
    %1184 = vector.broadcast %cst_469 : f32 to vector<1x128xf32>
    %1185 = arith.divf %1183, %1184 : vector<1x128xf32>
    %cst_470 = arith.constant 2.000000e+00 : f32
    %1186 = vector.broadcast %cst_470 : f32 to vector<1x128xf32>
    %1187 = arith.mulf %1185, %1186 : vector<1x128xf32>
    %cst_471 = arith.constant 1.000000e+00 : f32
    %1188 = vector.broadcast %cst_471 : f32 to vector<1x128xf32>
    %1189 = arith.subf %1187, %1188 : vector<1x128xf32>
    %1190 = vector.broadcast %1128 : f32 to vector<1x128xf32>
    %1191 = arith.mulf %1190, %1180 : vector<1x128xf32>
    %1192 = arith.addf %23, %1191 : vector<1x128xf32>
    %cst_472 = arith.constant 1.500000e+01 : f32
    %1193 = vector.broadcast %cst_472 : f32 to vector<1x128xf32>
    %1194 = arith.divf %1192, %1193 : vector<1x128xf32>
    %cst_473 = arith.constant 2.000000e+00 : f32
    %1195 = vector.broadcast %cst_473 : f32 to vector<1x128xf32>
    %1196 = arith.mulf %1194, %1195 : vector<1x128xf32>
    %cst_474 = arith.constant 1.000000e+00 : f32
    %1197 = vector.broadcast %cst_474 : f32 to vector<1x128xf32>
    %1198 = arith.subf %1196, %1197 : vector<1x128xf32>
    %cst_475 = arith.constant 1.000000e+00 : f32
    %1199 = vector.broadcast %cst_475 : f32 to vector<1x128xf32>
    %1200 = arith.addf %1189, %1199 : vector<1x128xf32>
    %cst_476 = arith.constant 1.600000e+01 : f32
    %1201 = vector.broadcast %cst_476 : f32 to vector<1x128xf32>
    %1202 = arith.mulf %1200, %1201 : vector<1x128xf32>
    %cst_477 = arith.constant 1.000000e+00 : f32
    %1203 = vector.broadcast %cst_477 : f32 to vector<1x128xf32>
    %1204 = arith.subf %1202, %1203 : vector<1x128xf32>
    %cst_478 = arith.constant 5.000000e-01 : f32
    %1205 = vector.broadcast %cst_478 : f32 to vector<1x128xf32>
    %1206 = arith.mulf %1204, %1205 : vector<1x128xf32>
    %cst_479 = arith.constant 1.000000e+00 : f32
    %1207 = vector.broadcast %cst_479 : f32 to vector<1x128xf32>
    %1208 = arith.addf %1198, %1207 : vector<1x128xf32>
    %cst_480 = arith.constant 1.600000e+01 : f32
    %1209 = vector.broadcast %cst_480 : f32 to vector<1x128xf32>
    %1210 = arith.mulf %1208, %1209 : vector<1x128xf32>
    %cst_481 = arith.constant 1.000000e+00 : f32
    %1211 = vector.broadcast %cst_481 : f32 to vector<1x128xf32>
    %1212 = arith.subf %1210, %1211 : vector<1x128xf32>
    %cst_482 = arith.constant 5.000000e-01 : f32
    %1213 = vector.broadcast %cst_482 : f32 to vector<1x128xf32>
    %1214 = arith.mulf %1212, %1213 : vector<1x128xf32>
    %cst_483 = arith.constant 5.000000e-01 : f32
    %1215 = vector.broadcast %cst_483 : f32 to vector<1x128xf32>
    %1216 = arith.addf %1206, %1215 : vector<1x128xf32>
    %1217 = math.floor %1216 : vector<1x128xf32>
    %1218 = arith.fptosi %1217 : vector<1x128xf32> to vector<1x128xi32>
    %cst_484 = arith.constant 5.000000e-01 : f32
    %1219 = vector.broadcast %cst_484 : f32 to vector<1x128xf32>
    %1220 = arith.addf %1214, %1219 : vector<1x128xf32>
    %1221 = math.floor %1220 : vector<1x128xf32>
    %1222 = arith.fptosi %1221 : vector<1x128xf32> to vector<1x128xi32>
    %1223 = tpu.concatenate %1172, %1218 in 1 : vector<1x128xi32>, vector<1x128xi32> -> vector<1x256xi32>
    %1224 = tpu.concatenate %1176, %1222 in 1 : vector<1x128xi32>, vector<1x128xi32> -> vector<1x256xi32>
    %c0_i32_485 = arith.constant 0 : i32
    %1225 = vector.broadcast %c0_i32_485 : i32 to vector<1x256xi32>
    %1226 = arith.cmpi sge, %1223, %1225 : vector<1x256xi32>
    %c16_i32_486 = arith.constant 16 : i32
    %1227 = vector.broadcast %c16_i32_486 : i32 to vector<1x256xi32>
    %1228 = arith.cmpi slt, %1223, %1227 : vector<1x256xi32>
    %1229 = arith.andi %1226, %1228 : vector<1x256xi1>
    %c0_i32_487 = arith.constant 0 : i32
    %1230 = vector.broadcast %c0_i32_487 : i32 to vector<1x256xi32>
    %1231 = arith.cmpi sge, %1224, %1230 : vector<1x256xi32>
    %1232 = arith.andi %1229, %1231 : vector<1x256xi1>
    %c16_i32_488 = arith.constant 16 : i32
    %1233 = vector.broadcast %c16_i32_488 : i32 to vector<1x256xi32>
    %1234 = arith.cmpi slt, %1224, %1233 : vector<1x256xi32>
    %1235 = arith.andi %1232, %1234 : vector<1x256xi1>
    %1236 = vector.broadcast %31 : vector<16x1xi32> to vector<16x256xi32>
    %1237 = vector.broadcast %1223 : vector<1x256xi32> to vector<16x256xi32>
    %1238 = arith.cmpi eq, %1236, %1237 : vector<16x256xi32>
    %1239 = vector.broadcast %1235 : vector<1x256xi1> to vector<16x256xi1>
    %1240 = arith.andi %1238, %1239 : vector<16x256xi1>
    %1241 = arith.extui %1240 : vector<16x256xi1> to vector<16x256xi32>
    %1242 = arith.sitofp %1241 : vector<16x256xi32> to vector<16x256xf32>
    %1243 = vector.broadcast %32 : vector<16x1xi32> to vector<16x256xi32>
    %1244 = vector.broadcast %1224 : vector<1x256xi32> to vector<16x256xi32>
    %1245 = arith.cmpi eq, %1243, %1244 : vector<16x256xi32>
    %1246 = arith.extui %1245 : vector<16x256xi1> to vector<16x256xi32>
    %1247 = arith.sitofp %1246 : vector<16x256xi32> to vector<16x256xf32>
    %c0_489 = arith.constant 0 : index
    %c5 = arith.constant 5 : index
    %c0_490 = arith.constant 0 : index
    %c0_491 = arith.constant 0 : index
    %1248 = vector.load %arg5[%c0_489, %c5, %c0_490, %c0_491] : memref<1x8x32x16xf32, #tpu.memory_space<vmem>>, vector<1x1x32x16xf32>
    %1249 = vector.shape_cast %1248 : vector<1x1x32x16xf32> to vector<32x16xf32>
    %cst_492 = arith.constant dense<0.000000e+00> : vector<32x256xf32>
    %1250 = tpu.matmul %1249, %1242, %cst_492 {dimension_numbers = #tpu.dot_dimension_numbers<[1], [0], [0], [1], [0, 0, 1, 1], [], []>} : vector<32x16xf32>, vector<16x256xf32>, vector<32x256xf32> -> vector<32x256xf32>
    %1251 = vector.extract_strided_slice %1250 {offsets = [0, 0], sizes = [16, 256], strides = [1, 1]} : vector<32x256xf32> to vector<16x256xf32>
    %1252 = arith.mulf %1251, %1247 : vector<16x256xf32>
    %cst_493 = arith.constant dense<0.000000e+00> : vector<256xf32>
    %1253 = vector.multi_reduction <add>, %1252, %cst_493 [0] : vector<16x256xf32> to vector<256xf32>
    %1254 = vector.shape_cast %1253 : vector<256xf32> to vector<1x256xf32>
    %1255 = vector.extract_strided_slice %1250 {offsets = [16, 0], sizes = [16, 256], strides = [1, 1]} : vector<32x256xf32> to vector<16x256xf32>
    %1256 = arith.mulf %1255, %1247 : vector<16x256xf32>
    %cst_494 = arith.constant dense<0.000000e+00> : vector<256xf32>
    %1257 = vector.multi_reduction <add>, %1256, %cst_494 [0] : vector<16x256xf32> to vector<256xf32>
    %1258 = vector.shape_cast %1257 : vector<256xf32> to vector<1x256xf32>
    %1259 = vector.extract_strided_slice %1254 {offsets = [0, 0], sizes = [1, 128], strides = [1, 1]} : vector<1x256xf32> to vector<1x128xf32>
    %1260 = arith.addf %1259, %1134 : vector<1x128xf32>
    %1261 = vector.extract_strided_slice %1258 {offsets = [0, 0], sizes = [1, 128], strides = [1, 1]} : vector<1x256xf32> to vector<1x128xf32>
    %1262 = vector.extract_strided_slice %1254 {offsets = [0, 128], sizes = [1, 128], strides = [1, 1]} : vector<1x256xf32> to vector<1x128xf32>
    %1263 = arith.addf %1262, %1180 : vector<1x128xf32>
    %1264 = vector.extract_strided_slice %1258 {offsets = [0, 128], sizes = [1, 128], strides = [1, 1]} : vector<1x256xf32> to vector<1x128xf32>
    %c0_495 = arith.constant 0 : index
    %1265 = memref.load %arg8[%c0_495] : memref<3xf32, #tpu.memory_space<smem>>
    %c0_496 = arith.constant 0 : index
    %c0_497 = arith.constant 0 : index
    %1266 = memref.load %arg7[%c0_496, %c0_497] : memref<3x3xf32, #tpu.memory_space<smem>>
    %1267 = vector.broadcast %1266 : f32 to vector<1x128xf32>
    %1268 = arith.mulf %1267, %1130 : vector<1x128xf32>
    %1269 = vector.broadcast %1265 : f32 to vector<1x128xf32>
    %1270 = arith.addf %1269, %1268 : vector<1x128xf32>
    %c0_498 = arith.constant 0 : index
    %c1_499 = arith.constant 1 : index
    %1271 = memref.load %arg7[%c0_498, %c1_499] : memref<3x3xf32, #tpu.memory_space<smem>>
    %1272 = vector.broadcast %1271 : f32 to vector<1x128xf32>
    %1273 = arith.mulf %1272, %1261 : vector<1x128xf32>
    %1274 = arith.addf %1270, %1273 : vector<1x128xf32>
    %c0_500 = arith.constant 0 : index
    %c2_501 = arith.constant 2 : index
    %1275 = memref.load %arg7[%c0_500, %c2_501] : memref<3x3xf32, #tpu.memory_space<smem>>
    %1276 = vector.broadcast %1275 : f32 to vector<1x128xf32>
    %1277 = arith.mulf %1276, %1264 : vector<1x128xf32>
    %1278 = arith.addf %1274, %1277 : vector<1x128xf32>
    %c1_502 = arith.constant 1 : index
    %1279 = memref.load %arg8[%c1_502] : memref<3xf32, #tpu.memory_space<smem>>
    %c1_503 = arith.constant 1 : index
    %c0_504 = arith.constant 0 : index
    %1280 = memref.load %arg7[%c1_503, %c0_504] : memref<3x3xf32, #tpu.memory_space<smem>>
    %1281 = vector.broadcast %1280 : f32 to vector<1x128xf32>
    %1282 = arith.mulf %1281, %1130 : vector<1x128xf32>
    %1283 = vector.broadcast %1279 : f32 to vector<1x128xf32>
    %1284 = arith.addf %1283, %1282 : vector<1x128xf32>
    %c1_505 = arith.constant 1 : index
    %c1_506 = arith.constant 1 : index
    %1285 = memref.load %arg7[%c1_505, %c1_506] : memref<3x3xf32, #tpu.memory_space<smem>>
    %1286 = vector.broadcast %1285 : f32 to vector<1x128xf32>
    %1287 = arith.mulf %1286, %1261 : vector<1x128xf32>
    %1288 = arith.addf %1284, %1287 : vector<1x128xf32>
    %c1_507 = arith.constant 1 : index
    %c2_508 = arith.constant 2 : index
    %1289 = memref.load %arg7[%c1_507, %c2_508] : memref<3x3xf32, #tpu.memory_space<smem>>
    %1290 = vector.broadcast %1289 : f32 to vector<1x128xf32>
    %1291 = arith.mulf %1290, %1264 : vector<1x128xf32>
    %1292 = arith.addf %1288, %1291 : vector<1x128xf32>
    %c2_509 = arith.constant 2 : index
    %1293 = memref.load %arg8[%c2_509] : memref<3xf32, #tpu.memory_space<smem>>
    %c2_510 = arith.constant 2 : index
    %c0_511 = arith.constant 0 : index
    %1294 = memref.load %arg7[%c2_510, %c0_511] : memref<3x3xf32, #tpu.memory_space<smem>>
    %1295 = vector.broadcast %1294 : f32 to vector<1x128xf32>
    %1296 = arith.mulf %1295, %1130 : vector<1x128xf32>
    %1297 = vector.broadcast %1293 : f32 to vector<1x128xf32>
    %1298 = arith.addf %1297, %1296 : vector<1x128xf32>
    %c2_512 = arith.constant 2 : index
    %c1_513 = arith.constant 1 : index
    %1299 = memref.load %arg7[%c2_512, %c1_513] : memref<3x3xf32, #tpu.memory_space<smem>>
    %1300 = vector.broadcast %1299 : f32 to vector<1x128xf32>
    %1301 = arith.mulf %1300, %1261 : vector<1x128xf32>
    %1302 = arith.addf %1298, %1301 : vector<1x128xf32>
    %c2_514 = arith.constant 2 : index
    %c2_515 = arith.constant 2 : index
    %1303 = memref.load %arg7[%c2_514, %c2_515] : memref<3x3xf32, #tpu.memory_space<smem>>
    %1304 = vector.broadcast %1303 : f32 to vector<1x128xf32>
    %1305 = arith.mulf %1304, %1264 : vector<1x128xf32>
    %1306 = arith.addf %1302, %1305 : vector<1x128xf32>
    %1307 = arith.maximumf %1278, %1292 : vector<1x128xf32>
    %1308 = arith.maximumf %1307, %1306 : vector<1x128xf32>
    %1309 = arith.subf %1278, %1308 : vector<1x128xf32>
    %1310 = math.exp %1309 : vector<1x128xf32>
    %1311 = arith.subf %1292, %1308 : vector<1x128xf32>
    %1312 = math.exp %1311 : vector<1x128xf32>
    %1313 = arith.subf %1306, %1308 : vector<1x128xf32>
    %1314 = math.exp %1313 : vector<1x128xf32>
    %1315 = arith.addf %1310, %1312 : vector<1x128xf32>
    %1316 = arith.addf %1315, %1314 : vector<1x128xf32>
    %cst_516 = arith.constant 1.000000e+00 : f32
    %1317 = vector.broadcast %cst_516 : f32 to vector<1x128xf32>
    %1318 = arith.divf %1317, %1316 : vector<1x128xf32>
    %1319 = arith.mulf %1310, %1318 : vector<1x128xf32>
    %c0_517 = arith.constant 0 : index
    %c0_518 = arith.constant 0 : index
    %c5_519 = arith.constant 5 : index
    %c0_520 = arith.constant 0 : index
    %1320 = vector.load %arg10[%c0_517, %c0_518, %c5_519, %c0_520] : memref<1x3x8x128xf32, #tpu.memory_space<vmem>>, vector<1x1x1x128xf32>
    %1321 = vector.shape_cast %1320 : vector<1x1x1x128xf32> to vector<1x128xf32>
    %1322 = vector.shape_cast %1319 : vector<1x128xf32> to vector<1x1x1x128xf32>
    tpu.vector_store %arg10[%c0_517, %c0_518, %c5_519, %c0_520], %1322 {strides = array<i32>} : memref<1x3x8x128xf32, #tpu.memory_space<vmem>>, vector<1x1x1x128xf32>,
    %1323 = arith.mulf %1319, %1129 : vector<1x128xf32>
    %1324 = arith.mulf %1312, %1318 : vector<1x128xf32>
    %c0_521 = arith.constant 0 : index
    %c1_522 = arith.constant 1 : index
    %c5_523 = arith.constant 5 : index
    %c0_524 = arith.constant 0 : index
    %1325 = vector.load %arg10[%c0_521, %c1_522, %c5_523, %c0_524] : memref<1x3x8x128xf32, #tpu.memory_space<vmem>>, vector<1x1x1x128xf32>
    %1326 = vector.shape_cast %1325 : vector<1x1x1x128xf32> to vector<1x128xf32>
    %1327 = vector.shape_cast %1324 : vector<1x128xf32> to vector<1x1x1x128xf32>
    tpu.vector_store %arg10[%c0_521, %c1_522, %c5_523, %c0_524], %1327 {strides = array<i32>} : memref<1x3x8x128xf32, #tpu.memory_space<vmem>>, vector<1x1x1x128xf32>,
    %1328 = arith.mulf %1324, %1260 : vector<1x128xf32>
    %1329 = arith.addf %1323, %1328 : vector<1x128xf32>
    %1330 = arith.mulf %1314, %1318 : vector<1x128xf32>
    %c0_525 = arith.constant 0 : index
    %c2_526 = arith.constant 2 : index
    %c5_527 = arith.constant 5 : index
    %c0_528 = arith.constant 0 : index
    %1331 = vector.load %arg10[%c0_525, %c2_526, %c5_527, %c0_528] : memref<1x3x8x128xf32, #tpu.memory_space<vmem>>, vector<1x1x1x128xf32>
    %1332 = vector.shape_cast %1331 : vector<1x1x1x128xf32> to vector<1x128xf32>
    %1333 = vector.shape_cast %1330 : vector<1x128xf32> to vector<1x1x1x128xf32>
    tpu.vector_store %arg10[%c0_525, %c2_526, %c5_527, %c0_528], %1333 {strides = array<i32>} : memref<1x3x8x128xf32, #tpu.memory_space<vmem>>, vector<1x1x1x128xf32>,
    %1334 = arith.mulf %1330, %1263 : vector<1x128xf32>
    %1335 = arith.addf %1329, %1334 : vector<1x128xf32>
    %cst_529 = arith.constant 0.000000e+00 : f32
    %1336 = vector.broadcast %cst_529 : f32 to vector<1x128xf32>
    %1337 = arith.maximumf %1335, %1336 : vector<1x128xf32>
    %c0_530 = arith.constant 0 : index
    %c5_531 = arith.constant 5 : index
    %c0_532 = arith.constant 0 : index
    %1338 = vector.load %arg9[%c0_530, %c5_531, %c0_532] : memref<1x8x128xf32, #tpu.memory_space<vmem>>, vector<1x1x128xf32>
    %1339 = vector.shape_cast %1338 : vector<1x1x128xf32> to vector<1x128xf32>
    %1340 = vector.shape_cast %1337 : vector<1x128xf32> to vector<1x1x128xf32>
    tpu.vector_store %arg9[%c0_530, %c5_531, %c0_532], %1340 {strides = array<i32>} : memref<1x8x128xf32, #tpu.memory_space<vmem>>, vector<1x1x128xf32>,
    %c8_i32_533 = arith.constant 8 : i32
    %1341 = arith.muli %arg1, %c8_i32_533 : i32
    %c6_i32 = arith.constant 6 : i32
    %1342 = arith.addi %1341, %c6_i32 : i32
    %c0_534 = arith.constant 0 : index
    %1343 = arith.index_cast %1342 : i32 to index
    %1344 = memref.load %arg6[%c0_534, %1343] : memref<2x8xf32, #tpu.memory_space<smem>>
    %c1_535 = arith.constant 1 : index
    %1345 = arith.index_cast %1342 : i32 to index
    %1346 = memref.load %arg6[%c1_535, %1345] : memref<2x8xf32, #tpu.memory_space<smem>>
    %1347 = vector.extract_strided_slice %28 {offsets = [6, 0], sizes = [1, 128], strides = [1, 1]} : vector<8x128xf32> to vector<1x128xf32>
    %1348 = vector.extract_strided_slice %30 {offsets = [6, 0], sizes = [1, 128], strides = [1, 1]} : vector<8x128xf32> to vector<1x128xf32>
    %cst_536 = arith.constant 1.000000e+00 : f32
    %1349 = vector.broadcast %cst_536 : f32 to vector<1x128xf32>
    %1350 = arith.subf %1347, %1349 : vector<1x128xf32>
    %cst_537 = arith.constant 2.000000e-01 : f32
    %1351 = vector.broadcast %cst_537 : f32 to vector<1x128xf32>
    %1352 = arith.mulf %1350, %1351 : vector<1x128xf32>
    %1353 = vector.broadcast %1344 : f32 to vector<1x128xf32>
    %1354 = arith.mulf %1353, %1352 : vector<1x128xf32>
    %1355 = arith.addf %26, %1354 : vector<1x128xf32>
    %cst_538 = arith.constant 1.500000e+01 : f32
    %1356 = vector.broadcast %cst_538 : f32 to vector<1x128xf32>
    %1357 = arith.divf %1355, %1356 : vector<1x128xf32>
    %cst_539 = arith.constant 2.000000e+00 : f32
    %1358 = vector.broadcast %cst_539 : f32 to vector<1x128xf32>
    %1359 = arith.mulf %1357, %1358 : vector<1x128xf32>
    %cst_540 = arith.constant 1.000000e+00 : f32
    %1360 = vector.broadcast %cst_540 : f32 to vector<1x128xf32>
    %1361 = arith.subf %1359, %1360 : vector<1x128xf32>
    %1362 = vector.broadcast %1346 : f32 to vector<1x128xf32>
    %1363 = arith.mulf %1362, %1352 : vector<1x128xf32>
    %1364 = arith.addf %23, %1363 : vector<1x128xf32>
    %cst_541 = arith.constant 1.500000e+01 : f32
    %1365 = vector.broadcast %cst_541 : f32 to vector<1x128xf32>
    %1366 = arith.divf %1364, %1365 : vector<1x128xf32>
    %cst_542 = arith.constant 2.000000e+00 : f32
    %1367 = vector.broadcast %cst_542 : f32 to vector<1x128xf32>
    %1368 = arith.mulf %1366, %1367 : vector<1x128xf32>
    %cst_543 = arith.constant 1.000000e+00 : f32
    %1369 = vector.broadcast %cst_543 : f32 to vector<1x128xf32>
    %1370 = arith.subf %1368, %1369 : vector<1x128xf32>
    %cst_544 = arith.constant 1.000000e+00 : f32
    %1371 = vector.broadcast %cst_544 : f32 to vector<1x128xf32>
    %1372 = arith.addf %1361, %1371 : vector<1x128xf32>
    %cst_545 = arith.constant 1.600000e+01 : f32
    %1373 = vector.broadcast %cst_545 : f32 to vector<1x128xf32>
    %1374 = arith.mulf %1372, %1373 : vector<1x128xf32>
    %cst_546 = arith.constant 1.000000e+00 : f32
    %1375 = vector.broadcast %cst_546 : f32 to vector<1x128xf32>
    %1376 = arith.subf %1374, %1375 : vector<1x128xf32>
    %cst_547 = arith.constant 5.000000e-01 : f32
    %1377 = vector.broadcast %cst_547 : f32 to vector<1x128xf32>
    %1378 = arith.mulf %1376, %1377 : vector<1x128xf32>
    %cst_548 = arith.constant 1.000000e+00 : f32
    %1379 = vector.broadcast %cst_548 : f32 to vector<1x128xf32>
    %1380 = arith.addf %1370, %1379 : vector<1x128xf32>
    %cst_549 = arith.constant 1.600000e+01 : f32
    %1381 = vector.broadcast %cst_549 : f32 to vector<1x128xf32>
    %1382 = arith.mulf %1380, %1381 : vector<1x128xf32>
    %cst_550 = arith.constant 1.000000e+00 : f32
    %1383 = vector.broadcast %cst_550 : f32 to vector<1x128xf32>
    %1384 = arith.subf %1382, %1383 : vector<1x128xf32>
    %cst_551 = arith.constant 5.000000e-01 : f32
    %1385 = vector.broadcast %cst_551 : f32 to vector<1x128xf32>
    %1386 = arith.mulf %1384, %1385 : vector<1x128xf32>
    %cst_552 = arith.constant 5.000000e-01 : f32
    %1387 = vector.broadcast %cst_552 : f32 to vector<1x128xf32>
    %1388 = arith.addf %1378, %1387 : vector<1x128xf32>
    %1389 = math.floor %1388 : vector<1x128xf32>
    %1390 = arith.fptosi %1389 : vector<1x128xf32> to vector<1x128xi32>
    %cst_553 = arith.constant 5.000000e-01 : f32
    %1391 = vector.broadcast %cst_553 : f32 to vector<1x128xf32>
    %1392 = arith.addf %1386, %1391 : vector<1x128xf32>
    %1393 = math.floor %1392 : vector<1x128xf32>
    %1394 = arith.fptosi %1393 : vector<1x128xf32> to vector<1x128xi32>
    %cst_554 = arith.constant 1.000000e+00 : f32
    %1395 = vector.broadcast %cst_554 : f32 to vector<1x128xf32>
    %1396 = arith.subf %1347, %1395 : vector<1x128xf32>
    %cst_555 = arith.constant 5.000000e-01 : f32
    %1397 = vector.broadcast %cst_555 : f32 to vector<1x128xf32>
    %1398 = arith.mulf %1396, %1397 : vector<1x128xf32>
    %1399 = vector.broadcast %1344 : f32 to vector<1x128xf32>
    %1400 = arith.mulf %1399, %1398 : vector<1x128xf32>
    %1401 = arith.addf %26, %1400 : vector<1x128xf32>
    %cst_556 = arith.constant 1.500000e+01 : f32
    %1402 = vector.broadcast %cst_556 : f32 to vector<1x128xf32>
    %1403 = arith.divf %1401, %1402 : vector<1x128xf32>
    %cst_557 = arith.constant 2.000000e+00 : f32
    %1404 = vector.broadcast %cst_557 : f32 to vector<1x128xf32>
    %1405 = arith.mulf %1403, %1404 : vector<1x128xf32>
    %cst_558 = arith.constant 1.000000e+00 : f32
    %1406 = vector.broadcast %cst_558 : f32 to vector<1x128xf32>
    %1407 = arith.subf %1405, %1406 : vector<1x128xf32>
    %1408 = vector.broadcast %1346 : f32 to vector<1x128xf32>
    %1409 = arith.mulf %1408, %1398 : vector<1x128xf32>
    %1410 = arith.addf %23, %1409 : vector<1x128xf32>
    %cst_559 = arith.constant 1.500000e+01 : f32
    %1411 = vector.broadcast %cst_559 : f32 to vector<1x128xf32>
    %1412 = arith.divf %1410, %1411 : vector<1x128xf32>
    %cst_560 = arith.constant 2.000000e+00 : f32
    %1413 = vector.broadcast %cst_560 : f32 to vector<1x128xf32>
    %1414 = arith.mulf %1412, %1413 : vector<1x128xf32>
    %cst_561 = arith.constant 1.000000e+00 : f32
    %1415 = vector.broadcast %cst_561 : f32 to vector<1x128xf32>
    %1416 = arith.subf %1414, %1415 : vector<1x128xf32>
    %cst_562 = arith.constant 1.000000e+00 : f32
    %1417 = vector.broadcast %cst_562 : f32 to vector<1x128xf32>
    %1418 = arith.addf %1407, %1417 : vector<1x128xf32>
    %cst_563 = arith.constant 1.600000e+01 : f32
    %1419 = vector.broadcast %cst_563 : f32 to vector<1x128xf32>
    %1420 = arith.mulf %1418, %1419 : vector<1x128xf32>
    %cst_564 = arith.constant 1.000000e+00 : f32
    %1421 = vector.broadcast %cst_564 : f32 to vector<1x128xf32>
    %1422 = arith.subf %1420, %1421 : vector<1x128xf32>
    %cst_565 = arith.constant 5.000000e-01 : f32
    %1423 = vector.broadcast %cst_565 : f32 to vector<1x128xf32>
    %1424 = arith.mulf %1422, %1423 : vector<1x128xf32>
    %cst_566 = arith.constant 1.000000e+00 : f32
    %1425 = vector.broadcast %cst_566 : f32 to vector<1x128xf32>
    %1426 = arith.addf %1416, %1425 : vector<1x128xf32>
    %cst_567 = arith.constant 1.600000e+01 : f32
    %1427 = vector.broadcast %cst_567 : f32 to vector<1x128xf32>
    %1428 = arith.mulf %1426, %1427 : vector<1x128xf32>
    %cst_568 = arith.constant 1.000000e+00 : f32
    %1429 = vector.broadcast %cst_568 : f32 to vector<1x128xf32>
    %1430 = arith.subf %1428, %1429 : vector<1x128xf32>
    %cst_569 = arith.constant 5.000000e-01 : f32
    %1431 = vector.broadcast %cst_569 : f32 to vector<1x128xf32>
    %1432 = arith.mulf %1430, %1431 : vector<1x128xf32>
    %cst_570 = arith.constant 5.000000e-01 : f32
    %1433 = vector.broadcast %cst_570 : f32 to vector<1x128xf32>
    %1434 = arith.addf %1424, %1433 : vector<1x128xf32>
    %1435 = math.floor %1434 : vector<1x128xf32>
    %1436 = arith.fptosi %1435 : vector<1x128xf32> to vector<1x128xi32>
    %cst_571 = arith.constant 5.000000e-01 : f32
    %1437 = vector.broadcast %cst_571 : f32 to vector<1x128xf32>
    %1438 = arith.addf %1432, %1437 : vector<1x128xf32>
    %1439 = math.floor %1438 : vector<1x128xf32>
    %1440 = arith.fptosi %1439 : vector<1x128xf32> to vector<1x128xi32>
    %1441 = tpu.concatenate %1390, %1436 in 1 : vector<1x128xi32>, vector<1x128xi32> -> vector<1x256xi32>
    %1442 = tpu.concatenate %1394, %1440 in 1 : vector<1x128xi32>, vector<1x128xi32> -> vector<1x256xi32>
    %c0_i32_572 = arith.constant 0 : i32
    %1443 = vector.broadcast %c0_i32_572 : i32 to vector<1x256xi32>
    %1444 = arith.cmpi sge, %1441, %1443 : vector<1x256xi32>
    %c16_i32_573 = arith.constant 16 : i32
    %1445 = vector.broadcast %c16_i32_573 : i32 to vector<1x256xi32>
    %1446 = arith.cmpi slt, %1441, %1445 : vector<1x256xi32>
    %1447 = arith.andi %1444, %1446 : vector<1x256xi1>
    %c0_i32_574 = arith.constant 0 : i32
    %1448 = vector.broadcast %c0_i32_574 : i32 to vector<1x256xi32>
    %1449 = arith.cmpi sge, %1442, %1448 : vector<1x256xi32>
    %1450 = arith.andi %1447, %1449 : vector<1x256xi1>
    %c16_i32_575 = arith.constant 16 : i32
    %1451 = vector.broadcast %c16_i32_575 : i32 to vector<1x256xi32>
    %1452 = arith.cmpi slt, %1442, %1451 : vector<1x256xi32>
    %1453 = arith.andi %1450, %1452 : vector<1x256xi1>
    %1454 = vector.broadcast %31 : vector<16x1xi32> to vector<16x256xi32>
    %1455 = vector.broadcast %1441 : vector<1x256xi32> to vector<16x256xi32>
    %1456 = arith.cmpi eq, %1454, %1455 : vector<16x256xi32>
    %1457 = vector.broadcast %1453 : vector<1x256xi1> to vector<16x256xi1>
    %1458 = arith.andi %1456, %1457 : vector<16x256xi1>
    %1459 = arith.extui %1458 : vector<16x256xi1> to vector<16x256xi32>
    %1460 = arith.sitofp %1459 : vector<16x256xi32> to vector<16x256xf32>
    %1461 = vector.broadcast %32 : vector<16x1xi32> to vector<16x256xi32>
    %1462 = vector.broadcast %1442 : vector<1x256xi32> to vector<16x256xi32>
    %1463 = arith.cmpi eq, %1461, %1462 : vector<16x256xi32>
    %1464 = arith.extui %1463 : vector<16x256xi1> to vector<16x256xi32>
    %1465 = arith.sitofp %1464 : vector<16x256xi32> to vector<16x256xf32>
    %c0_576 = arith.constant 0 : index
    %c6 = arith.constant 6 : index
    %c0_577 = arith.constant 0 : index
    %c0_578 = arith.constant 0 : index
    %1466 = vector.load %arg5[%c0_576, %c6, %c0_577, %c0_578] : memref<1x8x32x16xf32, #tpu.memory_space<vmem>>, vector<1x1x32x16xf32>
    %1467 = vector.shape_cast %1466 : vector<1x1x32x16xf32> to vector<32x16xf32>
    %cst_579 = arith.constant dense<0.000000e+00> : vector<32x256xf32>
    %1468 = tpu.matmul %1467, %1460, %cst_579 {dimension_numbers = #tpu.dot_dimension_numbers<[1], [0], [0], [1], [0, 0, 1, 1], [], []>} : vector<32x16xf32>, vector<16x256xf32>, vector<32x256xf32> -> vector<32x256xf32>
    %1469 = vector.extract_strided_slice %1468 {offsets = [0, 0], sizes = [16, 256], strides = [1, 1]} : vector<32x256xf32> to vector<16x256xf32>
    %1470 = arith.mulf %1469, %1465 : vector<16x256xf32>
    %cst_580 = arith.constant dense<0.000000e+00> : vector<256xf32>
    %1471 = vector.multi_reduction <add>, %1470, %cst_580 [0] : vector<16x256xf32> to vector<256xf32>
    %1472 = vector.shape_cast %1471 : vector<256xf32> to vector<1x256xf32>
    %1473 = vector.extract_strided_slice %1468 {offsets = [16, 0], sizes = [16, 256], strides = [1, 1]} : vector<32x256xf32> to vector<16x256xf32>
    %1474 = arith.mulf %1473, %1465 : vector<16x256xf32>
    %cst_581 = arith.constant dense<0.000000e+00> : vector<256xf32>
    %1475 = vector.multi_reduction <add>, %1474, %cst_581 [0] : vector<16x256xf32> to vector<256xf32>
    %1476 = vector.shape_cast %1475 : vector<256xf32> to vector<1x256xf32>
    %1477 = vector.extract_strided_slice %1472 {offsets = [0, 0], sizes = [1, 128], strides = [1, 1]} : vector<1x256xf32> to vector<1x128xf32>
    %1478 = arith.addf %1477, %1352 : vector<1x128xf32>
    %1479 = vector.extract_strided_slice %1476 {offsets = [0, 0], sizes = [1, 128], strides = [1, 1]} : vector<1x256xf32> to vector<1x128xf32>
    %1480 = vector.extract_strided_slice %1472 {offsets = [0, 128], sizes = [1, 128], strides = [1, 1]} : vector<1x256xf32> to vector<1x128xf32>
    %1481 = arith.addf %1480, %1398 : vector<1x128xf32>
    %1482 = vector.extract_strided_slice %1476 {offsets = [0, 128], sizes = [1, 128], strides = [1, 1]} : vector<1x256xf32> to vector<1x128xf32>
    %c0_582 = arith.constant 0 : index
    %1483 = memref.load %arg8[%c0_582] : memref<3xf32, #tpu.memory_space<smem>>
    %c0_583 = arith.constant 0 : index
    %c0_584 = arith.constant 0 : index
    %1484 = memref.load %arg7[%c0_583, %c0_584] : memref<3x3xf32, #tpu.memory_space<smem>>
    %1485 = vector.broadcast %1484 : f32 to vector<1x128xf32>
    %1486 = arith.mulf %1485, %1348 : vector<1x128xf32>
    %1487 = vector.broadcast %1483 : f32 to vector<1x128xf32>
    %1488 = arith.addf %1487, %1486 : vector<1x128xf32>
    %c0_585 = arith.constant 0 : index
    %c1_586 = arith.constant 1 : index
    %1489 = memref.load %arg7[%c0_585, %c1_586] : memref<3x3xf32, #tpu.memory_space<smem>>
    %1490 = vector.broadcast %1489 : f32 to vector<1x128xf32>
    %1491 = arith.mulf %1490, %1479 : vector<1x128xf32>
    %1492 = arith.addf %1488, %1491 : vector<1x128xf32>
    %c0_587 = arith.constant 0 : index
    %c2_588 = arith.constant 2 : index
    %1493 = memref.load %arg7[%c0_587, %c2_588] : memref<3x3xf32, #tpu.memory_space<smem>>
    %1494 = vector.broadcast %1493 : f32 to vector<1x128xf32>
    %1495 = arith.mulf %1494, %1482 : vector<1x128xf32>
    %1496 = arith.addf %1492, %1495 : vector<1x128xf32>
    %c1_589 = arith.constant 1 : index
    %1497 = memref.load %arg8[%c1_589] : memref<3xf32, #tpu.memory_space<smem>>
    %c1_590 = arith.constant 1 : index
    %c0_591 = arith.constant 0 : index
    %1498 = memref.load %arg7[%c1_590, %c0_591] : memref<3x3xf32, #tpu.memory_space<smem>>
    %1499 = vector.broadcast %1498 : f32 to vector<1x128xf32>
    %1500 = arith.mulf %1499, %1348 : vector<1x128xf32>
    %1501 = vector.broadcast %1497 : f32 to vector<1x128xf32>
    %1502 = arith.addf %1501, %1500 : vector<1x128xf32>
    %c1_592 = arith.constant 1 : index
    %c1_593 = arith.constant 1 : index
    %1503 = memref.load %arg7[%c1_592, %c1_593] : memref<3x3xf32, #tpu.memory_space<smem>>
    %1504 = vector.broadcast %1503 : f32 to vector<1x128xf32>
    %1505 = arith.mulf %1504, %1479 : vector<1x128xf32>
    %1506 = arith.addf %1502, %1505 : vector<1x128xf32>
    %c1_594 = arith.constant 1 : index
    %c2_595 = arith.constant 2 : index
    %1507 = memref.load %arg7[%c1_594, %c2_595] : memref<3x3xf32, #tpu.memory_space<smem>>
    %1508 = vector.broadcast %1507 : f32 to vector<1x128xf32>
    %1509 = arith.mulf %1508, %1482 : vector<1x128xf32>
    %1510 = arith.addf %1506, %1509 : vector<1x128xf32>
    %c2_596 = arith.constant 2 : index
    %1511 = memref.load %arg8[%c2_596] : memref<3xf32, #tpu.memory_space<smem>>
    %c2_597 = arith.constant 2 : index
    %c0_598 = arith.constant 0 : index
    %1512 = memref.load %arg7[%c2_597, %c0_598] : memref<3x3xf32, #tpu.memory_space<smem>>
    %1513 = vector.broadcast %1512 : f32 to vector<1x128xf32>
    %1514 = arith.mulf %1513, %1348 : vector<1x128xf32>
    %1515 = vector.broadcast %1511 : f32 to vector<1x128xf32>
    %1516 = arith.addf %1515, %1514 : vector<1x128xf32>
    %c2_599 = arith.constant 2 : index
    %c1_600 = arith.constant 1 : index
    %1517 = memref.load %arg7[%c2_599, %c1_600] : memref<3x3xf32, #tpu.memory_space<smem>>
    %1518 = vector.broadcast %1517 : f32 to vector<1x128xf32>
    %1519 = arith.mulf %1518, %1479 : vector<1x128xf32>
    %1520 = arith.addf %1516, %1519 : vector<1x128xf32>
    %c2_601 = arith.constant 2 : index
    %c2_602 = arith.constant 2 : index
    %1521 = memref.load %arg7[%c2_601, %c2_602] : memref<3x3xf32, #tpu.memory_space<smem>>
    %1522 = vector.broadcast %1521 : f32 to vector<1x128xf32>
    %1523 = arith.mulf %1522, %1482 : vector<1x128xf32>
    %1524 = arith.addf %1520, %1523 : vector<1x128xf32>
    %1525 = arith.maximumf %1496, %1510 : vector<1x128xf32>
    %1526 = arith.maximumf %1525, %1524 : vector<1x128xf32>
    %1527 = arith.subf %1496, %1526 : vector<1x128xf32>
    %1528 = math.exp %1527 : vector<1x128xf32>
    %1529 = arith.subf %1510, %1526 : vector<1x128xf32>
    %1530 = math.exp %1529 : vector<1x128xf32>
    %1531 = arith.subf %1524, %1526 : vector<1x128xf32>
    %1532 = math.exp %1531 : vector<1x128xf32>
    %1533 = arith.addf %1528, %1530 : vector<1x128xf32>
    %1534 = arith.addf %1533, %1532 : vector<1x128xf32>
    %cst_603 = arith.constant 1.000000e+00 : f32
    %1535 = vector.broadcast %cst_603 : f32 to vector<1x128xf32>
    %1536 = arith.divf %1535, %1534 : vector<1x128xf32>
    %1537 = arith.mulf %1528, %1536 : vector<1x128xf32>
    %c0_604 = arith.constant 0 : index
    %c0_605 = arith.constant 0 : index
    %c6_606 = arith.constant 6 : index
    %c0_607 = arith.constant 0 : index
    %1538 = vector.load %arg10[%c0_604, %c0_605, %c6_606, %c0_607] : memref<1x3x8x128xf32, #tpu.memory_space<vmem>>, vector<1x1x1x128xf32>
    %1539 = vector.shape_cast %1538 : vector<1x1x1x128xf32> to vector<1x128xf32>
    %1540 = vector.shape_cast %1537 : vector<1x128xf32> to vector<1x1x1x128xf32>
    tpu.vector_store %arg10[%c0_604, %c0_605, %c6_606, %c0_607], %1540 {strides = array<i32>} : memref<1x3x8x128xf32, #tpu.memory_space<vmem>>, vector<1x1x1x128xf32>,
    %1541 = arith.mulf %1537, %1347 : vector<1x128xf32>
    %1542 = arith.mulf %1530, %1536 : vector<1x128xf32>
    %c0_608 = arith.constant 0 : index
    %c1_609 = arith.constant 1 : index
    %c6_610 = arith.constant 6 : index
    %c0_611 = arith.constant 0 : index
    %1543 = vector.load %arg10[%c0_608, %c1_609, %c6_610, %c0_611] : memref<1x3x8x128xf32, #tpu.memory_space<vmem>>, vector<1x1x1x128xf32>
    %1544 = vector.shape_cast %1543 : vector<1x1x1x128xf32> to vector<1x128xf32>
    %1545 = vector.shape_cast %1542 : vector<1x128xf32> to vector<1x1x1x128xf32>
    tpu.vector_store %arg10[%c0_608, %c1_609, %c6_610, %c0_611], %1545 {strides = array<i32>} : memref<1x3x8x128xf32, #tpu.memory_space<vmem>>, vector<1x1x1x128xf32>,
    %1546 = arith.mulf %1542, %1478 : vector<1x128xf32>
    %1547 = arith.addf %1541, %1546 : vector<1x128xf32>
    %1548 = arith.mulf %1532, %1536 : vector<1x128xf32>
    %c0_612 = arith.constant 0 : index
    %c2_613 = arith.constant 2 : index
    %c6_614 = arith.constant 6 : index
    %c0_615 = arith.constant 0 : index
    %1549 = vector.load %arg10[%c0_612, %c2_613, %c6_614, %c0_615] : memref<1x3x8x128xf32, #tpu.memory_space<vmem>>, vector<1x1x1x128xf32>
    %1550 = vector.shape_cast %1549 : vector<1x1x1x128xf32> to vector<1x128xf32>
    %1551 = vector.shape_cast %1548 : vector<1x128xf32> to vector<1x1x1x128xf32>
    tpu.vector_store %arg10[%c0_612, %c2_613, %c6_614, %c0_615], %1551 {strides = array<i32>} : memref<1x3x8x128xf32, #tpu.memory_space<vmem>>, vector<1x1x1x128xf32>,
    %1552 = arith.mulf %1548, %1481 : vector<1x128xf32>
    %1553 = arith.addf %1547, %1552 : vector<1x128xf32>
    %cst_616 = arith.constant 0.000000e+00 : f32
    %1554 = vector.broadcast %cst_616 : f32 to vector<1x128xf32>
    %1555 = arith.maximumf %1553, %1554 : vector<1x128xf32>
    %c0_617 = arith.constant 0 : index
    %c6_618 = arith.constant 6 : index
    %c0_619 = arith.constant 0 : index
    %1556 = vector.load %arg9[%c0_617, %c6_618, %c0_619] : memref<1x8x128xf32, #tpu.memory_space<vmem>>, vector<1x1x128xf32>
    %1557 = vector.shape_cast %1556 : vector<1x1x128xf32> to vector<1x128xf32>
    %1558 = vector.shape_cast %1555 : vector<1x128xf32> to vector<1x1x128xf32>
    tpu.vector_store %arg9[%c0_617, %c6_618, %c0_619], %1558 {strides = array<i32>} : memref<1x8x128xf32, #tpu.memory_space<vmem>>, vector<1x1x128xf32>,
    %c8_i32_620 = arith.constant 8 : i32
    %1559 = arith.muli %arg1, %c8_i32_620 : i32
    %c7_i32 = arith.constant 7 : i32
    %1560 = arith.addi %1559, %c7_i32 : i32
    %c0_621 = arith.constant 0 : index
    %1561 = arith.index_cast %1560 : i32 to index
    %1562 = memref.load %arg6[%c0_621, %1561] : memref<2x8xf32, #tpu.memory_space<smem>>
    %c1_622 = arith.constant 1 : index
    %1563 = arith.index_cast %1560 : i32 to index
    %1564 = memref.load %arg6[%c1_622, %1563] : memref<2x8xf32, #tpu.memory_space<smem>>
    %1565 = vector.extract_strided_slice %28 {offsets = [7, 0], sizes = [1, 128], strides = [1, 1]} : vector<8x128xf32> to vector<1x128xf32>
    %1566 = vector.extract_strided_slice %30 {offsets = [7, 0], sizes = [1, 128], strides = [1, 1]} : vector<8x128xf32> to vector<1x128xf32>
    %cst_623 = arith.constant 1.000000e+00 : f32
    %1567 = vector.broadcast %cst_623 : f32 to vector<1x128xf32>
    %1568 = arith.subf %1565, %1567 : vector<1x128xf32>
    %cst_624 = arith.constant 2.000000e-01 : f32
    %1569 = vector.broadcast %cst_624 : f32 to vector<1x128xf32>
    %1570 = arith.mulf %1568, %1569 : vector<1x128xf32>
    %1571 = vector.broadcast %1562 : f32 to vector<1x128xf32>
    %1572 = arith.mulf %1571, %1570 : vector<1x128xf32>
    %1573 = arith.addf %26, %1572 : vector<1x128xf32>
    %cst_625 = arith.constant 1.500000e+01 : f32
    %1574 = vector.broadcast %cst_625 : f32 to vector<1x128xf32>
    %1575 = arith.divf %1573, %1574 : vector<1x128xf32>
    %cst_626 = arith.constant 2.000000e+00 : f32
    %1576 = vector.broadcast %cst_626 : f32 to vector<1x128xf32>
    %1577 = arith.mulf %1575, %1576 : vector<1x128xf32>
    %cst_627 = arith.constant 1.000000e+00 : f32
    %1578 = vector.broadcast %cst_627 : f32 to vector<1x128xf32>
    %1579 = arith.subf %1577, %1578 : vector<1x128xf32>
    %1580 = vector.broadcast %1564 : f32 to vector<1x128xf32>
    %1581 = arith.mulf %1580, %1570 : vector<1x128xf32>
    %1582 = arith.addf %23, %1581 : vector<1x128xf32>
    %cst_628 = arith.constant 1.500000e+01 : f32
    %1583 = vector.broadcast %cst_628 : f32 to vector<1x128xf32>
    %1584 = arith.divf %1582, %1583 : vector<1x128xf32>
    %cst_629 = arith.constant 2.000000e+00 : f32
    %1585 = vector.broadcast %cst_629 : f32 to vector<1x128xf32>
    %1586 = arith.mulf %1584, %1585 : vector<1x128xf32>
    %cst_630 = arith.constant 1.000000e+00 : f32
    %1587 = vector.broadcast %cst_630 : f32 to vector<1x128xf32>
    %1588 = arith.subf %1586, %1587 : vector<1x128xf32>
    %cst_631 = arith.constant 1.000000e+00 : f32
    %1589 = vector.broadcast %cst_631 : f32 to vector<1x128xf32>
    %1590 = arith.addf %1579, %1589 : vector<1x128xf32>
    %cst_632 = arith.constant 1.600000e+01 : f32
    %1591 = vector.broadcast %cst_632 : f32 to vector<1x128xf32>
    %1592 = arith.mulf %1590, %1591 : vector<1x128xf32>
    %cst_633 = arith.constant 1.000000e+00 : f32
    %1593 = vector.broadcast %cst_633 : f32 to vector<1x128xf32>
    %1594 = arith.subf %1592, %1593 : vector<1x128xf32>
    %cst_634 = arith.constant 5.000000e-01 : f32
    %1595 = vector.broadcast %cst_634 : f32 to vector<1x128xf32>
    %1596 = arith.mulf %1594, %1595 : vector<1x128xf32>
    %cst_635 = arith.constant 1.000000e+00 : f32
    %1597 = vector.broadcast %cst_635 : f32 to vector<1x128xf32>
    %1598 = arith.addf %1588, %1597 : vector<1x128xf32>
    %cst_636 = arith.constant 1.600000e+01 : f32
    %1599 = vector.broadcast %cst_636 : f32 to vector<1x128xf32>
    %1600 = arith.mulf %1598, %1599 : vector<1x128xf32>
    %cst_637 = arith.constant 1.000000e+00 : f32
    %1601 = vector.broadcast %cst_637 : f32 to vector<1x128xf32>
    %1602 = arith.subf %1600, %1601 : vector<1x128xf32>
    %cst_638 = arith.constant 5.000000e-01 : f32
    %1603 = vector.broadcast %cst_638 : f32 to vector<1x128xf32>
    %1604 = arith.mulf %1602, %1603 : vector<1x128xf32>
    %cst_639 = arith.constant 5.000000e-01 : f32
    %1605 = vector.broadcast %cst_639 : f32 to vector<1x128xf32>
    %1606 = arith.addf %1596, %1605 : vector<1x128xf32>
    %1607 = math.floor %1606 : vector<1x128xf32>
    %1608 = arith.fptosi %1607 : vector<1x128xf32> to vector<1x128xi32>
    %cst_640 = arith.constant 5.000000e-01 : f32
    %1609 = vector.broadcast %cst_640 : f32 to vector<1x128xf32>
    %1610 = arith.addf %1604, %1609 : vector<1x128xf32>
    %1611 = math.floor %1610 : vector<1x128xf32>
    %1612 = arith.fptosi %1611 : vector<1x128xf32> to vector<1x128xi32>
    %cst_641 = arith.constant 1.000000e+00 : f32
    %1613 = vector.broadcast %cst_641 : f32 to vector<1x128xf32>
    %1614 = arith.subf %1565, %1613 : vector<1x128xf32>
    %cst_642 = arith.constant 5.000000e-01 : f32
    %1615 = vector.broadcast %cst_642 : f32 to vector<1x128xf32>
    %1616 = arith.mulf %1614, %1615 : vector<1x128xf32>
    %1617 = vector.broadcast %1562 : f32 to vector<1x128xf32>
    %1618 = arith.mulf %1617, %1616 : vector<1x128xf32>
    %1619 = arith.addf %26, %1618 : vector<1x128xf32>
    %cst_643 = arith.constant 1.500000e+01 : f32
    %1620 = vector.broadcast %cst_643 : f32 to vector<1x128xf32>
    %1621 = arith.divf %1619, %1620 : vector<1x128xf32>
    %cst_644 = arith.constant 2.000000e+00 : f32
    %1622 = vector.broadcast %cst_644 : f32 to vector<1x128xf32>
    %1623 = arith.mulf %1621, %1622 : vector<1x128xf32>
    %cst_645 = arith.constant 1.000000e+00 : f32
    %1624 = vector.broadcast %cst_645 : f32 to vector<1x128xf32>
    %1625 = arith.subf %1623, %1624 : vector<1x128xf32>
    %1626 = vector.broadcast %1564 : f32 to vector<1x128xf32>
    %1627 = arith.mulf %1626, %1616 : vector<1x128xf32>
    %1628 = arith.addf %23, %1627 : vector<1x128xf32>
    %cst_646 = arith.constant 1.500000e+01 : f32
    %1629 = vector.broadcast %cst_646 : f32 to vector<1x128xf32>
    %1630 = arith.divf %1628, %1629 : vector<1x128xf32>
    %cst_647 = arith.constant 2.000000e+00 : f32
    %1631 = vector.broadcast %cst_647 : f32 to vector<1x128xf32>
    %1632 = arith.mulf %1630, %1631 : vector<1x128xf32>
    %cst_648 = arith.constant 1.000000e+00 : f32
    %1633 = vector.broadcast %cst_648 : f32 to vector<1x128xf32>
    %1634 = arith.subf %1632, %1633 : vector<1x128xf32>
    %cst_649 = arith.constant 1.000000e+00 : f32
    %1635 = vector.broadcast %cst_649 : f32 to vector<1x128xf32>
    %1636 = arith.addf %1625, %1635 : vector<1x128xf32>
    %cst_650 = arith.constant 1.600000e+01 : f32
    %1637 = vector.broadcast %cst_650 : f32 to vector<1x128xf32>
    %1638 = arith.mulf %1636, %1637 : vector<1x128xf32>
    %cst_651 = arith.constant 1.000000e+00 : f32
    %1639 = vector.broadcast %cst_651 : f32 to vector<1x128xf32>
    %1640 = arith.subf %1638, %1639 : vector<1x128xf32>
    %cst_652 = arith.constant 5.000000e-01 : f32
    %1641 = vector.broadcast %cst_652 : f32 to vector<1x128xf32>
    %1642 = arith.mulf %1640, %1641 : vector<1x128xf32>
    %cst_653 = arith.constant 1.000000e+00 : f32
    %1643 = vector.broadcast %cst_653 : f32 to vector<1x128xf32>
    %1644 = arith.addf %1634, %1643 : vector<1x128xf32>
    %cst_654 = arith.constant 1.600000e+01 : f32
    %1645 = vector.broadcast %cst_654 : f32 to vector<1x128xf32>
    %1646 = arith.mulf %1644, %1645 : vector<1x128xf32>
    %cst_655 = arith.constant 1.000000e+00 : f32
    %1647 = vector.broadcast %cst_655 : f32 to vector<1x128xf32>
    %1648 = arith.subf %1646, %1647 : vector<1x128xf32>
    %cst_656 = arith.constant 5.000000e-01 : f32
    %1649 = vector.broadcast %cst_656 : f32 to vector<1x128xf32>
    %1650 = arith.mulf %1648, %1649 : vector<1x128xf32>
    %cst_657 = arith.constant 5.000000e-01 : f32
    %1651 = vector.broadcast %cst_657 : f32 to vector<1x128xf32>
    %1652 = arith.addf %1642, %1651 : vector<1x128xf32>
    %1653 = math.floor %1652 : vector<1x128xf32>
    %1654 = arith.fptosi %1653 : vector<1x128xf32> to vector<1x128xi32>
    %cst_658 = arith.constant 5.000000e-01 : f32
    %1655 = vector.broadcast %cst_658 : f32 to vector<1x128xf32>
    %1656 = arith.addf %1650, %1655 : vector<1x128xf32>
    %1657 = math.floor %1656 : vector<1x128xf32>
    %1658 = arith.fptosi %1657 : vector<1x128xf32> to vector<1x128xi32>
    %1659 = tpu.concatenate %1608, %1654 in 1 : vector<1x128xi32>, vector<1x128xi32> -> vector<1x256xi32>
    %1660 = tpu.concatenate %1612, %1658 in 1 : vector<1x128xi32>, vector<1x128xi32> -> vector<1x256xi32>
    %c0_i32_659 = arith.constant 0 : i32
    %1661 = vector.broadcast %c0_i32_659 : i32 to vector<1x256xi32>
    %1662 = arith.cmpi sge, %1659, %1661 : vector<1x256xi32>
    %c16_i32_660 = arith.constant 16 : i32
    %1663 = vector.broadcast %c16_i32_660 : i32 to vector<1x256xi32>
    %1664 = arith.cmpi slt, %1659, %1663 : vector<1x256xi32>
    %1665 = arith.andi %1662, %1664 : vector<1x256xi1>
    %c0_i32_661 = arith.constant 0 : i32
    %1666 = vector.broadcast %c0_i32_661 : i32 to vector<1x256xi32>
    %1667 = arith.cmpi sge, %1660, %1666 : vector<1x256xi32>
    %1668 = arith.andi %1665, %1667 : vector<1x256xi1>
    %c16_i32_662 = arith.constant 16 : i32
    %1669 = vector.broadcast %c16_i32_662 : i32 to vector<1x256xi32>
    %1670 = arith.cmpi slt, %1660, %1669 : vector<1x256xi32>
    %1671 = arith.andi %1668, %1670 : vector<1x256xi1>
    %1672 = vector.broadcast %31 : vector<16x1xi32> to vector<16x256xi32>
    %1673 = vector.broadcast %1659 : vector<1x256xi32> to vector<16x256xi32>
    %1674 = arith.cmpi eq, %1672, %1673 : vector<16x256xi32>
    %1675 = vector.broadcast %1671 : vector<1x256xi1> to vector<16x256xi1>
    %1676 = arith.andi %1674, %1675 : vector<16x256xi1>
    %1677 = arith.extui %1676 : vector<16x256xi1> to vector<16x256xi32>
    %1678 = arith.sitofp %1677 : vector<16x256xi32> to vector<16x256xf32>
    %1679 = vector.broadcast %32 : vector<16x1xi32> to vector<16x256xi32>
    %1680 = vector.broadcast %1660 : vector<1x256xi32> to vector<16x256xi32>
    %1681 = arith.cmpi eq, %1679, %1680 : vector<16x256xi32>
    %1682 = arith.extui %1681 : vector<16x256xi1> to vector<16x256xi32>
    %1683 = arith.sitofp %1682 : vector<16x256xi32> to vector<16x256xf32>
    %c0_663 = arith.constant 0 : index
    %c7 = arith.constant 7 : index
    %c0_664 = arith.constant 0 : index
    %c0_665 = arith.constant 0 : index
    %1684 = vector.load %arg5[%c0_663, %c7, %c0_664, %c0_665] : memref<1x8x32x16xf32, #tpu.memory_space<vmem>>, vector<1x1x32x16xf32>
    %1685 = vector.shape_cast %1684 : vector<1x1x32x16xf32> to vector<32x16xf32>
    %cst_666 = arith.constant dense<0.000000e+00> : vector<32x256xf32>
    %1686 = tpu.matmul %1685, %1678, %cst_666 {dimension_numbers = #tpu.dot_dimension_numbers<[1], [0], [0], [1], [0, 0, 1, 1], [], []>} : vector<32x16xf32>, vector<16x256xf32>, vector<32x256xf32> -> vector<32x256xf32>
    %1687 = vector.extract_strided_slice %1686 {offsets = [0, 0], sizes = [16, 256], strides = [1, 1]} : vector<32x256xf32> to vector<16x256xf32>
    %1688 = arith.mulf %1687, %1683 : vector<16x256xf32>
    %cst_667 = arith.constant dense<0.000000e+00> : vector<256xf32>
    %1689 = vector.multi_reduction <add>, %1688, %cst_667 [0] : vector<16x256xf32> to vector<256xf32>
    %1690 = vector.shape_cast %1689 : vector<256xf32> to vector<1x256xf32>
    %1691 = vector.extract_strided_slice %1686 {offsets = [16, 0], sizes = [16, 256], strides = [1, 1]} : vector<32x256xf32> to vector<16x256xf32>
    %1692 = arith.mulf %1691, %1683 : vector<16x256xf32>
    %cst_668 = arith.constant dense<0.000000e+00> : vector<256xf32>
    %1693 = vector.multi_reduction <add>, %1692, %cst_668 [0] : vector<16x256xf32> to vector<256xf32>
    %1694 = vector.shape_cast %1693 : vector<256xf32> to vector<1x256xf32>
    %1695 = vector.extract_strided_slice %1690 {offsets = [0, 0], sizes = [1, 128], strides = [1, 1]} : vector<1x256xf32> to vector<1x128xf32>
    %1696 = arith.addf %1695, %1570 : vector<1x128xf32>
    %1697 = vector.extract_strided_slice %1694 {offsets = [0, 0], sizes = [1, 128], strides = [1, 1]} : vector<1x256xf32> to vector<1x128xf32>
    %1698 = vector.extract_strided_slice %1690 {offsets = [0, 128], sizes = [1, 128], strides = [1, 1]} : vector<1x256xf32> to vector<1x128xf32>
    %1699 = arith.addf %1698, %1616 : vector<1x128xf32>
    %1700 = vector.extract_strided_slice %1694 {offsets = [0, 128], sizes = [1, 128], strides = [1, 1]} : vector<1x256xf32> to vector<1x128xf32>
    %c0_669 = arith.constant 0 : index
    %1701 = memref.load %arg8[%c0_669] : memref<3xf32, #tpu.memory_space<smem>>
    %c0_670 = arith.constant 0 : index
    %c0_671 = arith.constant 0 : index
    %1702 = memref.load %arg7[%c0_670, %c0_671] : memref<3x3xf32, #tpu.memory_space<smem>>
    %1703 = vector.broadcast %1702 : f32 to vector<1x128xf32>
    %1704 = arith.mulf %1703, %1566 : vector<1x128xf32>
    %1705 = vector.broadcast %1701 : f32 to vector<1x128xf32>
    %1706 = arith.addf %1705, %1704 : vector<1x128xf32>
    %c0_672 = arith.constant 0 : index
    %c1_673 = arith.constant 1 : index
    %1707 = memref.load %arg7[%c0_672, %c1_673] : memref<3x3xf32, #tpu.memory_space<smem>>
    %1708 = vector.broadcast %1707 : f32 to vector<1x128xf32>
    %1709 = arith.mulf %1708, %1697 : vector<1x128xf32>
    %1710 = arith.addf %1706, %1709 : vector<1x128xf32>
    %c0_674 = arith.constant 0 : index
    %c2_675 = arith.constant 2 : index
    %1711 = memref.load %arg7[%c0_674, %c2_675] : memref<3x3xf32, #tpu.memory_space<smem>>
    %1712 = vector.broadcast %1711 : f32 to vector<1x128xf32>
    %1713 = arith.mulf %1712, %1700 : vector<1x128xf32>
    %1714 = arith.addf %1710, %1713 : vector<1x128xf32>
    %c1_676 = arith.constant 1 : index
    %1715 = memref.load %arg8[%c1_676] : memref<3xf32, #tpu.memory_space<smem>>
    %c1_677 = arith.constant 1 : index
    %c0_678 = arith.constant 0 : index
    %1716 = memref.load %arg7[%c1_677, %c0_678] : memref<3x3xf32, #tpu.memory_space<smem>>
    %1717 = vector.broadcast %1716 : f32 to vector<1x128xf32>
    %1718 = arith.mulf %1717, %1566 : vector<1x128xf32>
    %1719 = vector.broadcast %1715 : f32 to vector<1x128xf32>
    %1720 = arith.addf %1719, %1718 : vector<1x128xf32>
    %c1_679 = arith.constant 1 : index
    %c1_680 = arith.constant 1 : index
    %1721 = memref.load %arg7[%c1_679, %c1_680] : memref<3x3xf32, #tpu.memory_space<smem>>
    %1722 = vector.broadcast %1721 : f32 to vector<1x128xf32>
    %1723 = arith.mulf %1722, %1697 : vector<1x128xf32>
    %1724 = arith.addf %1720, %1723 : vector<1x128xf32>
    %c1_681 = arith.constant 1 : index
    %c2_682 = arith.constant 2 : index
    %1725 = memref.load %arg7[%c1_681, %c2_682] : memref<3x3xf32, #tpu.memory_space<smem>>
    %1726 = vector.broadcast %1725 : f32 to vector<1x128xf32>
    %1727 = arith.mulf %1726, %1700 : vector<1x128xf32>
    %1728 = arith.addf %1724, %1727 : vector<1x128xf32>
    %c2_683 = arith.constant 2 : index
    %1729 = memref.load %arg8[%c2_683] : memref<3xf32, #tpu.memory_space<smem>>
    %c2_684 = arith.constant 2 : index
    %c0_685 = arith.constant 0 : index
    %1730 = memref.load %arg7[%c2_684, %c0_685] : memref<3x3xf32, #tpu.memory_space<smem>>
    %1731 = vector.broadcast %1730 : f32 to vector<1x128xf32>
    %1732 = arith.mulf %1731, %1566 : vector<1x128xf32>
    %1733 = vector.broadcast %1729 : f32 to vector<1x128xf32>
    %1734 = arith.addf %1733, %1732 : vector<1x128xf32>
    %c2_686 = arith.constant 2 : index
    %c1_687 = arith.constant 1 : index
    %1735 = memref.load %arg7[%c2_686, %c1_687] : memref<3x3xf32, #tpu.memory_space<smem>>
    %1736 = vector.broadcast %1735 : f32 to vector<1x128xf32>
    %1737 = arith.mulf %1736, %1697 : vector<1x128xf32>
    %1738 = arith.addf %1734, %1737 : vector<1x128xf32>
    %c2_688 = arith.constant 2 : index
    %c2_689 = arith.constant 2 : index
    %1739 = memref.load %arg7[%c2_688, %c2_689] : memref<3x3xf32, #tpu.memory_space<smem>>
    %1740 = vector.broadcast %1739 : f32 to vector<1x128xf32>
    %1741 = arith.mulf %1740, %1700 : vector<1x128xf32>
    %1742 = arith.addf %1738, %1741 : vector<1x128xf32>
    %1743 = arith.maximumf %1714, %1728 : vector<1x128xf32>
    %1744 = arith.maximumf %1743, %1742 : vector<1x128xf32>
    %1745 = arith.subf %1714, %1744 : vector<1x128xf32>
    %1746 = math.exp %1745 : vector<1x128xf32>
    %1747 = arith.subf %1728, %1744 : vector<1x128xf32>
    %1748 = math.exp %1747 : vector<1x128xf32>
    %1749 = arith.subf %1742, %1744 : vector<1x128xf32>
    %1750 = math.exp %1749 : vector<1x128xf32>
    %1751 = arith.addf %1746, %1748 : vector<1x128xf32>
    %1752 = arith.addf %1751, %1750 : vector<1x128xf32>
    %cst_690 = arith.constant 1.000000e+00 : f32
    %1753 = vector.broadcast %cst_690 : f32 to vector<1x128xf32>
    %1754 = arith.divf %1753, %1752 : vector<1x128xf32>
    %1755 = arith.mulf %1746, %1754 : vector<1x128xf32>
    %c0_691 = arith.constant 0 : index
    %c0_692 = arith.constant 0 : index
    %c7_693 = arith.constant 7 : index
    %c0_694 = arith.constant 0 : index
    %1756 = vector.load %arg10[%c0_691, %c0_692, %c7_693, %c0_694] : memref<1x3x8x128xf32, #tpu.memory_space<vmem>>, vector<1x1x1x128xf32>
    %1757 = vector.shape_cast %1756 : vector<1x1x1x128xf32> to vector<1x128xf32>
    %1758 = vector.shape_cast %1755 : vector<1x128xf32> to vector<1x1x1x128xf32>
    tpu.vector_store %arg10[%c0_691, %c0_692, %c7_693, %c0_694], %1758 {strides = array<i32>} : memref<1x3x8x128xf32, #tpu.memory_space<vmem>>, vector<1x1x1x128xf32>,
    %1759 = arith.mulf %1755, %1565 : vector<1x128xf32>
    %1760 = arith.mulf %1748, %1754 : vector<1x128xf32>
    %c0_695 = arith.constant 0 : index
    %c1_696 = arith.constant 1 : index
    %c7_697 = arith.constant 7 : index
    %c0_698 = arith.constant 0 : index
    %1761 = vector.load %arg10[%c0_695, %c1_696, %c7_697, %c0_698] : memref<1x3x8x128xf32, #tpu.memory_space<vmem>>, vector<1x1x1x128xf32>
    %1762 = vector.shape_cast %1761 : vector<1x1x1x128xf32> to vector<1x128xf32>
    %1763 = vector.shape_cast %1760 : vector<1x128xf32> to vector<1x1x1x128xf32>
    tpu.vector_store %arg10[%c0_695, %c1_696, %c7_697, %c0_698], %1763 {strides = array<i32>} : memref<1x3x8x128xf32, #tpu.memory_space<vmem>>, vector<1x1x1x128xf32>,
    %1764 = arith.mulf %1760, %1696 : vector<1x128xf32>
    %1765 = arith.addf %1759, %1764 : vector<1x128xf32>
    %1766 = arith.mulf %1750, %1754 : vector<1x128xf32>
    %c0_699 = arith.constant 0 : index
    %c2_700 = arith.constant 2 : index
    %c7_701 = arith.constant 7 : index
    %c0_702 = arith.constant 0 : index
    %1767 = vector.load %arg10[%c0_699, %c2_700, %c7_701, %c0_702] : memref<1x3x8x128xf32, #tpu.memory_space<vmem>>, vector<1x1x1x128xf32>
    %1768 = vector.shape_cast %1767 : vector<1x1x1x128xf32> to vector<1x128xf32>
    %1769 = vector.shape_cast %1766 : vector<1x128xf32> to vector<1x1x1x128xf32>
    tpu.vector_store %arg10[%c0_699, %c2_700, %c7_701, %c0_702], %1769 {strides = array<i32>} : memref<1x3x8x128xf32, #tpu.memory_space<vmem>>, vector<1x1x1x128xf32>,
    %1770 = arith.mulf %1766, %1699 : vector<1x128xf32>
    %1771 = arith.addf %1765, %1770 : vector<1x128xf32>
    %cst_703 = arith.constant 0.000000e+00 : f32
    %1772 = vector.broadcast %cst_703 : f32 to vector<1x128xf32>
    %1773 = arith.maximumf %1771, %1772 : vector<1x128xf32>
    %c0_704 = arith.constant 0 : index
    %c7_705 = arith.constant 7 : index
    %c0_706 = arith.constant 0 : index
    %1774 = vector.load %arg9[%c0_704, %c7_705, %c0_706] : memref<1x8x128xf32, #tpu.memory_space<vmem>>, vector<1x1x128xf32>
    %1775 = vector.shape_cast %1774 : vector<1x1x128xf32> to vector<1x128xf32>
    %1776 = vector.shape_cast %1773 : vector<1x128xf32> to vector<1x1x128xf32>
    tpu.vector_store %arg9[%c0_704, %c7_705, %c0_706], %1776 {strides = array<i32>} : memref<1x8x128xf32, #tpu.memory_space<vmem>>, vector<1x1x128xf32>,
    return
  }
  func.func @transform_0(%arg0: i32, %arg1: i32, %arg2: i32) -> (i32, i32, i32) {
    %c0_i32 = arith.constant 0 : i32
    return %arg0, %arg1, %arg2 : i32, i32, i32
  }
  func.func @transform_1(%arg0: i32, %arg1: i32, %arg2: i32) -> (i32, i32, i32) {
    %c0_i32 = arith.constant 0 : i32
    return %arg0, %arg1, %arg2 : i32, i32, i32
  }
  func.func @transform_2(%arg0: i32, %arg1: i32, %arg2: i32) -> (i32, i32, i32, i32) {
    %c0_i32 = arith.constant 0 : i32
    %c0_i32_0 = arith.constant 0 : i32
    %c0_i32_1 = arith.constant 0 : i32
    return %arg0, %arg1, %c0_i32, %c0_i32_0 : i32, i32, i32, i32
  }
  func.func @transform_3(%arg0: i32, %arg1: i32, %arg2: i32) -> (i32, i32) {
    %c0_i32 = arith.constant 0 : i32
    %c0_i32_0 = arith.constant 0 : i32
    %c0_i32_1 = arith.constant 0 : i32
    return %c0_i32, %c0_i32_0 : i32, i32
  }
  func.func @transform_4(%arg0: i32, %arg1: i32, %arg2: i32) -> (i32, i32) {
    %c0_i32 = arith.constant 0 : i32
    %c0_i32_0 = arith.constant 0 : i32
    %c0_i32_1 = arith.constant 0 : i32
    return %c0_i32, %c0_i32_0 : i32, i32
  }
  func.func @transform_5(%arg0: i32, %arg1: i32, %arg2: i32) -> i32 {
    %c0_i32 = arith.constant 0 : i32
    %c0_i32_0 = arith.constant 0 : i32
    return %c0_i32 : i32
  }
  func.func @transform_6(%arg0: i32, %arg1: i32, %arg2: i32) -> (i32, i32, i32) {
    %c0_i32 = arith.constant 0 : i32
    return %arg0, %arg1, %arg2 : i32, i32, i32
  }
  func.func @transform_7(%arg0: i32, %arg1: i32, %arg2: i32) -> (i32, i32, i32, i32) {
    %c0_i32 = arith.constant 0 : i32
    %c0_i32_0 = arith.constant 0 : i32
    return %arg0, %c0_i32, %arg1, %arg2 : i32, i32, i32, i32
  }
}

</mosaic_0001>

<bundles_post_ra>
// kernel: cpp_refine.1
= control target key start
LH: loop header
LB: loop body
LE: loop exit
PB: predicated region body
PF: predicated region fallthrough
CT: control target
= control target key end

     0   :  { %s5983_s0 = inlined_call_operand.vmem [shape: f32[2,8,256], index: 0, kind: input, shape index: {}]   ;;  %s5984_s1 = inlined_call_operand.vmem [shape: f32[2,8,256], index: 1, kind: input, shape index: {}]   ;;  %s5985_s2 = inlined_call_operand.vmem [shape: f32[2,8,32,16], index: 2, kind: input, shape index: {}]   ;;  %s5986_s3 = inlined_call_operand.vmem [shape: f32[2,8], index: 3, kind: input, shape index: {}]   ;;  %s5987_s4 = inlined_call_operand.vmem [shape: f32[3,3], index: 4, kind: input, shape index: {}]   ;;  %s5988_s5 = inlined_call_operand.vmem [shape: f32[3], index: 5, kind: input, shape index: {}]   ;;  %s5989_s6 = inlined_call_operand.vmem [shape: f32[2,8,256], index: 6, kind: output, shape index: {0}]   ;;  %s5990_s7 = inlined_call_operand.vmem [shape: f32[2,3,8,256], index: 7, kind: output, shape index: {1}]  }
   0x1   :  { %6020 = sst [smem:[#allocation25_spill]] %s5983_s0 }
   0x2   :  { %6021 = sst [smem:[#allocation26_spill]] %s5987_s4 }
   0x3   :  { %13 = vsyncpa [#allocation3], 0 }
   0x4   :  { %14 = vsyncpa [#allocation5], 0  ;;  %s4266_s24 = smov 0   ;;  %s4268_s25 = smov 0  }
   0x5   :  { %s4270_s26 = smov 0   ;;  %s4272_s27 = smov 0  }
   0x6   :  { %s4274_s28 = smov 0   ;;  %s4276_s29 = smov 0  }
   0x7   :  { %s4278_s30 = smov 0  }
   0x8 LB: > { %s3532_s8 = sadd.s32 4294967295, %s4218_s30   ;;  %s32_s9 = sadd.s32 1, %s4210_s28  ;;  %s4218_s30 = sphi %s4278_s30, %s20_s30   ;;  %s4214_s29 = sphi %s4276_s29, %s6128_s29   ;;  %s4210_s28 = sphi %s4274_s28, %s6127_s28   ;;  %s4206_s27 = sphi %s4272_s27, %s6126_s27   ;;  %s4202_s26 = sphi %s4270_s26, %s6125_s26   ;;  %s4198_s25 = sphi %s4268_s25, %s6124_s25   ;;  %s4194_s24 = sphi %s4266_s24, %s6123_s24  }
   0x9   : > { %p33_p0 = scmp.ge.s32.totalorder %s32_s9, 2  ;;  %s39_s10 = sadd.s32 1, %s4214_s29 }
   0xa   : > { %s231_s11 = sadd.s32 1, %s4198_s25  ;;  %p241_p1 = scmp.ne.s32.totalorder %s4198_s25, %s4194_s24 }
   0xb   : > { %s6130_s9 = smov (%p33_p0, %s32_s9), 0  ;;  %s6132_s10 = smov (!%p33_p0, %s39_s10), %s4214_s29 }
   0xc   : > { %s227_s12 = ssub.s32 %s4210_s28, %s6130_s9  ;;  %p242_p2 = scmp.eq.s32.totalorder %s3532_s8, 3 }
   0xd   : > { %p41_p3 = scmp.ge.s32.totalorder %s6132_s10, 2  ;;  %p3534_p4 = scmp.ge.s32.totalorder %s4218_s30, 1 }
   0xe   : > { %p4313_p5 = por %p242_p2, %p241_p1  ;;  %p255_p6 = scmp.lt.s32.totalorder %s4218_s30, 5 }
   0xf   : > { %s6134_s10 = smov (%p41_p3, %s6132_s10), 0  ;;  %p4326_p8 = scmp.eq.s32.totalorder %s3532_s8, 0 }
  0x10   : > { %s6022_s13 = scalar_select %p4313_p5, 1, 0 }
  0x11   : > { %p4320_p7 = pnand %p3534_p4, %p255_p6  ;;  %s224_s15 = ssub.s32 %s4214_s29, %s6134_s10 }
  0x12   : > { %s6024_s16 = scalar_select %p4326_p8, 1, 0 }
  0x13   : > { %s6023_s14 = scalar_select %p4320_p7, 1, 0 }
  0x14   : > { %s228_s17 = sor.u32 %s227_s12, %s224_s15  ;;  %p3968_p9 = pneg %p4320_p7 }
  0x15   : > { %p229_p10 = scmp.eq.s32.totalorder %s228_s17, 0  ;;  %s6025_s4 = sld [smem:[#allocation26_spill]] }
  0x16   : > { %p4337_p11 = pnand %p4326_p8, %p3968_p9 }
  0x17   : > { %s4342_s22 = scalar_select %p229_p10, %s4198_s25, %s231_s11  }
  0x18   : > { %p4113_p13 = pneg %p4337_p11 }
  0x1b   : > { %s279_s20 = sshll.u32 %s6025_s4, 4  ;;  %s280_s20 = int_to_ptr.vmem [resolvable:$true] %s279_s20 }
  0x1c   : > { %s4111_s23 = scalar_lea.vmem %s280_s20, 64  ;;  %p4119_p2 = scmp.lt.s32.totalorder %s280_s20, %s280_s20 }
  0x1d   : > { %p4112_p12 = scmp.ne.s32.totalorder %s280_s20, %s4111_s23  ;;  %p4120_p3 = scmp.lt.s32.totalorder %s4111_s23, %s4111_s23 }
  0x1f   : > { %p4114_p0 = pnand %p4113_p13, %p4112_p12  ;;  %p4121_p4 = por %p4120_p3, %p4119_p2 }
  0x21   : > { %p4115_p1 = pneg %p4114_p0 }
  0x23   : > { %p4122_p6 = pnand %p4121_p4, %p4115_p1 }
  0x25   : > { %4125 = shalt.err (!%p4122_p6)
}
  0x26   : > { %s4220_s8 = smov [#allocation4]   ;;  %s268_s15 = sshll.u32 %s5986_s3, 4  ;;  %s269_s15 = int_to_ptr.vmem [resolvable:$true] %s268_s15 }
  0x27   : > { %3974 = dma.vmem_to_smem (!%p4337_p11), %s280_s20, 64, %s4220_s8, [#allocation5]  }
  0x28   : > { %s290_s19 = sshll.u32 %s5988_s5, 4  ;;  %s4126_s4 = scalar_lea.vmem %s269_s15, 32  ;;  %s291_s19 = int_to_ptr.vmem [resolvable:$true] %s290_s19 }
  0x29   : > { %p4127_p9 = scmp.ne.s32.totalorder %s269_s15, %s4126_s4  ;;  %p4134_p0 = scmp.lt.s32.totalorder %s269_s15, %s269_s15 }
  0x2a   : > { %p4135_p1 = scmp.lt.s32.totalorder %s4126_s4, %s4126_s4 }
  0x2b   : > { %p4129_p10 = pnand %p4127_p9, %p4113_p13 }
  0x2c   : > { %p4136_p2 = por %p4135_p1, %p4134_p0 }
  0x2d   : > { %p4130_p12 = pneg %p4129_p10 }
  0x2f   : > { %p4137_p3 = pnand %p4136_p2, %p4130_p12 }
  0x31   : > { %4140 = shalt.err (!%p4137_p3)
}
  0x32   : > { %s4221_s20 = smov [#allocation2]   ;;  %s4141_s23 = scalar_lea.vmem %s291_s19, 16 }
  0x33   : > { %3971 = dma.vmem_to_smem (!%p4337_p11), %s269_s15, 32, %s4221_s20, [#allocation3]  }
  0x34   : > { %p4142_p4 = scmp.ne.s32.totalorder %s291_s19, %s4141_s23  ;;  %p4149_p8 = scmp.lt.s32.totalorder %s291_s19, %s291_s19 }
  0x35   : > { %p4150_p9 = scmp.lt.s32.totalorder %s4141_s23, %s4141_s23 }
  0x36   : > { %p4144_p6 = pnand %p4142_p4, %p4113_p13 }
  0x37   : > { %p4151_p10 = por %p4150_p9, %p4149_p8 }
  0x38   : > { %p4145_p5 = pneg %p4144_p6 }
  0x3a   : > { %p4152_p7 = pnand %p4151_p10, %p4145_p5 }
  0x3c   : > { %4155 = shalt.err (!%p4152_p7)
}
  0x3d   : > { %s4222_s4 = smov [#allocation6]   ;;  %p6027_p12 = scmp.ne.s32.totalorder %s6023_s14, 0 }
  0x3e   : > { %3977 = dma.vmem_to_smem (!%p4337_p11), %s291_s19, 16, %s4222_s4, [#allocation5]  }
  0x3f   : > { %347 = sbr.rel (%p6027_p12) target bundleno = 548 (0x224), region = 44 }
  0x44   : > { %p6028_p0 = scmp.ne.s32.totalorder %s6024_s16, 0 }
  0x46   : > { %4185 = dma.done.wait (%p6028_p0), [#allocation3], 32  }
  0x47   : > { %4187 = vsyncadd (%p6028_p0), [#allocation3], 4294967264 }
  0x48   : > { %4189 = dma.done.wait (%p6028_p0), [#allocation5], 80  }
  0x49   : > { %4191 = vsyncadd (%p6028_p0), [#allocation5], 4294967216 }
  0x4a   : > { %361 = sfence }
  0x4b   : > { %p428_p5 = scmp.lt.s32.totalorder %s4206_s27, 1  ;;  %p432_p7 = scmp.lt.s32.totalorder %s4202_s26, 1  ;;  %v475_v0 = vlaneseq  ;;  %v6000_v1 = vmov 0.0  }
  0x4c   : > { %s3551_s14 = sshll.u32 %s4202_s26, 7  ;;  %s4380_s21 = sld [smem:[#allocation2]]  ;;  %715 = vmatprep.mubr.f32.mxu0 %v6000_v1  ;;  %1061 = vmatprep.mubr.f32.mxu1 %v6000_v1 }
  0x4d   : > { %s4385_s8 = scalar_select %p428_p5, %s4206_s27, 1  ;;  %v476_v2 = vand.u32 127, %v475_v0  ;;  %v478_v3 = vstv %s3551_s14  ;;  %v4406_v8 = vshrl.u32 %v475_v0, 7 }
  0x4e   : > { %s433_s16 = scalar_select %p432_p7, %s4202_s26, 1 }
  0x4f   : > { %s3543_s11 = sshll.u32 %s4385_s8, 1  ;;  %v479_v4 = vadd.s32 %v478_v3, %v476_v2  ;;  %s4389_s12 = sld [smem:[#allocation2 + $0x80]]  ;;  %6030 = vst [vmem:[#allocation10_spill] sm:$0xff] %v4406_v8  ;;  %v4411_v11 = vadd.s32 8, %v4406_v8  ;;  %v4421_v18 = vsub.s32 0, %v4406_v8  ;;  %v4424_v19 = vsub.s32 1, %v4406_v8 }
  0x50   : > { %s437_s15 = sadd.s32 %s3543_s11, %s433_s16  ;;  %s4391_s17 = sld [smem:[#allocation2 + $0x1]]  ;;  %v4430_v23 = vsub.s32 2, %v4406_v8  ;;  %v4433_v24 = vsub.s32 3, %v4406_v8  ;;  %v4439_v28 = vsub.s32 4, %v4406_v8 }
  0x51   : > { %s4393_s18 = sshll.u32 %s437_s15, 3  ;;  %v480_v5 = vcvt.s32.f32 %v479_v4  ;;  %s4395_s19 = sld [smem:[#allocation2 + $0x81]]  ;;  %6031 = vst [vmem:[#allocation11_spill] sm:$0xff] %v4411_v11 }
  0x52   : > { %s6029_s0 = sld [smem:[#allocation25_spill]]  ;;  %v512_v14 = vstv %s4380_s21  ;;  %p6122_p8 = scmp.ne.s32.totalorder %s6022_s13, 0 }
  0x53   : > { %v481_v6 = vmul.f32 0.0625, %v480_v5  ;;  %s4404_s14 = sld [smem:[#allocation2 + $0x2]] }
  0x54   : > { %s4408_s16 = sld [smem:[#allocation2 + $0x82]] }
  0x55   : > { %v482_v10 = vfloor.f32 %v481_v6  ;;  %v519_v15 = vstv %s4389_s12  ;;  %s4418_s11 = sld [smem:[#allocation2 + $0x3]]  ;;  %s3889_s12 = sshll.u32 %s4385_s8, 8 }
  0x56   : > { %v860_v16 = vstv %s4391_s17  ;;  %s4443_s21 = sld [smem:[#allocation2 + $0x83]]  ;;  %s4610_s17 = scalar_lea.vmem %s5985_s2, %s3889_s12 }
  0x57   : > { %v483_v13 = vmul.f32 16.0, %v482_v10  ;;  %v486_v17 = vadd.f32 1.0, %v482_v10  ;;  %v866_v22 = vstv %s4395_s19  ;;  %s4647_s19 = sld [smem:[#allocation2 + $0x4]] }
  0x58   : > { %s4401_s4 = scalar_lea.vmem %s6029_s0, %s4393_s18  ;;  %s4660_s20 = sld [smem:[#allocation2 + $0x84]] }
  0x59   : > { %v495_v7 = vld [vmem:[%s4401_s4] sm:$0xff]  ;;  %v484_v21 = vsub.f32 %v480_v5, %v483_v13  ;;  %v1204_v30 = vstv %s4404_s14  ;;  %s4699_s23 = sld [smem:[#allocation2 + $0x5]] }
  0x5a   : > { %v3555_v9 = vadd.f32 -1.0, %v495_v7  ;;  %v1210_v31 = vstv %s4408_s16  ;;  %s4710_s14 = sld [smem:[#allocation2 + $0x85]] }
  0x5b   : > { %vm485_vm0 = vcmp.ge.f32.partialorder %v484_v21, 16.0  ;;  %v3552_v29 = vadd.f32 -16.0, %v484_v21  ;;  %v1548_v46 = vstv %s4418_s11  ;;  %s4842_s16 = sld [smem:[#allocation2 + $0x6]] }
  0x5c   : > { %v4413_v12 = vmul.f32 0.5, %v3555_v9  ;;  %v4426_v20 = vmul.f32 0.2, %v3555_v9  ;;  %v487_v32 = vsel %vm485_vm0, %v486_v17, %v482_v10  ;;  %v1554_v62 = vstv %s4443_s21  ;;  %s4855_s11 = sld [smem:[#allocation2 + $0x86]] }
  0x5d   : > { %v489_v36 = vsel %vm485_vm0, %v3552_v29, %v484_v21  ;;  %v3553_v37 = vadd.f32 -1.0, %v487_v32  ;;  %s4882_s21 = sld [smem:[#allocation2 + $0x7]] }
  0x5e   : > { %6032 = vst [vmem:[#allocation12_spill] sm:$0xff] %v4413_v12  ;;  %6033 = vst [vmem:[#allocation13_spill] sm:$0xff] %v4426_v20  ;;  %v540_v25 = vmul.f32 %v4413_v12, %v512_v14  ;;  %v545_v26 = vmul.f32 %v4413_v12, %v519_v15  ;;  %v886_v27 = vmul.f32 %v860_v16, %v4413_v12  ;;  %vm490_vm1 = vcmp.lt.f32.partialorder %v489_v36, 0.0  ;;  %s4894_s12 = sld [smem:[#allocation2 + $0x87]] }
  0x5f   : > { %v891_v33 = vmul.f32 %v866_v22, %v4413_v12  ;;  %v513_v34 = vmul.f32 %v512_v14, %v4426_v20  ;;  %v520_v35 = vmul.f32 %v519_v15, %v4426_v20  ;;  %v861_v38 = vmul.f32 %v860_v16, %v4426_v20  ;;  %s5140_s8 = sld [smem:[#allocation4]] }
  0x60   : > { %v867_v39 = vmul.f32 %v866_v22, %v4426_v20  ;;  %v493_v40 = vadd.f32 16.0, %v489_v36  ;;  %v4451_v41 = vmul.f32 %v1204_v30, %v4426_v20  ;;  %v4454_v42 = vmul.f32 %v1210_v31, %v4426_v20  ;;  %s5142_s15 = sld [smem:[#allocation4 + $0x80]] }
  0x61   : > { %v4456_v43 = vsel %vm490_vm1, %v3553_v37, %v487_v32  ;;  %v4459_v44 = vmul.f32 %v1204_v30, %v4413_v12  ;;  %v4462_v45 = vmul.f32 %v1210_v31, %v4413_v12  ;;  %s5175_s0 = sld [smem:[#allocation4 + $0x101]] }
  0x62   : > { %v4465_v47 = vsel %vm490_vm1, %v493_v40, %v489_v36  ;;  %v546_v48 = vadd.f32 %v545_v26, %v4456_v43  ;;  %v892_v49 = vadd.f32 %v891_v33, %v4456_v43  ;;  %v521_v50 = vadd.f32 %v520_v35, %v4456_v43 }
  0x63   : > { %v541_v51 = vadd.f32 %v540_v25, %v4465_v47  ;;  %v887_v52 = vadd.f32 %v886_v27, %v4465_v47  ;;  %v514_v53 = vadd.f32 %v513_v34, %v4465_v47  ;;  %v862_v54 = vadd.f32 %v861_v38, %v4465_v47 }
  0x64   : > { %v547_v55 = vmul.f32 0.06666667, %v546_v48  ;;  %v893_v56 = vmul.f32 0.06666667, %v892_v49  ;;  %v522_v57 = vmul.f32 0.06666667, %v521_v50  ;;  %v868_v58 = vadd.f32 %v867_v39, %v4456_v43 }
  0x65   : > { %v542_v59 = vmul.f32 0.06666667, %v541_v51  ;;  %v888_v60 = vmul.f32 0.06666667, %v887_v52  ;;  %v516_v61 = vmul.f32 0.06666667, %v514_v53 }
  0x66   : > { %v548_v63 = vmul.f32 2.0, %v547_v55  ;;  %v894_v0 = vmul.f32 2.0, %v893_v56  ;;  %v523_v2 = vmul.f32 2.0, %v522_v57  ;;  %v863_v3 = vmul.f32 0.06666667, %v862_v54 }
  0x67   : > { %v543_v4 = vmul.f32 2.0, %v542_v59  ;;  %v889_v5 = vmul.f32 2.0, %v888_v60  ;;  %v517_v6 = vmul.f32 2.0, %v516_v61  ;;  %v869_v7 = vmul.f32 0.06666667, %v868_v58 }
  0x68   : > { %v3561_v9 = vadd.f32 -1.0, %v548_v63  ;;  %v3599_v10 = vadd.f32 -1.0, %v894_v0  ;;  %v3557_v13 = vadd.f32 -1.0, %v523_v2  ;;  %v864_v14 = vmul.f32 2.0, %v863_v3 }
  0x69   : > { %v3560_v15 = vadd.f32 -1.0, %v543_v4  ;;  %v3598_v16 = vadd.f32 -1.0, %v889_v5  ;;  %v3556_v17 = vadd.f32 -1.0, %v517_v6  ;;  %v870_v21 = vmul.f32 2.0, %v869_v7 }
  0x6a   : > { %v554_v22 = vadd.f32 1.0, %v3561_v9  ;;  %v900_v25 = vadd.f32 1.0, %v3599_v10  ;;  %v529_v26 = vadd.f32 1.0, %v3557_v13  ;;  %v3594_v27 = vadd.f32 -1.0, %v864_v14 }
  0x6b   : > { %v550_v29 = vadd.f32 1.0, %v3560_v15  ;;  %v896_v30 = vadd.f32 1.0, %v3598_v16  ;;  %v525_v31 = vadd.f32 1.0, %v3556_v17  ;;  %v3595_v32 = vadd.f32 -1.0, %v870_v21 }
  0x6c   : > { %v555_v33 = vmul.f32 16.0, %v554_v22  ;;  %v901_v34 = vmul.f32 16.0, %v900_v25  ;;  %v530_v35 = vmul.f32 16.0, %v529_v26  ;;  %v872_v36 = vadd.f32 1.0, %v3594_v27 }
  0x6d   : > { %v551_v37 = vmul.f32 16.0, %v550_v29  ;;  %v897_v38 = vmul.f32 16.0, %v896_v30  ;;  %v526_v39 = vmul.f32 16.0, %v525_v31  ;;  %v876_v40 = vadd.f32 1.0, %v3595_v32 }
  0x6e   : > { %v3563_v48 = vadd.f32 -1.0, %v555_v33  ;;  %v3601_v49 = vadd.f32 -1.0, %v901_v34  ;;  %v3559_v50 = vadd.f32 -1.0, %v530_v35  ;;  %v873_v51 = vmul.f32 16.0, %v872_v36 }
  0x6f   : > { %v3562_v52 = vadd.f32 -1.0, %v551_v37  ;;  %v3600_v53 = vadd.f32 -1.0, %v897_v38  ;;  %v3558_v54 = vadd.f32 -1.0, %v526_v39  ;;  %v877_v55 = vmul.f32 16.0, %v876_v40 }
  0x70   : > { %v557_v56 = vmul.f32 0.5, %v3563_v48  ;;  %v903_v57 = vmul.f32 0.5, %v3601_v49  ;;  %v532_v58 = vmul.f32 0.5, %v3559_v50  ;;  %v3596_v59 = vadd.f32 -1.0, %v873_v51 }
  0x71   : > { %v553_v60 = vmul.f32 0.5, %v3562_v52  ;;  %v899_v61 = vmul.f32 0.5, %v3600_v53  ;;  %v528_v63 = vmul.f32 0.5, %v3558_v54  ;;  %v3597_v0 = vadd.f32 -1.0, %v877_v55 }
  0x72   : > { %v561_v2 = vadd.f32 0.5, %v557_v56  ;;  %v907_v3 = vadd.f32 0.5, %v903_v57  ;;  %v536_v4 = vadd.f32 0.5, %v532_v58  ;;  %v875_v5 = vmul.f32 0.5, %v3596_v59 }
  0x73   : > { %v558_v6 = vadd.f32 0.5, %v553_v60  ;;  %v904_v7 = vadd.f32 0.5, %v899_v61  ;;  %v533_v9 = vadd.f32 0.5, %v528_v63  ;;  %v879_v10 = vmul.f32 0.5, %v3597_v0 }
  0x74   : > { %v562_v13 = vfloor.f32 %v561_v2  ;;  %v908_v14 = vfloor.f32 %v907_v3  ;;  %v537_v15 = vfloor.f32 %v536_v4  ;;  %v880_v16 = vadd.f32 0.5, %v875_v5 }
  0x75   : > { %v559_v17 = vfloor.f32 %v558_v6  ;;  %v905_v21 = vfloor.f32 %v904_v7  ;;  %v534_v22 = vfloor.f32 %v533_v9  ;;  %v883_v25 = vadd.f32 0.5, %v879_v10 }
  0x76   : > { %v3897_v26 = vtrunc.f32 %v562_v13  ;;  %v3905_v27 = vtrunc.f32 %v908_v14  ;;  %v881_v29 = vfloor.f32 %v880_v16  ;;  %v4479_v30 = vmul.f32 %v1548_v46, %v4426_v20 }
  0x77   : > { %v3895_v31 = vtrunc.f32 %v559_v17  ;;  %v3903_v32 = vtrunc.f32 %v905_v21  ;;  %v3891_v33 = vtrunc.f32 %v534_v22  ;;  %v884_v34 = vfloor.f32 %v883_v25 }
  0x78   : > { %v4481_v35 = vcvt.f32.s32 %v3897_v26  ;;  %v3893_v36 = vtrunc.f32 %v537_v15  ;;  %v4486_v37 = vmul.f32 %v1554_v62, %v4426_v20  ;;  %v1574_v38 = vmul.f32 %v1548_v46, %v4413_v12 }
  0x79   : > { %v3896_v39 = vcvt.f32.s32 %v3895_v31  ;;  %v3904_v40 = vcvt.f32.s32 %v3903_v32  ;;  %v4491_v48 = vcvt.f32.s32 %v3905_v27  ;;  %v3892_v49 = vcvt.f32.s32 %v3891_v33 }
  0x7a   : > { %vm571_vm2 = vcmp.ge.s32.totalorder %v4481_v35, 0  ;;  %v3899_v50 = vtrunc.f32 %v881_v29  ;;  %v3901_v51 = vtrunc.f32 %v884_v34  ;;  %v1231_v52 = vadd.f32 %v4459_v44, %v4465_v47 }
  0x7b   : > { %vm565_vm3 = vcmp.ge.s32.totalorder %v3896_v39, 0  ;;  %vm567_vm4 = vcmp.lt.s32.totalorder %v3896_v39, 16  ;;  %vm575_vm5 = vcmp.lt.s32.totalorder %v4481_v35, 16  ;;  %v4498_v53 = vrot.slane %v3896_v39, %v4421_v18 }
  0x7c   : > { %vm569_vm6 = vmand %vm565_vm3, %vm567_vm4  ;;  %vm911_vm7 = vcmp.ge.s32.totalorder %v3904_v40, 0  ;;  %vm913_vm8 = vcmp.lt.s32.totalorder %v3904_v40, 16  ;;  %v4501_v46 = vrot.slane %v3904_v40, %v4424_v19  ;;  %v4503_v54 = vcvt.f32.s32 %v3893_v36 }
  0x7d   : > { %vm573_vm9 = vmand %vm569_vm6, %vm571_vm2  ;;  %vm917_vm10 = vcmp.ge.s32.totalorder %v4491_v48, 0  ;;  %vm921_vm11 = vcmp.lt.s32.totalorder %v4491_v48, 16  ;;  %vm564_vm12 = vcmp.ge.s32.totalorder %v3892_v49, 0  ;;  %v1579_v44 = vmul.f32 %v1554_v62, %v4413_v12 }
  0x7e   : > { %vm577_vm13 = vmand %vm573_vm9, %vm575_vm5  ;;  %vm589_vm14 = vcmp.eq.s32.totalorder %v4411_v11, %v4498_v53  ;;  %vm566_vm15 = vcmp.lt.s32.totalorder %v3892_v49, 16  ;;  %v4513_v55 = vrot.slane %v3892_v49, %v4421_v18  ;;  %v3900_v56 = vcvt.f32.s32 %v3899_v50 }
  0x7f   : > { %v4224_v57 = vmov 0   ;;  %vm915_vm0 = vmand %vm911_vm7, %vm913_vm8  ;;  %v4518_v59 = vcvt.f32.s32 %v3901_v51  ;;  %v1232_v60 = vmul.f32 0.06666667, %v1231_v52  ;;  %v1236_v62 = vadd.f32 %v4462_v45, %v4456_v43 }
  0x80   : > { %v591_v58 = vsel %vm577_vm13, 1, %v4224_v57  ;;  %vm919_vm1 = vmand %vm915_vm0, %vm917_vm10  ;;  %vm935_vm2 = vcmp.eq.s32.totalorder %v4411_v11, %v4501_v46  ;;  %vm570_vm3 = vcmp.ge.s32.totalorder %v4503_v54, 0  ;;  %vm574_vm4 = vcmp.lt.s32.totalorder %v4503_v54, 16 }
  0x81   : > { %v599_v61 = vrot.slane %v591_v58, %v4421_v18  ;;  %vm587_vm5 = vcmp.eq.s32.totalorder %v4406_v8, %v4498_v53  ;;  %vm923_vm6 = vmand %vm919_vm1, %vm921_vm11  ;;  %vm910_vm7 = vcmp.ge.s32.totalorder %v3900_v56, 0  ;;  %vm912_vm8 = vcmp.lt.s32.totalorder %v3900_v56, 16  ;;  %v634_v53 = vld [vmem:[%s4610_s17] sm:$0xff] }
  0x82   : > { %vm916_vm9 = vcmp.ge.s32.totalorder %v4518_v59, 0  ;;  %v4535_v45 = vrot.slane %v3900_v56, %v4424_v19  ;;  %v937_v0 = vsel %vm923_vm6, 1, %v4224_v57  ;;  %vm4544_vm13 = vmand %vm564_vm12, %vm566_vm15  ;;  %vm588_vm11 = vcmp.eq.s32.totalorder %v4411_v11, %v4513_v55 }
  0x83   : > { %vm4537_vm10 = vcmp.eq.s32.totalorder %v599_v61, 1  ;;  %v1233_v3 = vmul.f32 2.0, %v1232_v60  ;;  %v1237_v4 = vmul.f32 0.06666667, %v1236_v62  ;;  %v945_v5 = vrot.slane %v937_v0, %v4424_v19  ;;  %v636_v62 = vld [vmem:[%s4610_s17 + $0x10] sm:$0xff] }
  0x84   : > { %vm920_vm0 = vcmp.lt.s32.totalorder %v4518_v59, 16  ;;  %v1575_v6 = vadd.f32 %v1574_v38, %v4465_v47  ;;  %vm605_vm12 = vmand %vm589_vm14, %vm4537_vm10  ;;  %v1580_v10 = vadd.f32 %v1579_v44, %v4456_v43  ;;  %v1206_v13 = vadd.f32 %v4451_v41, %v4465_v47 }
  0x85   : > { %v3640_v7 = vadd.f32 -1.0, %v1233_v3  ;;  %v1238_v9 = vmul.f32 2.0, %v1237_v4  ;;  %v4225_v14 = vmov 1.0   ;;  %vm4566_vm6 = vcmp.eq.s32.totalorder %v945_v5, 1  ;;  %vm4574_vm14 = vmand %vm4544_vm13, %vm570_vm3 }
  0x86   : > { %3572 = vmatprep.subr.msk.mxu0 %vm605_vm12, %v4225_v14  ;;  %vm934_vm15 = vcmp.eq.s32.totalorder %v4411_v11, %v4535_v45  ;;  %v1576_v17 = vmul.f32 0.06666667, %v1575_v6  ;;  %v1212_v41 = vadd.f32 %v4454_v42, %v4456_v43  ;;  %v1550_v21 = vadd.f32 %v4479_v30, %v4465_v47  ;;  %vm951_vm3 = vmand %vm935_vm2, %vm4566_vm6 }
  0x87   : > { %vm932_vm12 = vcmp.eq.s32.totalorder %v4406_v8, %v4535_v45  ;;  %vm638_vm1 = vcmask 130048   ;;  %v3641_v22 = vadd.f32 -1.0, %v1238_v9  ;;  %v1240_v25 = vadd.f32 1.0, %v3640_v7  ;;  %3614 = vmatprep.subr.msk.mxu1 %vm951_vm3, %v4225_v14  ;;  %vm576_vm13 = vmand %vm4574_vm14, %vm574_vm4 }
  0x88   : > { %v1581_v26 = vmul.f32 0.06666667, %v1580_v10  ;;  %v1207_v27 = vmul.f32 0.06666667, %v1206_v13  ;;  %v1577_v29 = vmul.f32 2.0, %v1576_v17  ;;  %v1556_v30 = vadd.f32 %v4486_v37, %v4456_v43  ;;  %vm914_vm2 = vmand %vm910_vm7, %vm912_vm8 }
  0x89   : > { %v1213_v31 = vmul.f32 0.06666667, %v1212_v41  ;;  %v1551_v42 = vmul.f32 0.06666667, %v1550_v21  ;;  %v1241_v32 = vmul.f32 16.0, %v1240_v25  ;;  %v1244_v33 = vadd.f32 1.0, %v3641_v22  ;;  %vm918_vm3 = vmand %vm914_vm2, %vm916_vm9 }
  0x8a   : > { %v1582_v34 = vmul.f32 2.0, %v1581_v26  ;;  %v1208_v36 = vmul.f32 2.0, %v1207_v27  ;;  %v590_v38 = vsel %vm576_vm13, 1, %v4224_v57  ;;  %v3682_v39 = vadd.f32 -1.0, %v1577_v29  ;;  %vm922_vm4 = vmand %vm918_vm3, %vm920_vm0  ;;  %v3610_v22 = vld [vmem:[%s4610_s17 + $0x20] sm:$0xff] }
  0x8b   : > { %v1214_v40 = vmul.f32 2.0, %v1213_v31  ;;  %v1552_v37 = vmul.f32 2.0, %v1551_v42  ;;  %v595_v49 = vrot.slane %v590_v38, %v4421_v18  ;;  %v3642_v50 = vadd.f32 -1.0, %v1241_v32  ;;  %vm4617_vm7 = vmand %vm587_vm5, %vm4537_vm10 }
  0x8c   : > { %v1245_v51 = vmul.f32 16.0, %v1244_v33  ;;  %v3683_v52 = vadd.f32 -1.0, %v1582_v34  ;;  %v1584_v44 = vadd.f32 1.0, %v3682_v39  ;;  %v3636_v56 = vadd.f32 -1.0, %v1208_v36  ;;  %v635_v33 = vld [vmem:[%s4610_s17 + $0x8] sm:$0xff] }
  0x8d   : > { %v3637_v58 = vadd.f32 -1.0, %v1214_v40  ;;  %v3678_v60 = vadd.f32 -1.0, %v1552_v37  ;;  %vm600_vm8 = vcmp.eq.s32.totalorder %v595_v49, 1  ;;  %v936_v61 = vsel %vm922_vm4, 1, %v4224_v57 }
  0x8e   : > { %v1243_v0 = vmul.f32 0.5, %v3642_v50  ;;  %v3643_v2 = vadd.f32 -1.0, %v1245_v51  ;;  %vm604_vm9 = vmand %vm588_vm11, %vm600_vm8  ;;  %v941_v3 = vrot.slane %v936_v61, %v4424_v19  ;;  %v1585_v4 = vmul.f32 16.0, %v1584_v44 }
  0x8f   : > { %v1588_v63 = vadd.f32 1.0, %v3683_v52  ;;  %v1216_v5 = vadd.f32 1.0, %v3636_v56  ;;  %3573 = vmatpush1.msk.msra.mxu0 %vm604_vm9, %v4225_v14  ;;  %vm6044_vm5 = vcmp.eq.s32.totalorder %v4406_v8, %v4513_v55  ;;  %v1220_v9 = vadd.f32 1.0, %v3637_v58  ;;  %v3611_v56 = vld [vmem:[%s4610_s17 + $0x28] sm:$0xff] }
  0x90   : > { %vm602_vm10 = vmand %vm6044_vm5, %vm600_vm8  ;;  %v1247_v6 = vmul.f32 0.5, %v3643_v2  ;;  %v1248_v7 = vadd.f32 0.5, %v1243_v0  ;;  %v1557_v10 = vmul.f32 0.06666667, %v1556_v30  ;;  %vm6045_vm11 = vcmp.eq.s32.totalorder %v4406_v8, %v4501_v46  ;;  %3574 = vmatprep.subr.msk.mxu0 %vm4617_vm7, %v4225_v14 }
  0x91   : > { %vm4636_vm0 = vmand %vm6045_vm11, %vm4566_vm6  ;;  %vm946_vm14 = vcmp.eq.s32.totalorder %v941_v3, 1  ;;  %v3684_v55 = vadd.f32 -1.0, %v1585_v4  ;;  %v1589_v16 = vmul.f32 16.0, %v1588_v63  ;;  %v1217_v17 = vmul.f32 16.0, %v1216_v5  ;;  %3575 = vmatpush1.msk.msra.mxu0 %vm602_vm10, %v4225_v14 }
  0x92   : > { %vm950_vm13 = vmand %vm934_vm15, %vm946_vm14  ;;  %v1249_v46 = vfloor.f32 %v1248_v7  ;;  %v1251_v15 = vadd.f32 0.5, %v1247_v6  ;;  %v1221_v41 = vmul.f32 16.0, %v1220_v9  ;;  %v1558_v21 = vmul.f32 2.0, %v1557_v10  ;;  %3576 = vmatmul.mubr.msk.f32.vlgmr.msra.gmra.mxu0 %vm638_vm1, %v634_v53  ;;  %v3612_v9 = vld [vmem:[%s4610_s17 + $0x30] sm:$0xff] }
  0x93   : > { %3615 = vmatpush1.msk.msra.mxu1 %vm950_vm13, %v4225_v14  ;;  %vm948_vm6 = vmand %vm932_vm12, %vm946_vm14  ;;  %v1587_v25 = vmul.f32 0.5, %v3684_v55  ;;  %v3685_v26 = vadd.f32 -1.0, %v1589_v16  ;;  %v3638_v27 = vadd.f32 -1.0, %v1217_v17  ;;  %v1560_v29 = vadd.f32 1.0, %v3678_v60  ;;  %721 = vmatprep.mubr.f32.mxu0 %v6000_v1  ;;  %v637_v55 = vld [vmem:[%s4610_s17 + $0x18] sm:$0xff] }
  0x94   : > { %3616 = vmatprep.subr.msk.mxu1 %vm4636_vm0, %v4225_v14  ;;  %v3911_v31 = vtrunc.f32 %v1249_v46  ;;  %v1252_v42 = vfloor.f32 %v1251_v15  ;;  %v3639_v30 = vadd.f32 -1.0, %v1221_v41  ;;  %v3679_v32 = vadd.f32 -1.0, %v1558_v21 }
  0x95   : > { %3617 = vmatpush1.msk.msra.mxu1 %vm948_vm6, %v4225_v14  ;;  %v1591_v45 = vmul.f32 0.5, %v3685_v26  ;;  %v1592_v34 = vadd.f32 0.5, %v1587_v25  ;;  %v1219_v36 = vmul.f32 0.5, %v3638_v27  ;;  %v1561_v38 = vmul.f32 16.0, %v1560_v29  ;;  %v3613_v27 = vld [vmem:[%s4610_s17 + $0x38] sm:$0xff] }
  0x96   : > { %3618 = vmatmul.mubr.msk.f32.vlgmr.msra.gmra.mxu1 %vm638_vm1, %v3610_v22  ;;  %v3912_v39 = vcvt.f32.s32 %v3911_v31  ;;  %v3913_v40 = vtrunc.f32 %v1252_v42  ;;  %v1223_v37 = vmul.f32 0.5, %v3639_v30  ;;  %v1564_v49 = vadd.f32 1.0, %v3679_v32  ;;  %3577 = vmatmul.mubr.msk.f32.gmra.mxu0 %vm638_vm1, %v635_v33 }
  0x97   : > { %v1593_v50 = vfloor.f32 %v1592_v34  ;;  %v1595_v51 = vadd.f32 0.5, %v1591_v45  ;;  %v1224_v52 = vadd.f32 0.5, %v1219_v36  ;;  %v3680_v44 = vadd.f32 -1.0, %v1561_v38  ;;  %1067 = vmatprep.mubr.f32.mxu1 %v6000_v1  ;;  %727 = vmatprep.mubr.f32.mxu0 %v6000_v1 }
  0x98   : > { %v4667_v58 = vcvt.f32.s32 %v3913_v40  ;;  %vm1255_vm15 = vcmp.ge.s32.totalorder %v3912_v39, 0  ;;  %vm1257_vm12 = vcmp.lt.s32.totalorder %v3912_v39, 16  ;;  %v4670_v60 = vrot.slane %v3912_v39, %v4430_v23 }
  0x99   : > { %vm1259_vm2 = vmand %vm1255_vm15, %vm1257_vm12  ;;  %v3919_v61 = vtrunc.f32 %v1593_v50  ;;  %v1596_v0 = vfloor.f32 %v1595_v51  ;;  %v1225_v2 = vfloor.f32 %v1224_v52  ;;  %v1227_v3 = vadd.f32 0.5, %v1223_v37 }
  0x9a   : > { %vm1261_vm3 = vcmp.ge.s32.totalorder %v4667_v58, 0  ;;  %vm1265_vm4 = vcmp.lt.s32.totalorder %v4667_v58, 16  ;;  %v1563_v4 = vmul.f32 0.5, %v3680_v44  ;;  %3619 = vmatmul.mubr.msk.f32.gmra.mxu1 %vm638_vm1, %v3611_v56  ;;  %v1892_v63 = vstv %s4647_s19  ;;  %3578 = vmatmul.mubr.msk.f32.gmra.mxu0 %vm638_vm1, %v636_v62  ;;  %s5146_s19 = sld [smem:[#allocation6]] }
  0x9b   : > { %vm1263_vm7 = vmand %vm1259_vm2, %vm1261_vm3  ;;  %v3920_v5 = vcvt.f32.s32 %v3919_v61  ;;  %v3921_v53 = vtrunc.f32 %v1596_v0  ;;  %v3907_v6 = vtrunc.f32 %v1225_v2  ;;  %v1228_v7 = vfloor.f32 %v1227_v3  ;;  %1073 = vmatprep.mubr.f32.mxu1 %v6000_v1  ;;  %733 = vmatprep.mubr.f32.mxu0 %v6000_v1 }
  0x9c   : > { %vm1267_vm8 = vmand %vm1263_vm7, %vm1265_vm4  ;;  %vm1279_vm9 = vcmp.eq.s32.totalorder %v4411_v11, %v4670_v60  ;;  %v1565_v10 = vmul.f32 16.0, %v1564_v49  ;;  %v1568_v13 = vadd.f32 0.5, %v1563_v4  ;;  %v1898_v16 = vstv %s4660_s20  ;;  %s5152_s20 = sld [smem:[#allocation4 + $0x100]] }
  0x9d   : > { %v1281_v17 = vsel %vm1267_vm8, 1, %v4224_v57  ;;  %v4687_v46 = vcvt.f32.s32 %v3921_v53  ;;  %vm1599_vm5 = vcmp.ge.s32.totalorder %v3920_v5, 0  ;;  %vm1601_vm10 = vcmp.lt.s32.totalorder %v3920_v5, 16 }
  0x9e   : > { %v1289_v15 = vrot.slane %v1281_v17, %v4430_v23  ;;  %vm1603_vm11 = vmand %vm1599_vm5, %vm1601_vm10  ;;  %v4691_v41 = vrot.slane %v3920_v5, %v4433_v24  ;;  %v3908_v21 = vcvt.f32.s32 %v3907_v6  ;;  %v3909_v22 = vtrunc.f32 %v1228_v7  ;;  %3620 = vmatmul.mubr.msk.f32.gmra.mxu1 %vm638_vm1, %v3612_v9  ;;  %3579 = vmatmul.mubr.msk.f32.gmra.mxu0 %vm638_vm1, %v637_v55 }
  0x9f   : > { %vm1605_vm0 = vcmp.ge.s32.totalorder %v4687_v46, 0  ;;  %vm1609_vm14 = vcmp.lt.s32.totalorder %v4687_v46, 16  ;;  %v3681_v25 = vadd.f32 -1.0, %v1565_v10  ;;  %v1569_v26 = vfloor.f32 %v1568_v13  ;;  %1079 = vmatprep.mubr.f32.mxu1 %v6000_v1  ;;  %1405 = vmatprep.mubr.f32.mxu0 %v6000_v1 }
  0xa0   : > { %vm4701_vm13 = vcmp.eq.s32.totalorder %v1289_v15, 1  ;;  %vm1607_vm6 = vmand %vm1603_vm11, %vm1605_vm0  ;;  %v4705_v31 = vcvt.f32.s32 %v3909_v22  ;;  %vm1254_vm15 = vcmp.ge.s32.totalorder %v3908_v21, 0  ;;  %vm1277_vm12 = vcmp.eq.s32.totalorder %v4406_v8, %v4670_v60  ;;  %v3652_v60 = vld [vmem:[%s4610_s17 + $0x40] sm:$0xff] }
  0xa1   : > { %vm1295_vm2 = vmand %vm1279_vm9, %vm4701_vm13  ;;  %vm1256_vm3 = vcmp.lt.s32.totalorder %v3908_v21, 16  ;;  %v1271_v42 = vrot.slane %v3908_v21, %v4430_v23  ;;  %v1567_v30 = vmul.f32 0.5, %v3681_v25  ;;  %v3915_v32 = vtrunc.f32 %v1569_v26 }
  0xa2   : > { %3656 = vmatprep.subr.msk.mxu0 %vm1295_vm2, %v4225_v14  ;;  %vm1611_vm4 = vmand %vm1607_vm6, %vm1609_vm14  ;;  %vm1623_vm7 = vcmp.eq.s32.totalorder %v4411_v11, %v4691_v41  ;;  %vm1260_vm8 = vcmp.ge.s32.totalorder %v4705_v31, 0  ;;  %vm1264_vm5 = vcmp.lt.s32.totalorder %v4705_v31, 16  ;;  %3621 = vmatmul.mubr.msk.f32.gmra.mxu1 %vm638_vm1, %v3613_v27  ;;  %v1893_v33 = vmul.f32 %v1892_v63, %v4426_v20 }
  0xa3   : > { %v1625_v45 = vsel %vm1611_vm4, 1, %v4224_v57  ;;  %vm1258_vm9 = vmand %vm1254_vm15, %vm1256_vm3  ;;  %v3916_v34 = vcvt.f32.s32 %v3915_v32  ;;  %v1571_v36 = vadd.f32 0.5, %v1567_v30  ;;  %1749 = vmatprep.mubr.f32.mxu1 %v6000_v1  ;;  %v1899_v38 = vmul.f32 %v1898_v16, %v4426_v20 }
  0xa4   : > { %v1633_v39 = vrot.slane %v1625_v45, %v4433_v24  ;;  %vm1262_vm10 = vmand %vm1258_vm9, %vm1260_vm8  ;;  %vm1278_vm11 = vcmp.eq.s32.totalorder %v4411_v11, %v1271_v42  ;;  %v1918_v40 = vmul.f32 %v1892_v63, %v4413_v12  ;;  %v1923_v37 = vmul.f32 %v1898_v16, %v4413_v12 }
  0xa5   : > { %vm1266_vm0 = vmand %vm1262_vm10, %vm1264_vm5  ;;  %v1572_v49 = vfloor.f32 %v1571_v36  ;;  %vm1598_vm14 = vcmp.ge.s32.totalorder %v3916_v34, 0  ;;  %vm1600_vm6 = vcmp.lt.s32.totalorder %v3916_v34, 16  ;;  %v4736_v50 = vrot.slane %v3916_v34, %v4433_v24 }
  0xa6   : > { %vm4738_vm15 = vcmp.eq.s32.totalorder %v1633_v39, 1  ;;  %v1280_v52 = vsel %vm1266_vm0, 1, %v4224_v57  ;;  %vm1621_vm2 = vcmp.eq.s32.totalorder %v4406_v8, %v4691_v41  ;;  %v1919_v44 = vadd.f32 %v1918_v40, %v4465_v47  ;;  %vm4757_vm5 = vmand %vm1598_vm14, %vm1600_vm6  ;;  %v3653_v40 = vld [vmem:[%s4610_s17 + $0x48] sm:$0xff] }
  0xa7   : > { %v1924_v56 = vadd.f32 %v1923_v37, %v4456_v43  ;;  %vm1639_vm3 = vmand %vm1623_vm7, %vm4738_vm15  ;;  %v1285_v62 = vrot.slane %v1280_v52, %v4430_v23  ;;  %v3917_v61 = vtrunc.f32 %v1572_v49  ;;  %vm1622_vm4 = vcmp.eq.s32.totalorder %v4411_v11, %v4736_v50 }
  0xa8   : > { %vm1276_vm8 = vcmp.eq.s32.totalorder %v4406_v8, %v1271_v42  ;;  %3698 = vmatprep.subr.msk.mxu1 %vm1639_vm3, %v4225_v14  ;;  %vm1620_vm9 = vcmp.eq.s32.totalorder %v4406_v8, %v4736_v50  ;;  %v1920_v2 = vmul.f32 0.06666667, %v1919_v44  ;;  %v2236_v4 = vstv %s4699_s23  ;;  %vm4772_vm10 = vmand %vm1277_vm12, %vm4701_vm13  ;;  %s5156_s23 = sld [smem:[#allocation6 + $0x1]] }
  0xa9   : > { %v1925_v3 = vmul.f32 0.06666667, %v1924_v56  ;;  %v2242_v63 = vstv %s4710_s14  ;;  %vm1290_vm7 = vcmp.eq.s32.totalorder %v1285_v62, 1  ;;  %v4765_v5 = vcvt.f32.s32 %v3917_v61  ;;  %s5186_s14 = sld [smem:[#allocation4 + $0x2]] }
  0xaa   : > { %v2237_v6 = vmul.f32 %v2236_v4, %v4426_v20  ;;  %v2243_v7 = vmul.f32 %v2242_v63, %v4426_v20  ;;  %vm1294_vm0 = vmand %vm1278_vm11, %vm1290_vm7  ;;  %v1921_v9 = vmul.f32 2.0, %v1920_v2  ;;  %v2262_v13 = vmul.f32 %v2236_v4, %v4413_v12  ;;  %v3694_v2 = vld [vmem:[%s4610_s17 + $0x60] sm:$0xff] }
  0xab   : > { %v1926_v10 = vmul.f32 2.0, %v1925_v3  ;;  %v2267_v55 = vmul.f32 %v2242_v63, %v4413_v12  ;;  %3657 = vmatpush1.msk.msra.mxu0 %vm1294_vm0, %v4225_v14  ;;  %vm1604_vm13 = vcmp.ge.s32.totalorder %v4765_v5, 0  ;;  %vm1608_vm12 = vcmp.lt.s32.totalorder %v4765_v5, 16  ;;  %vm1292_vm14 = vmand %vm1276_vm8, %vm1290_vm7 }
  0xac   : > { %v1894_v16 = vadd.f32 %v1893_v33, %v4465_v47  ;;  %v1900_v17 = vadd.f32 %v1899_v38, %v4456_v43  ;;  %vm1606_vm11 = vmand %vm4757_vm5, %vm1604_vm13  ;;  %3658 = vmatprep.subr.msk.mxu0 %vm4772_vm10, %v4225_v14  ;;  %v3724_v15 = vadd.f32 -1.0, %v1921_v9  ;;  %v2263_v22 = vadd.f32 %v2262_v13, %v4465_v47  ;;  %v3654_v9 = vld [vmem:[%s4610_s17 + $0x50] sm:$0xff] }
  0xad   : > { %v3725_v21 = vadd.f32 -1.0, %v1926_v10  ;;  %v2268_v25 = vadd.f32 %v2267_v55, %v4456_v43  ;;  %vm1610_vm6 = vmand %vm1606_vm11, %vm1608_vm12  ;;  %3659 = vmatpush1.msk.msra.mxu0 %vm1292_vm14, %v4225_v14  ;;  %v2238_v29 = vadd.f32 %v2237_v6, %v4465_v47  ;;  %v2244_v42 = vadd.f32 %v2243_v7, %v4456_v43 }
  0xae   : > { %v1895_v26 = vmul.f32 0.06666667, %v1894_v16  ;;  %v1901_v27 = vmul.f32 0.06666667, %v1900_v17  ;;  %v1624_v30 = vsel %vm1610_vm6, 1, %v4224_v57  ;;  %3660 = vmatmul.mubr.msk.f32.vlgmr.msra.gmra.mxu0 %vm638_vm1, %v3652_v60  ;;  %v1928_v32 = vadd.f32 1.0, %v3724_v15  ;;  %vm4810_vm8 = vmand %vm1621_vm2, %vm4738_vm15 }
  0xaf   : > { %v1932_v33 = vadd.f32 1.0, %v3725_v21  ;;  %v2264_v45 = vmul.f32 0.06666667, %v2263_v22  ;;  %v1629_v34 = vrot.slane %v1624_v30, %v4433_v24  ;;  %v2269_v36 = vmul.f32 0.06666667, %v2268_v25  ;;  %1411 = vmatprep.mubr.f32.mxu0 %v6000_v1 }
  0xb0   : > { %v1896_v38 = vmul.f32 2.0, %v1895_v26  ;;  %v1902_v39 = vmul.f32 2.0, %v1901_v27  ;;  %v1929_v37 = vmul.f32 16.0, %v1928_v32  ;;  %v2239_v44 = vmul.f32 0.06666667, %v2238_v29  ;;  %v3695_v32 = vld [vmem:[%s4610_s17 + $0x68] sm:$0xff] }
  0xb1   : > { %v1933_v49 = vmul.f32 16.0, %v1932_v33  ;;  %v2265_v52 = vmul.f32 2.0, %v2264_v45  ;;  %vm1634_vm3 = vcmp.eq.s32.totalorder %v1629_v34, 1  ;;  %v2270_v62 = vmul.f32 2.0, %v2269_v36  ;;  %v3655_v33 = vld [vmem:[%s4610_s17 + $0x58] sm:$0xff] }
  0xb2   : > { %v3720_v61 = vadd.f32 -1.0, %v1896_v38  ;;  %v3721_v0 = vadd.f32 -1.0, %v1902_v39  ;;  %vm1638_vm5 = vmand %vm1622_vm4, %vm1634_vm3  ;;  %v3726_v3 = vadd.f32 -1.0, %v1929_v37  ;;  %v2240_v51 = vmul.f32 2.0, %v2239_v44  ;;  %3661 = vmatmul.mubr.msk.f32.gmra.mxu0 %vm638_vm1, %v3653_v40 }
  0xb3   : > { %v3727_v4 = vadd.f32 -1.0, %v1933_v49  ;;  %v3766_v63 = vadd.f32 -1.0, %v2265_v52  ;;  %3699 = vmatpush1.msk.msra.mxu1 %vm1638_vm5, %v4225_v14  ;;  %vm1636_vm15 = vmand %vm1620_vm9, %vm1634_vm3  ;;  %v3767_v41 = vadd.f32 -1.0, %v2270_v62  ;;  %v2245_v7 = vmul.f32 0.06666667, %v2244_v42  ;;  %1417 = vmatprep.mubr.f32.mxu0 %v6000_v1 }
  0xb4   : > { %v1904_v53 = vadd.f32 1.0, %v3720_v61  ;;  %v1908_v6 = vadd.f32 1.0, %v3721_v0  ;;  %3700 = vmatprep.subr.msk.mxu1 %vm4810_vm8, %v4225_v14  ;;  %v1931_v10 = vmul.f32 0.5, %v3726_v3  ;;  %v3762_v60 = vadd.f32 -1.0, %v2240_v51 }
  0xb5   : > { %v1935_v13 = vmul.f32 0.5, %v3727_v4  ;;  %v2272_v55 = vadd.f32 1.0, %v3766_v63  ;;  %3701 = vmatpush1.msk.msra.mxu1 %vm1636_vm15, %v4225_v14  ;;  %v2276_v50 = vadd.f32 1.0, %v3767_v41  ;;  %v2246_v15 = vmul.f32 2.0, %v2245_v7  ;;  %v3696_v4 = vld [vmem:[%s4610_s17 + $0x70] sm:$0xff] }
  0xb6   : > { %v1905_v16 = vmul.f32 16.0, %v1904_v53  ;;  %v1909_v17 = vmul.f32 16.0, %v1908_v6  ;;  %3702 = vmatmul.mubr.msk.f32.vlgmr.msra.gmra.mxu1 %vm638_vm1, %v3694_v2  ;;  %v1936_v21 = vadd.f32 0.5, %v1931_v10  ;;  %v2248_v26 = vadd.f32 1.0, %v3762_v60  ;;  %3662 = vmatmul.mubr.msk.f32.gmra.mxu0 %vm638_vm1, %v3654_v9 }
  0xb7   : > { %v1939_v22 = vadd.f32 0.5, %v1935_v13  ;;  %v2273_v25 = vmul.f32 16.0, %v2272_v55  ;;  %v2277_v27 = vmul.f32 16.0, %v2276_v50  ;;  %v3763_v30 = vadd.f32 -1.0, %v2246_v15  ;;  %1755 = vmatprep.mubr.f32.mxu1 %v6000_v1  ;;  %1423 = vmatprep.mubr.f32.mxu0 %v6000_v1 }
  0xb8   : > { %v3722_v29 = vadd.f32 -1.0, %v1905_v16  ;;  %v3723_v42 = vadd.f32 -1.0, %v1909_v17  ;;  %v1937_v45 = vfloor.f32 %v1936_v21  ;;  %v2249_v38 = vmul.f32 16.0, %v2248_v26  ;;  %v3697_v16 = vld [vmem:[%s4610_s17 + $0x78] sm:$0xff] }
  0xb9   : > { %v1940_v34 = vfloor.f32 %v1939_v22  ;;  %v3768_v36 = vadd.f32 -1.0, %v2273_v25  ;;  %v3769_v39 = vadd.f32 -1.0, %v2277_v27  ;;  %v2252_v49 = vadd.f32 1.0, %v3763_v30 }
  0xba   : > { %v1907_v40 = vmul.f32 0.5, %v3722_v29  ;;  %v1911_v37 = vmul.f32 0.5, %v3723_v42  ;;  %v3927_v52 = vtrunc.f32 %v1937_v45  ;;  %v3764_v62 = vadd.f32 -1.0, %v2249_v38  ;;  %3703 = vmatmul.mubr.msk.f32.gmra.mxu1 %vm638_vm1, %v3695_v32  ;;  %3663 = vmatmul.mubr.msk.f32.gmra.mxu0 %vm638_vm1, %v3655_v33 }
  0xbb   : > { %v3929_v44 = vtrunc.f32 %v1940_v34  ;;  %v2275_v56 = vmul.f32 0.5, %v3768_v36  ;;  %v2279_v61 = vmul.f32 0.5, %v3769_v39  ;;  %v2253_v3 = vmul.f32 16.0, %v2252_v49  ;;  %1761 = vmatprep.mubr.f32.mxu1 %v6000_v1  ;;  %2093 = vmatprep.mubr.f32.mxu0 %v6000_v1 }
  0xbc   : > { %v1912_v0 = vadd.f32 0.5, %v1907_v40  ;;  %v1915_v2 = vadd.f32 0.5, %v1911_v37  ;;  %v3928_v63 = vcvt.f32.s32 %v3927_v52  ;;  %v2251_v53 = vmul.f32 0.5, %v3764_v62 }
  0xbd   : > { %v4840_v51 = vcvt.f32.s32 %v3929_v44  ;;  %v2280_v41 = vadd.f32 0.5, %v2275_v56  ;;  %v2283_v6 = vadd.f32 0.5, %v2279_v61  ;;  %v3765_v10 = vadd.f32 -1.0, %v2253_v3 }
  0xbe   : > { %v1913_v7 = vfloor.f32 %v1912_v0  ;;  %v1916_v9 = vfloor.f32 %v1915_v2  ;;  %vm1943_vm2 = vcmp.ge.s32.totalorder %v3928_v63, 0  ;;  %vm1945_vm4 = vcmp.lt.s32.totalorder %v3928_v63, 16  ;;  %3704 = vmatmul.mubr.msk.f32.gmra.mxu1 %vm638_vm1, %v3696_v4 }
  0xbf   : > { %vm1949_vm9 = vcmp.ge.s32.totalorder %v4840_v51, 0  ;;  %vm1953_vm7 = vcmp.lt.s32.totalorder %v4840_v51, 16  ;;  %vm1947_vm10 = vmand %vm1943_vm2, %vm1945_vm4  ;;  %v4848_v13 = vrot.slane %v3928_v63, %v4439_v28  ;;  %v2281_v55 = vfloor.f32 %v2280_v41  ;;  %1767 = vmatprep.mubr.f32.mxu1 %v6000_v1 }
  0xc0   : > { %v2284_v60 = vfloor.f32 %v2283_v6  ;;  %v3923_v50 = vtrunc.f32 %v1913_v7  ;;  %vm1951_vm0 = vmand %vm1947_vm10, %vm1949_vm9  ;;  %v4853_v17 = vsub.s32 5, %v4406_v8  ;;  %v3925_v15 = vtrunc.f32 %v1916_v9 }
  0xc1   : > { %v2255_v21 = vmul.f32 0.5, %v3765_v10  ;;  %v2256_v22 = vadd.f32 0.5, %v2251_v53  ;;  %vm1955_vm13 = vmand %vm1951_vm0, %vm1953_vm7  ;;  %vm1967_vm12 = vcmp.eq.s32.totalorder %v4411_v11, %v4848_v13  ;;  %v3935_v25 = vtrunc.f32 %v2281_v55 }
  0xc2   : > { %v3937_v26 = vtrunc.f32 %v2284_v60  ;;  %v3924_v27 = vcvt.f32.s32 %v3923_v50  ;;  %v1969_v29 = vsel %vm1955_vm13, 1, %v4224_v57  ;;  %v4862_v42 = vcvt.f32.s32 %v3925_v15  ;;  %3705 = vmatmul.mubr.msk.f32.gmra.mxu1 %vm638_vm1, %v3697_v16 }
  0xc3   : > { %v2257_v30 = vfloor.f32 %v2256_v22  ;;  %v2259_v32 = vadd.f32 0.5, %v2255_v21  ;;  %v1977_v33 = vrot.slane %v1969_v29, %v4439_v28  ;;  %v3936_v45 = vcvt.f32.s32 %v3935_v25  ;;  %2437 = vmatprep.mubr.f32.mxu1 %v6000_v1 }
  0xc4   : > { %v4866_v34 = vcvt.f32.s32 %v3937_v26  ;;  %vm1942_vm14 = vcmp.ge.s32.totalorder %v3924_v27, 0  ;;  %vm1944_vm11 = vcmp.lt.s32.totalorder %v3924_v27, 16  ;;  %v4870_v36 = vrot.slane %v3924_v27, %v4439_v28 }
  0xc5   : > { %v2580_v38 = vstv %s4842_s16  ;;  %vm4873_vm6 = vcmp.eq.s32.totalorder %v1977_v33, 1  ;;  %vm2287_vm3 = vcmp.ge.s32.totalorder %v3936_v45, 0  ;;  %vm2289_vm8 = vcmp.lt.s32.totalorder %v3936_v45, 16  ;;  %vm4878_vm15 = vmand %vm1942_vm14, %vm1944_vm11  ;;  %s5198_s16 = sld [smem:[#allocation4 + $0x82]] }
  0xc6   : > { %vm2293_vm5 = vcmp.ge.s32.totalorder %v4866_v34, 0  ;;  %vm1983_vm2 = vmand %vm1967_vm12, %vm4873_vm6  ;;  %vm2297_vm4 = vcmp.lt.s32.totalorder %v4866_v34, 16  ;;  %v4891_v37 = vrot.slane %v3936_v45, %v4853_v17  ;;  %vm1948_vm9 = vcmp.ge.s32.totalorder %v4862_v42, 0 }
  0xc7   : > { %v3931_v49 = vtrunc.f32 %v2257_v30  ;;  %3740 = vmatprep.subr.msk.mxu0 %vm1983_vm2, %v4225_v14  ;;  %vm2291_vm7 = vmand %vm2287_vm3, %vm2289_vm8  ;;  %vm1952_vm10 = vcmp.lt.s32.totalorder %v4862_v42, 16  ;;  %vm1966_vm0 = vcmp.eq.s32.totalorder %v4411_v11, %v4870_v36  ;;  %v2260_v52 = vfloor.f32 %v2259_v32 }
  0xc8   : > { %vm1965_vm13 = vcmp.eq.s32.totalorder %v4406_v8, %v4848_v13  ;;  %vm2295_vm12 = vmand %vm2291_vm7, %vm2293_vm5  ;;  %vm1964_vm14 = vcmp.eq.s32.totalorder %v4406_v8, %v4870_v36  ;;  %v2581_v56 = vmul.f32 %v2580_v38, %v4426_v20  ;;  %v2586_v62 = vstv %s4855_s11  ;;  %s451_s11 = scalar_lea.vmem %s5984_s1, %s4393_s18 }
  0xc9   : > { %v3932_v44 = vcvt.f32.s32 %v3931_v49  ;;  %vm2299_vm11 = vmand %vm2295_vm12, %vm2297_vm4  ;;  %vm2311_vm3 = vcmp.eq.s32.totalorder %v4411_v11, %v4891_v37  ;;  %v3933_v61 = vtrunc.f32 %v2260_v52  ;;  %v2606_v0 = vmul.f32 %v2580_v38, %v4413_v12  ;;  %v3736_v52 = vld [vmem:[%s4610_s17 + $0x80] sm:$0xff] }
  0xca   : > { %v2611_v2 = vmul.f32 %v2586_v62, %v4413_v12  ;;  %v2313_v3 = vsel %vm2299_vm11, 1, %v4224_v57  ;;  %vm1950_vm8 = vmand %vm4878_vm15, %vm1948_vm9  ;;  %vm2309_vm4 = vcmp.eq.s32.totalorder %v4406_v8, %v4891_v37  ;;  %v2587_v10 = vmul.f32 %v2586_v62, %v4426_v20  ;;  %v3737_v37 = vld [vmem:[%s4610_s17 + $0x88] sm:$0xff] }
  0xcb   : > { %vm2286_vm5 = vcmp.ge.s32.totalorder %v3932_v44, 0  ;;  %vm2288_vm2 = vcmp.lt.s32.totalorder %v3932_v44, 16  ;;  %v4920_v4 = vrot.slane %v3932_v44, %v4853_v17  ;;  %v2321_v63 = vrot.slane %v2313_v3, %v4853_v17  ;;  %vm1954_vm7 = vmand %vm1950_vm8, %vm1952_vm10 }
  0xcc   : > { %v4927_v41 = vcvt.f32.s32 %v3933_v61  ;;  %v2607_v53 = vadd.f32 %v2606_v0, %v4465_v47  ;;  %v2612_v6 = vadd.f32 %v2611_v2, %v4456_v43  ;;  %v1968_v7 = vsel %vm1954_vm7, 1, %v4224_v57  ;;  %vm4932_vm15 = vmand %vm2286_vm5, %vm2288_vm2 }
  0xcd   : > { %vm2310_vm9 = vcmp.eq.s32.totalorder %v4411_v11, %v4920_v4  ;;  %vm2308_vm10 = vcmp.eq.s32.totalorder %v4406_v8, %v4920_v4  ;;  %vm4941_vm12 = vcmp.eq.s32.totalorder %v2321_v63, 1  ;;  %v1973_v60 = vrot.slane %v1968_v7, %v4439_v28  ;;  %vm4953_vm5 = vmand %vm1965_vm13, %vm4873_vm6 }
  0xce   : > { %vm2292_vm11 = vcmp.ge.s32.totalorder %v4927_v41, 0  ;;  %vm2296_vm8 = vcmp.lt.s32.totalorder %v4927_v41, 16  ;;  %vm2327_vm2 = vmand %vm2311_vm3, %vm4941_vm12  ;;  %v2608_v16 = vmul.f32 0.06666667, %v2607_v53  ;;  %v2613_v15 = vmul.f32 0.06666667, %v2612_v6 }
  0xcf   : > { %v2924_v21 = vstv %s4882_s21  ;;  %v2930_v22 = vstv %s4894_s12  ;;  %3782 = vmatprep.subr.msk.mxu1 %vm2327_vm2, %v4225_v14  ;;  %vm4965_vm7 = vcmp.eq.s32.totalorder %v1973_v60, 1  ;;  %vm2294_vm6 = vmand %vm4932_vm15, %vm2292_vm11  ;;  %v4972_v13 = vsub.s32 6, %v4406_v8  ;;  %s5165_s21 = sld [smem:[#allocation4 + $0x81]] }
  0xd0   : > { %v2925_v26 = vmul.f32 %v2924_v21, %v4426_v20  ;;  %v2950_v27 = vmul.f32 %v2924_v21, %v4413_v12  ;;  %vm1982_vm13 = vmand %vm1966_vm0, %vm4965_vm7  ;;  %v2609_v29 = vmul.f32 2.0, %v2608_v16  ;;  %v2614_v30 = vmul.f32 2.0, %v2613_v15  ;;  %v3778_v15 = vld [vmem:[%s4610_s17 + $0xa0] sm:$0xff]  ;;  %s5171_s12 = sld [smem:[#allocation6 + $0x2]] }
  0xd1   : > { %v2931_v32 = vmul.f32 %v2930_v22, %v4426_v20  ;;  %v2955_v33 = vmul.f32 %v2930_v22, %v4413_v12  ;;  %3741 = vmatpush1.msk.msra.mxu0 %vm1982_vm13, %v4225_v14  ;;  %vm2298_vm3 = vmand %vm2294_vm6, %vm2296_vm8  ;;  %v2582_v38 = vadd.f32 %v2581_v56, %v4465_v47  ;;  %v2588_v39 = vadd.f32 %v2587_v10, %v4456_v43 }
  0xd2   : > { %v2951_v45 = vadd.f32 %v2950_v27, %v4465_v47  ;;  %v2926_v40 = vadd.f32 %v2925_v26, %v4465_v47  ;;  %v2312_v49 = vsel %vm2298_vm3, 1, %v4224_v57  ;;  %3742 = vmatprep.subr.msk.mxu0 %vm4953_vm5, %v4225_v14  ;;  %v3808_v44 = vadd.f32 -1.0, %v2609_v29  ;;  %vm1980_vm0 = vmand %vm1964_vm14, %vm4965_vm7 }
  0xd3   : > { %v3809_v62 = vadd.f32 -1.0, %v2614_v30  ;;  %v2956_v61 = vadd.f32 %v2955_v33, %v4456_v43  ;;  %v2317_v0 = vrot.slane %v2312_v49, %v4853_v17  ;;  %v2583_v56 = vmul.f32 0.06666667, %v2582_v38  ;;  %3743 = vmatpush1.msk.msra.mxu0 %vm1980_vm0, %v4225_v14  ;;  %vm5008_vm11 = vmand %vm2309_vm4, %vm4941_vm12 }
  0xd4   : > { %v2952_v47 = vmul.f32 0.06666667, %v2951_v45  ;;  %v2589_v2 = vmul.f32 0.06666667, %v2588_v39  ;;  %v2616_v3 = vadd.f32 1.0, %v3808_v44  ;;  %3744 = vmatmul.mubr.msk.f32.vlgmr.msra.gmra.mxu0 %vm638_vm1, %v3736_v52  ;;  %v2932_v26 = vadd.f32 %v2931_v32, %v4456_v43  ;;  %v3738_v52 = vld [vmem:[%s4610_s17 + $0x90] sm:$0xff] }
  0xd5   : > { %v2620_v63 = vadd.f32 1.0, %v3809_v62  ;;  %v2957_v53 = vmul.f32 0.06666667, %v2956_v61  ;;  %v2927_v6 = vmul.f32 0.06666667, %v2926_v40  ;;  %vm2322_vm15 = vcmp.eq.s32.totalorder %v2317_v0, 1  ;;  %2099 = vmatprep.mubr.f32.mxu0 %v6000_v1 }
  0xd6   : > { %v2953_v7 = vmul.f32 2.0, %v2952_v47  ;;  %v2584_v9 = vmul.f32 2.0, %v2583_v56  ;;  %v2590_v10 = vmul.f32 2.0, %v2589_v2  ;;  %vm2326_vm14 = vmand %vm2310_vm9, %vm2322_vm15  ;;  %v2617_v60 = vmul.f32 16.0, %v2616_v3  ;;  %v3779_v47 = vld [vmem:[%s4610_s17 + $0xa8] sm:$0xff] }
  0xd7   : > { %v2621_v50 = vmul.f32 16.0, %v2620_v63  ;;  %v2958_v16 = vmul.f32 2.0, %v2957_v53  ;;  %v2928_v55 = vmul.f32 2.0, %v2927_v6  ;;  %3783 = vmatpush1.msk.msra.mxu1 %vm2326_vm14, %v4225_v14  ;;  %vm2324_vm4 = vmand %vm2308_vm10, %vm2322_vm15  ;;  %v2933_v39 = vmul.f32 0.06666667, %v2932_v26 }
  0xd8   : > { %v3850_v21 = vadd.f32 -1.0, %v2953_v7  ;;  %v3804_v22 = vadd.f32 -1.0, %v2584_v9  ;;  %v3805_v25 = vadd.f32 -1.0, %v2590_v10  ;;  %3784 = vmatprep.subr.msk.mxu1 %vm5008_vm11, %v4225_v14  ;;  %v3810_v27 = vadd.f32 -1.0, %v2617_v60  ;;  %3745 = vmatmul.mubr.msk.f32.gmra.mxu0 %vm638_vm1, %v3737_v37 }
  0xd9   : > { %v3811_v29 = vadd.f32 -1.0, %v2621_v50  ;;  %v3851_v30 = vadd.f32 -1.0, %v2958_v16  ;;  %v3846_v33 = vadd.f32 -1.0, %v2928_v55  ;;  %3785 = vmatpush1.msk.msra.mxu1 %vm2324_vm4, %v4225_v14  ;;  %2105 = vmatprep.mubr.f32.mxu0 %v6000_v1  ;;  %v2934_v0 = vmul.f32 2.0, %v2933_v39  ;;  %v3739_v16 = vld [vmem:[%s4610_s17 + $0x98] sm:$0xff] }
  0xda   : > { %v2960_v45 = vadd.f32 1.0, %v3850_v21  ;;  %v2592_v4 = vadd.f32 1.0, %v3804_v22  ;;  %v2596_v38 = vadd.f32 1.0, %v3805_v25  ;;  %3786 = vmatmul.mubr.msk.f32.vlgmr.msra.gmra.mxu1 %vm638_vm1, %v3778_v15  ;;  %v2619_v43 = vmul.f32 0.5, %v3810_v27  ;;  %v3780_v22 = vld [vmem:[%s4610_s17 + $0xb0] sm:$0xff] }
  0xdb   : > { %v2623_v32 = vmul.f32 0.5, %v3811_v29  ;;  %v2964_v40 = vadd.f32 1.0, %v3851_v30  ;;  %v2936_v49 = vadd.f32 1.0, %v3846_v33  ;;  %2443 = vmatprep.mubr.f32.mxu1 %v6000_v1  ;;  %v3847_v7 = vadd.f32 -1.0, %v2934_v0 }
  0xdc   : > { %v2961_v44 = vmul.f32 16.0, %v2960_v45  ;;  %v2593_v62 = vmul.f32 16.0, %v2592_v4  ;;  %v2597_v61 = vmul.f32 16.0, %v2596_v38  ;;  %v2624_v56 = vadd.f32 0.5, %v2619_v43  ;;  %3746 = vmatmul.mubr.msk.f32.gmra.mxu0 %vm638_vm1, %v3738_v52 }
  0xdd   : > { %v2627_v2 = vadd.f32 0.5, %v2623_v32  ;;  %v2965_v3 = vmul.f32 16.0, %v2964_v40  ;;  %v2937_v63 = vmul.f32 16.0, %v2936_v49  ;;  %2111 = vmatprep.mubr.f32.mxu0 %v6000_v1  ;;  %v2940_v21 = vadd.f32 1.0, %v3847_v7 }
  0xde   : > { %v3852_v53 = vadd.f32 -1.0, %v2961_v44  ;;  %v3806_v6 = vadd.f32 -1.0, %v2593_v62  ;;  %v3807_v36 = vadd.f32 -1.0, %v2597_v61  ;;  %v2625_v9 = vfloor.f32 %v2624_v56  ;;  %3787 = vmatmul.mubr.msk.f32.gmra.mxu1 %vm638_vm1, %v3779_v47  ;;  %v3781_v62 = vld [vmem:[%s4610_s17 + $0xb8] sm:$0xff] }
  0xdf   : > { %v2628_v10 = vfloor.f32 %v2627_v2  ;;  %v3853_v60 = vadd.f32 -1.0, %v2965_v3  ;;  %v3848_v50 = vadd.f32 -1.0, %v2937_v63  ;;  %2449 = vmatprep.mubr.f32.mxu1 %v6000_v1  ;;  %v2941_v4 = vmul.f32 16.0, %v2940_v21 }
  0xe0   : > { %v2963_v55 = vmul.f32 0.5, %v3852_v53  ;;  %v2595_v37 = vmul.f32 0.5, %v3806_v6  ;;  %v2599_v15 = vmul.f32 0.5, %v3807_v36  ;;  %v3943_v25 = vtrunc.f32 %v2625_v9  ;;  %3747 = vmatmul.mubr.msk.f32.gmra.mxu0 %vm638_vm1, %v3739_v16 }
  0xe1   : > { %v3945_v26 = vtrunc.f32 %v2628_v10  ;;  %v2967_v27 = vmul.f32 0.5, %v3853_v60  ;;  %v2939_v29 = vmul.f32 0.5, %v3848_v50  ;;  %2781 = vmatprep.mubr.f32.mxu0 %v6000_v1  ;;  %v3849_v44 = vadd.f32 -1.0, %v2941_v4 }
  0xe2   : > { %v2968_v30 = vadd.f32 0.5, %v2963_v55  ;;  %v2600_v33 = vadd.f32 0.5, %v2595_v37  ;;  %v2603_v45 = vadd.f32 0.5, %v2599_v15  ;;  %v3944_v38 = vcvt.f32.s32 %v3943_v25  ;;  %3788 = vmatmul.mubr.msk.f32.gmra.mxu1 %vm638_vm1, %v3780_v22 }
  0xe3   : > { %v5041_v39 = vcvt.f32.s32 %v3945_v26  ;;  %v2971_v43 = vadd.f32 0.5, %v2967_v27  ;;  %v2944_v32 = vadd.f32 0.5, %v2939_v29  ;;  %2455 = vmatprep.mubr.f32.mxu1 %v6000_v1  ;;  %v5051_v2 = vsub.s32 7, %v4406_v8 }
  0xe4   : > { %v2969_v40 = vfloor.f32 %v2968_v30  ;;  %v2601_v49 = vfloor.f32 %v2600_v33  ;;  %v2604_v52 = vfloor.f32 %v2603_v45  ;;  %vm2631_vm9 = vcmp.ge.s32.totalorder %v3944_v38, 0 }
  0xe5   : > { %vm2633_vm10 = vcmp.lt.s32.totalorder %v3944_v38, 16  ;;  %vm2637_vm12 = vcmp.ge.s32.totalorder %v5041_v39, 0  ;;  %vm2641_vm8 = vcmp.lt.s32.totalorder %v5041_v39, 16  ;;  %v2651_v61 = vrot.slane %v3944_v38, %v4972_v13 }
  0xe6   : > { %vm2635_vm5 = vmand %vm2631_vm9, %vm2633_vm10  ;;  %v3951_v0 = vtrunc.f32 %v2969_v40  ;;  %v2972_v47 = vfloor.f32 %v2971_v43  ;;  %v3939_v56 = vtrunc.f32 %v2601_v49  ;;  %v3941_v3 = vtrunc.f32 %v2604_v52  ;;  %3789 = vmatmul.mubr.msk.f32.gmra.mxu1 %vm638_vm1, %v3781_v62  ;;  %v3820_v40 = vld [vmem:[%s4610_s17 + $0xc0] sm:$0xff]  ;;  %v3863_v62 = vld [vmem:[%s4610_s17 + $0xe8] sm:$0xff] }
  0xe7   : > { %vm2639_vm2 = vmand %vm2635_vm5, %vm2637_vm12  ;;  %v2943_v63 = vmul.f32 0.5, %v3849_v44  ;;  %v2945_v53 = vfloor.f32 %v2944_v32  ;;  %vm2655_vm6 = vcmp.eq.s32.totalorder %v4411_v11, %v2651_v61  ;;  %3125 = vmatprep.mubr.f32.mxu1 %v6000_v1  ;;  %v3862_v52 = vld [vmem:[%s4610_s17 + $0xe0] sm:$0xff]  ;;  %v3822_v44 = vld [vmem:[%s4610_s17 + $0xd0] sm:$0xff]  ;;  %v782_v37 = vstv %s5146_s19  ;;  %s5458_s19 = sld [smem:[#allocation6]] }
  0xe8   : > { %vm2643_vm7 = vmand %vm2639_vm2, %vm2641_vm8  ;;  %v3952_v6 = vcvt.f32.s32 %v3951_v0  ;;  %v3953_v36 = vtrunc.f32 %v2972_v47  ;;  %v3940_v7 = vcvt.f32.s32 %v3939_v56  ;;  %v5057_v10 = vcvt.f32.s32 %v3941_v3  ;;  %v3865_v0 = vld [vmem:[%s4610_s17 + $0xf8] sm:$0xff] }
  0xe9   : > { %v2657_v9 = vsel %vm2643_vm7, 1, %v4224_v57  ;;  %v3947_v60 = vtrunc.f32 %v2945_v53  ;;  %v2947_v50 = vadd.f32 0.5, %v2943_v63  ;;  %v617_v47 = vrot.slane %v4503_v54, %v4421_v18  ;;  %v5182_v53 = vld [vmem:[%s451_s11] sm:$0xff]  ;;  %s5591_s11 = sld [smem:[#allocation4 + $0x81]] }
  0xea   : > { %v2665_v16 = vrot.slane %v2657_v9, %v4972_v13  ;;  %v5060_v55 = vcvt.f32.s32 %v3953_v36  ;;  %vm2975_vm13 = vcmp.ge.s32.totalorder %v3952_v6, 0  ;;  %vm2977_vm3 = vcmp.lt.s32.totalorder %v3952_v6, 16  ;;  %6078 = vst [vmem:[#allocation14_spill] sm:$0xff] %v5182_v53 }
  0xeb   : > { %vm2979_vm0 = vmand %vm2975_vm13, %vm2977_vm3  ;;  %vm2630_vm15 = vcmp.ge.s32.totalorder %v3940_v7, 0  ;;  %vm2632_vm11 = vcmp.lt.s32.totalorder %v3940_v7, 16  ;;  %v2995_v21 = vrot.slane %v3952_v6, %v5051_v2  ;;  %vm2636_vm8 = vcmp.ge.s32.totalorder %v5057_v10, 0 }
  0xec   : > { %vm5062_vm14 = vcmp.eq.s32.totalorder %v2665_v16, 1  ;;  %vm2981_vm4 = vcmp.ge.s32.totalorder %v5060_v55, 0  ;;  %vm2985_vm9 = vcmp.lt.s32.totalorder %v5060_v55, 16  ;;  %vm5068_vm10 = vmand %vm2630_vm15, %vm2632_vm11  ;;  %v3948_v22 = vcvt.f32.s32 %v3947_v60 }
  0xed   : > { %vm2671_vm12 = vmand %vm2655_vm6, %vm5062_vm14  ;;  %v2948_v25 = vfloor.f32 %v2947_v50  ;;  %vm2640_vm2 = vcmp.lt.s32.totalorder %v5057_v10, 16  ;;  %v2647_v26 = vrot.slane %v3940_v7, %v4972_v13  ;;  %vm2653_vm15 = vcmp.eq.s32.totalorder %v4406_v8, %v2651_v61  ;;  %v3823_v61 = vld [vmem:[%s4610_s17 + $0xd8] sm:$0xff] }
  0xee   : > { %3824 = vmatprep.subr.msk.mxu0 %vm2671_vm12, %v4225_v14  ;;  %vm2983_vm5 = vmand %vm2979_vm0, %vm2981_vm4  ;;  %vm2974_vm13 = vcmp.ge.s32.totalorder %v3948_v22, 0  ;;  %vm2976_vm3 = vcmp.lt.s32.totalorder %v3948_v22, 16  ;;  %vm2999_vm11 = vcmp.eq.s32.totalorder %v4411_v11, %v2995_v21  ;;  %v2991_v43 = vrot.slane %v3948_v22, %v5051_v2 }
  0xef   : > { %vm2987_vm7 = vmand %vm2983_vm5, %vm2985_vm9  ;;  %v3949_v27 = vtrunc.f32 %v2948_v25  ;;  %vm2654_vm12 = vcmp.eq.s32.totalorder %v4411_v11, %v2647_v26  ;;  %v963_v56 = vrot.slane %v4518_v59, %v4424_v19  ;;  %v621_v3 = vrot.slane %v4481_v35, %v4421_v18 }
  0xf0   : > { %v3001_v29 = vsel %vm2987_vm7, 1, %v4224_v57  ;;  %vm2638_vm6 = vmand %vm5068_vm10, %vm2636_vm8  ;;  %v967_v18 = vrot.slane %v4491_v48, %v4424_v19  ;;  %v780_v6 = vstv %s5140_s8  ;;  %v794_v36 = vstv %s5142_s15  ;;  %s5206_s8 = sld [smem:[#allocation4 + $0x102]] }
  0xf1   : > { %v3009_v30 = vrot.slane %v3001_v29, %v5051_v2  ;;  %vm2642_vm0 = vmand %vm2638_vm6, %vm2640_vm2  ;;  %v5087_v33 = vcvt.f32.s32 %v3949_v27  ;;  %vm2652_vm6 = vcmp.eq.s32.totalorder %v4406_v8, %v2647_v26  ;;  %v808_v60 = vstv %s5152_s20  ;;  %s5442_s15 = sld [smem:[#allocation4 + $0x80]] }
  0xf2   : > { %v2656_v45 = vsel %vm2642_vm0, 1, %v4224_v57  ;;  %vm2978_vm4 = vmand %vm2974_vm13, %vm2976_vm3  ;;  %v781_v16 = vmul.f32 %v780_v6, %v5182_v53  ;;  %v795_v15 = vmul.f32 %v794_v36, %v5182_v53  ;;  %v796_v25 = vstv %s5156_s23  ;;  %s5525_s20 = sld [smem:[#allocation6 + $0x1]] }
  0xf3   : > { %vm5090_vm9 = vcmp.eq.s32.totalorder %v3009_v30, 1  ;;  %v2661_v38 = vrot.slane %v2656_v45, %v4972_v13  ;;  %vm2980_vm10 = vcmp.ge.s32.totalorder %v5087_v33, 0  ;;  %vm2669_vm8 = vmand %vm2653_vm15, %vm5062_vm14  ;;  %vm2984_vm2 = vcmp.lt.s32.totalorder %v5087_v33, 16  ;;  %s5589_s23 = sld [smem:[#allocation4 + $0x1]] }
  0xf4   : > { %vm3015_vm5 = vmand %vm2999_vm11, %vm5090_vm9  ;;  %vm2997_vm14 = vcmp.eq.s32.totalorder %v4406_v8, %v2995_v21  ;;  %vm2998_vm15 = vcmp.eq.s32.totalorder %v4411_v11, %v2991_v43  ;;  %v1307_v21 = vrot.slane %v4705_v31, %v4430_v23  ;;  %v1651_v26 = vrot.slane %v4765_v5, %v4433_v24 }
  0xf5   : > { %3866 = vmatprep.subr.msk.mxu1 %vm3015_vm5, %v4225_v14  ;;  %vm2666_vm7 = vcmp.eq.s32.totalorder %v2661_v38, 1  ;;  %vm2982_vm13 = vmand %vm2978_vm4, %vm2980_vm10  ;;  %vm2996_vm4 = vcmp.eq.s32.totalorder %v4406_v8, %v2991_v43  ;;  %v1311_v27 = vrot.slane %v4667_v58, %v4430_v23  ;;  %v5224_v29 = vrot.slane %v4687_v46, %v4433_v24 }
  0xf6   : > { %vm2670_vm3 = vmand %vm2654_vm12, %vm2666_vm7  ;;  %v809_v58 = vmul.f32 %v808_v60, %v5182_v53  ;;  %v810_v38 = vstv %s5171_s12  ;;  %s5603_s12 = sld [smem:[#allocation4 + $0x100]] }
  0xf7   : > { %3825 = vmatpush1.msk.msra.mxu0 %vm2670_vm3, %v4225_v14  ;;  %vm2986_vm0 = vmand %vm2982_vm13, %vm2984_vm2  ;;  %vm623_vm2 = vcmp.eq.s32.totalorder %v4406_v8, %v621_v3  ;;  %vm970_vm13 = vcmp.eq.s32.totalorder %v4411_v11, %v963_v56  ;;  %vm969_vm3 = vcmp.eq.s32.totalorder %v4406_v8, %v967_v18 }
  0xf8   : > { %v3000_v32 = vsel %vm2986_vm0, 1, %v4224_v57  ;;  %3826 = vmatprep.subr.msk.mxu0 %vm2669_vm8, %v4225_v14  ;;  %vm2668_vm11 = vmand %vm2652_vm6, %vm2666_vm7  ;;  %v3821_v57 = vld [vmem:[%s4610_s17 + $0xc8] sm:$0xff]  ;;  %v5192_v48 = vsel %vm623_vm2, 1.0, %v6000_v1  ;;  %vm624_vm7 = vcmp.eq.s32.totalorder %v4411_v11, %v617_v47  ;;  %vm625_vm6 = vcmp.eq.s32.totalorder %v4411_v11, %v621_v3 }
  0xf9   : > { %v3005_v49 = vrot.slane %v3000_v32, %v5051_v2  ;;  %3827 = vmatpush1.msk.msra.mxu0 %vm2668_vm11, %v4225_v14  ;;  %vm3013_vm10 = vmand %vm2997_vm14, %vm5090_vm9  ;;  %vm968_vm9 = vcmp.eq.s32.totalorder %v4406_v8, %v963_v56  ;;  %vm971_vm0 = vcmp.eq.s32.totalorder %v4411_v11, %v967_v18  ;;  %v5229_v30 = vsel %vm969_vm3, 1.0, %v6000_v1 }
  0xfa   : > { %3828 = vmatmul.mubr.msk.f32.vlgmr.msra.gmra.mxu0 %vm638_vm1, %v3820_v40  ;;  %v5189_v19 = vsel %vm968_vm9, 1.0, %v6000_v1  ;;  %v3570_v31 = vsel %vm624_vm7, 1.0, %v6000_v1  ;;  %v5237_v5 = vsel %vm970_vm13, 1.0, %v6000_v1  ;;  %v5243_v24 = vsel %vm625_vm6, 1.0, %v6000_v1 }
  0xfb   : > { %vm3010_vm12 = vcmp.eq.s32.totalorder %v3005_v49, 1  ;;  %2787 = vmatprep.mubr.f32.mxu0 %v6000_v1  ;;  %v5248_v46 = vsel %vm971_vm0, 1.0, %v6000_v1  ;;  %v5256_v32 = vadd.f32 %v782_v37, %v781_v16  ;;  %v5258_v40 = vadd.f32 %v796_v25, %v795_v15 }
  0xfc   : > { %vm3014_vm8 = vmand %vm2998_vm15, %vm3010_vm12  ;;  %v5261_v49 = vstv %s5165_s21  ;;  %vm1312_vm14 = vcmp.eq.s32.totalorder %v4406_v8, %v1307_v21  ;;  %vm1656_vm15 = vcmp.eq.s32.totalorder %v4406_v8, %v1651_v26  ;;  %vm1313_vm11 = vcmp.eq.s32.totalorder %v4406_v8, %v1311_v27 }
  0xfd   : > { %3867 = vmatpush1.msk.msra.mxu1 %vm3014_vm8, %v4225_v14  ;;  %vm3012_vm5 = vmand %vm2996_vm4, %vm3010_vm12  ;;  %vm1657_vm4 = vcmp.eq.s32.totalorder %v4406_v8, %v5224_v29  ;;  %vm1314_vm12 = vcmp.eq.s32.totalorder %v4411_v11, %v1307_v21  ;;  %v5282_v3 = vstv %s5206_s8  ;;  %v5285_v18 = vsel %vm1312_vm14, 1.0, %v6000_v1  ;;  %s5621_s8 = scalar_lea.vmem %s5989_s6, %s4393_s18  ;;  %s5645_s18 = sld [smem:[#allocation4 + $0x2]] }
  0xfe   : > { %3868 = vmatprep.subr.msk.mxu1 %vm3013_vm10, %v4225_v14  ;;  %3829 = vmatmul.mubr.msk.f32.gmra.mxu0 %vm638_vm1, %v3821_v57  ;;  %v5288_v36 = vsel %vm1656_vm15, 1.0, %v6000_v1  ;;  %v5291_v60 = vsel %vm1313_vm11, 1.0, %v6000_v1  ;;  %v5294_v16 = vsel %vm1657_vm4, 1.0, %v6000_v1  ;;  %vm1658_vm10 = vcmp.eq.s32.totalorder %v4411_v11, %v1651_v26 }
  0xff   : > { %3869 = vmatpush1.msk.msra.mxu1 %vm3012_vm5, %v4225_v14  ;;  %2793 = vmatprep.mubr.f32.mxu0 %v6000_v1  ;;  %v3864_v14 = vld [vmem:[%s4610_s17 + $0xf0] sm:$0xff]  ;;  %s5154_s17 = sld [smem:[#allocation4 + $0x1]]  ;;  %vm1315_vm8 = vcmp.eq.s32.totalorder %v4411_v11, %v1311_v27  ;;  %v5320_v27 = vrot.slane %v4840_v51, %v4439_v28  ;;  %vm1659_vm5 = vcmp.eq.s32.totalorder %v4411_v11, %v5224_v29 }
 0x100   : > { %3870 = vmatmul.mubr.msk.f32.vlgmr.msra.gmra.mxu1 %vm638_vm1, %v3862_v52  ;;  %v5265_v52 = vstv %s5175_s0  ;;  %s5428_s0 = sld [smem:[#allocation4]] }
 0x101   : > { %3131 = vmatprep.mubr.f32.mxu1 %v6000_v1  ;;  %vm2001_vm2 = vcmp.eq.s32.totalorder %v4406_v8, %v5320_v27  ;;  %vm2003_vm6 = vcmp.eq.s32.totalorder %v4411_v11, %v5320_v27 }
 0x102   : > { %3830 = vmatmul.mubr.msk.f32.gmra.mxu0 %vm638_vm1, %v3822_v44 }
 0x103   : > { %2799 = vmatprep.mubr.f32.mxu0 %v6000_v1 }
 0x104   : > { %3871 = vmatmul.mubr.msk.f32.gmra.mxu1 %vm638_vm1, %v3863_v62  ;;  %v5271_v62 = vadd.f32 %v810_v38, %v809_v58 }
 0x105   : > { %3137 = vmatprep.mubr.f32.mxu1 %v6000_v1  ;;  %v5253_v4 = vstv %s5154_s17  ;;  %s425_s17 = sand.u32 1, %s4194_s24  }
 0x106   : > { %3831 = vmatmul.mubr.msk.f32.gmra.mxu0 %vm638_vm1, %v3823_v61  ;;  %v5274_v61 = vstv %s5186_s14  ;;  %s5551_s24 = smul.u32 24, %s425_s17 }
 0x108   : > { %3872 = vmatmul.mubr.msk.f32.gmra.mxu1 %vm638_vm1, %v3864_v14  ;;  %v5277_v14 = vstv %s5198_s16  ;;  %s5594_s21 = scalar_lea.vmem [#allocation7], %s5551_s24 }
 0x109   : > { %3143 = vmatprep.mubr.f32.mxu1 %v6000_v1 }
 0x10c   : > { %3873 = vmatmul.mubr.msk.f32.gmra.mxu1 %vm638_vm1, %v3865_v0  ;;  %vm622_vm1 = vcmp.eq.s32.totalorder %v4406_v8, %v617_v47 }
 0x10d   : > { %v5178_v54 = vsel %vm622_vm1, 1.0, %v6000_v1 }
 0x152   : > { %v5159_v63 = vpop.f32.mrf.mxu0 }
 0x153   : > { %v740_v51 = vmul.f32 %v5178_v54, %v5159_v63 }
 0x154   : > { %v5173_v35 = vpop.f32.mrf.mxu0 }
 0x156   : > { %v5180_v59 = vpop.f32.mrf.mxu1  ;;  %v5195_v7 = vpop.f32.mrf.mxu0 }
 0x158   : > { %v5201_v9 = vpop.f32.mrf.mxu1  ;;  %v5208_v50 = vpop.f32.mrf.mxu0 }
 0x15a   : > { %v5215_v22 = vpop.f32.mrf.mxu1  ;;  %v729_v23 = vpop.f32.mrf.mxu0 }
 0x15b   : > { %v758_v0 = vmul.f32 %v5178_v54, %v729_v23  ;;  %v5300_v23 = vsel %vm1314_vm12, 1.0, %v6000_v1 }
 0x15c   : > { %v5250_v45 = vpop.f32.mrf.mxu1  ;;  %v731_v43 = vpop.f32.mrf.mxu0 }
 0x15d   : > { %v759_v37 = vmul.f32 %v5192_v48, %v731_v43 }
 0x15e   : > { %v1075_v57 = vpop.f32.mrf.mxu1  ;;  %v735_v44 = vpop.f32.mrf.mxu0 }
 0x15f   : > { %v760_v56 = vmul.f32 %v3570_v31, %v735_v44  ;;  %v1104_v58 = vmul.f32 %v5189_v19, %v1075_v57  ;;  %v5307_v44 = vrot.slane %v4862_v42, %v4439_v28  ;;  %v5334_v28 = vrot.slane %v4866_v34, %v4853_v17 }
 0x160   : > { %v1077_v47 = vpop.f32.mrf.mxu1  ;;  %v737_v6 = vpop.f32.mrf.mxu0 }
 0x161   : > { %v762_v15 = vadd.f32 %v760_v56, %v758_v0  ;;  %v761_v25 = vmul.f32 %v5243_v24, %v737_v6  ;;  %v5310_v0 = vsel %vm1658_vm10, 1.0, %v6000_v1  ;;  %v5314_v56 = vrot.slane %v4927_v41, %v4853_v17 }
 0x162   : > { %v1081_v21 = vpop.f32.mrf.mxu1  ;;  %v1105_v57 = vmul.f32 %v5229_v30, %v1077_v47  ;;  %v742_v41 = vmul.f32 %v3570_v31, %v5195_v7  ;;  %vm2000_vm1 = vcmp.eq.s32.totalorder %v4406_v8, %v5307_v44  ;;  %vm2345_vm7 = vcmp.eq.s32.totalorder %v4406_v8, %v5334_v28 }
 0x163   : > { %v1106_v38 = vmul.f32 %v5237_v5, %v1081_v21  ;;  %v763_v26 = vrot.slane %v762_v15, 4  ;;  %v769_v12 = vadd.f32 %v761_v25, %v759_v37  ;;  %v5323_v37 = vsel %vm1315_vm8, 1.0, %v6000_v1 }
 0x164   : > { %v1083_v43 = vpop.f32.mrf.mxu1  ;;  %vm2344_vm9 = vcmp.eq.s32.totalorder %v4406_v8, %v5314_v56  ;;  %vm2002_vm13 = vcmp.eq.s32.totalorder %v4411_v11, %v5307_v44  ;;  %vm2346_vm3 = vcmp.eq.s32.totalorder %v4411_v11, %v5314_v56  ;;  %vm2347_vm0 = vcmp.eq.s32.totalorder %v4411_v11, %v5334_v28 }
 0x165   : > { %v1108_v6 = vadd.f32 %v1106_v38, %v1104_v58  ;;  %v1107_v21 = vmul.f32 %v5248_v46, %v1083_v43  ;;  %v764_v42 = vadd.f32 %v763_v26, %v762_v15  ;;  %v770_v20 = vrot.slane %v769_v12, 4 }
 0x166   : > { %v5341_v38 = vsel %vm1659_vm5, 1.0, %v6000_v1  ;;  %v5349_v26 = vsel %vm2344_vm9, 1.0, %v6000_v1  ;;  %v5352_v43 = vsel %vm2001_vm2, 1.0, %v6000_v1 }
 0x167   : > { %v1109_v25 = vrot.slane %v1108_v6, 4  ;;  %v1115_v53 = vadd.f32 %v1107_v21, %v1105_v57  ;;  %v765_v47 = vrot.slane %v764_v42, 2  ;;  %v771_v58 = vadd.f32 %v770_v20, %v769_v12  ;;  %6079 = vst [vmem:[#allocation15_spill] sm:$0xff] %v5349_v26  ;;  %6080 = vst [vmem:[#allocation16_spill] sm:$0xff] %v5352_v43 }
 0x168   : > { %v5344_v12 = vsel %vm2000_vm1, 1.0, %v6000_v1  ;;  %v5346_v20 = vadd.f32 %v742_v41, %v740_v51  ;;  %v1088_v57 = vmul.f32 %v5237_v5, %v5215_v22  ;;  %v741_v41 = vmul.f32 %v5192_v48, %v5173_v35 }
 0x169   : > { %v1110_v29 = vadd.f32 %v1109_v25, %v1108_v6  ;;  %v1116_v15 = vrot.slane %v1115_v53, 4  ;;  %v766_v7 = vadd.f32 %v765_v47, %v764_v42  ;;  %v772_v31 = vrot.slane %v771_v58, 2 }
 0x16a   : > { %v743_v6 = vmul.f32 %v5243_v24, %v5208_v50  ;;  %v1087_v50 = vmul.f32 %v5229_v30, %v5201_v9  ;;  %v745_v22 = vrot.slane %v5346_v20, 4 }
 0x16b   : > { %v1111_v17 = vrot.slane %v1110_v29, 2  ;;  %v1117_v34 = vadd.f32 %v1116_v15, %v1115_v53  ;;  %v767_v63 = vrot.slane %v766_v7, 1  ;;  %v773_v54 = vadd.f32 %v772_v31, %v771_v58 }
 0x16c   : > { %v1086_v53 = vmul.f32 %v5189_v19, %v5180_v59  ;;  %v751_v15 = vadd.f32 %v743_v6, %v741_v41  ;;  %v1089_v6 = vmul.f32 %v5248_v46, %v5250_v45 }
 0x16d   : > { %v1112_v21 = vadd.f32 %v1111_v17, %v1110_v29  ;;  %v1118_v42 = vrot.slane %v1117_v34, 2  ;;  %v768_v25 = vadd.f32 %v767_v63, %v766_v7  ;;  %v774_v47 = vrot.slane %v773_v54, 1 }
 0x16e   : > { %v5366_v58 = vpop.f32.mrf.mxu0  ;;  %v1090_v29 = vadd.f32 %v1088_v57, %v1086_v53 }
 0x16f   : > { %v1113_v5 = vrot.slane %v1112_v21, 1  ;;  %v1119_v24 = vadd.f32 %v1118_v42, %v1117_v34  ;;  %v786_v51 = vmul.f32 %v5253_v4, %v768_v25  ;;  %v800_v59 = vmul.f32 %v5261_v49, %v768_v25 }
 0x170   : > { %v814_v35 = vmul.f32 %v5265_v52, %v768_v25  ;;  %v775_v19 = vadd.f32 %v774_v47, %v773_v54  ;;  %v5376_v48 = vpop.f32.mrf.mxu0 }
 0x171   : > { %v1114_v7 = vadd.f32 %v1113_v5, %v1112_v21  ;;  %v1120_v31 = vrot.slane %v1119_v24, 1  ;;  %v787_v17 = vadd.f32 %v786_v51, %v5256_v32  ;;  %v801_v9 = vadd.f32 %v800_v59, %v5258_v40 }
 0x172   : > { %v815_v30 = vadd.f32 %v814_v35, %v5271_v62  ;;  %v790_v34 = vmul.f32 %v5274_v61, %v775_v19  ;;  %v5382_v63 = vpop.f32.mrf.mxu0  ;;  %v804_v57 = vmul.f32 %v5277_v14, %v775_v19  ;;  %v818_v53 = vmul.f32 %v5282_v3, %v775_v19 }
 0x173   : > { %v1132_v42 = vmul.f32 %v1114_v7, %v5253_v4  ;;  %v1146_v54 = vmul.f32 %v1114_v7, %v5261_v49  ;;  %v1160_v25 = vmul.f32 %v1114_v7, %v5265_v52  ;;  %v1121_v41 = vadd.f32 %v1120_v31, %v1119_v24 }
 0x174   : > { %v791_v21 = vadd.f32 %v790_v34, %v787_v17  ;;  %v5391_v47 = vpop.f32.mrf.mxu0  ;;  %v752_v5 = vrot.slane %v751_v15, 4  ;;  %v805_v35 = vadd.f32 %v804_v57, %v801_v9  ;;  %v1091_v24 = vrot.slane %v1090_v29, 4 }
 0x175   : > { %v1133_v51 = vadd.f32 %v1132_v42, %v5256_v32  ;;  %v1147_v59 = vadd.f32 %v1146_v54, %v5258_v40  ;;  %v1161_v1 = vadd.f32 %v1160_v25, %v5271_v62  ;;  %v1136_v7 = vmul.f32 %v1121_v41, %v5274_v61 }
 0x176   : > { %v1150_v43 = vmul.f32 %v1121_v41, %v5277_v14  ;;  %v1164_v46 = vmul.f32 %v1121_v41, %v5282_v3  ;;  %v5399_v45 = vpop.f32.mrf.mxu1  ;;  %v1419_v19 = vpop.f32.mrf.mxu0  ;;  %v819_v31 = vadd.f32 %v818_v53, %v815_v30  ;;  %v820_v17 = vmax.f32 %v791_v21, %v805_v35 }
 0x177   : > { %v6081_v34 = vmov 0.0   ;;  %v1097_v9 = vadd.f32 %v1089_v6, %v1087_v50  ;;  %v1137_v54 = vadd.f32 %v1136_v7, %v1133_v51  ;;  %v753_v50 = vadd.f32 %v752_v5, %v751_v15 }
 0x178   : > { %v5405_v42 = vsel %vm2345_vm7, 1.0, %v6081_v34  ;;  %v1151_v25 = vadd.f32 %v1150_v43, %v1147_v59  ;;  %v5407_v57 = vpop.f32.mrf.mxu1  ;;  %v5413_v41 = vsel %vm2002_vm13, 1.0, %v6081_v34  ;;  %v821_v26 = vmax.f32 %v820_v17, %v819_v31  ;;  %v1421_v30 = vpop.f32.mrf.mxu0 }
 0x179   : > { %6082 = vst [vmem:[#allocation17_spill] sm:$0xff] %v5405_v42  ;;  %6083 = vst [vmem:[#allocation18_spill] sm:$0xff] %v5413_v41  ;;  %v5419_v53 = vsel %vm2346_vm3, 1.0, %v6081_v34  ;;  %v746_v43 = vadd.f32 %v745_v22, %v5346_v20  ;;  %v1165_v44 = vadd.f32 %v1164_v46, %v1161_v1  ;;  %v1092_v59 = vadd.f32 %v1091_v24, %v1090_v29 }
 0x17a   : > { %6084 = vst [vmem:[#allocation19_spill] sm:$0xff] %v5419_v53  ;;  %v1166_v6 = vmax.f32 %v1137_v54, %v1151_v25  ;;  %v5426_v51 = vpop.f32.mrf.mxu1  ;;  %v822_v7 = vsub.f32 %v791_v21, %v821_v26  ;;  %v825_v17 = vsub.f32 %v805_v35, %v821_v26  ;;  %v828_v42 = vsub.f32 %v819_v31, %v821_v26  ;;  %v1425_v15 = vpop.f32.mrf.mxu0 }
 0x17b   : > { %v1098_v56 = vrot.slane %v1097_v9, 4  ;;  %v5433_v27 = vsel %vm2003_vm6, 1.0, %v6081_v34  ;;  %v5436_v28 = vsel %vm2347_vm0, 1.0, %v6081_v34  ;;  %v5440_v35 = vrot.slane %v5057_v10, %v4972_v13 }
 0x17c   : > { %v1167_v53 = vmax.f32 %v1166_v6, %v1165_v44  ;;  %v5430_v41 = vpop.f32.mrf.mxu1  ;;  %6085 = vst [vmem:[#allocation20_spill] sm:$0xff] %v5436_v28  ;;  %v823_v1 = vmul.f32 1.442695, %v822_v7  ;;  %v826_v20 = vmul.f32 1.442695, %v825_v17  ;;  %v747_v46 = vrot.slane %v746_v43, 2 }
 0x17d   : > { %v829_v22 = vmul.f32 1.442695, %v828_v42  ;;  %6086 = vst [vmem:[#allocation21_spill] sm:$0xff] %v5440_v35  ;;  %v1093_v24 = vrot.slane %v1092_v59, 2  ;;  %v754_v31 = vrot.slane %v753_v50, 2  ;;  %v1450_v42 = vmul.f32 %v5300_v23, %v1425_v15 }
 0x17e   : > { %v1168_v29 = vsub.f32 %v1137_v54, %v1167_v53  ;;  %v1171_v21 = vsub.f32 %v1151_v25, %v1167_v53  ;;  %v1174_v5 = vsub.f32 %v1165_v44, %v1167_v53  ;;  %v1763_v26 = vpop.f32.mrf.mxu1  ;;  %4046 = vpow2.f32 %v823_v1  ;;  %v1427_v1 = vpop.f32.mrf.mxu0 }
 0x17f   : > { %4048 = vpow2.f32 %v826_v20  ;;  %v1099_v54 = vadd.f32 %v1098_v56, %v1097_v9  ;;  %v5447_v10 = vrot.slane %v5087_v33, %v5051_v2  ;;  %v1448_v53 = vmul.f32 %v5285_v18, %v1419_v19 }
 0x180   : > { %v1169_v6 = vmul.f32 1.442695, %v1168_v29  ;;  %v1172_v7 = vmul.f32 1.442695, %v1171_v21  ;;  %v1765_v17 = vpop.f32.mrf.mxu1  ;;  %4050 = vpow2.f32 %v829_v22  ;;  %v1175_v25 = vmul.f32 1.442695, %v1174_v5 }
 0x181   : > { %v5452_v20 = vrot.slane %v5041_v39, %v4972_v13  ;;  %v5456_v29 = vrot.slane %v5060_v55, %v5051_v2  ;;  %v748_v9 = vadd.f32 %v747_v46, %v746_v43  ;;  %v755_v56 = vadd.f32 %v754_v31, %v753_v50  ;;  %v6089_v31 = vld [vmem:[#allocation14_spill] sm:$0xff] }
 0x182   : > { %4052 = vpow2.f32 %v1169_v6  ;;  %v1769_v44 = vpop.f32.mrf.mxu1  ;;  %v2502_v33 = vstv %s5428_s0  ;;  %v1094_v22 = vadd.f32 %v1093_v24, %v1092_v59  ;;  %v1792_v19 = vmul.f32 %v5288_v36, %v1763_v26  ;;  %s5629_s0 = sld [smem:[#allocation4 + $0x101]] }
 0x183   : > { %6087 = vst [vmem:[#allocation22_spill] sm:$0xff] %v5452_v20  ;;  %6088 = vst [vmem:[#allocation23_spill] sm:$0xff] %v5456_v29  ;;  %4054 = vpow2.f32 %v1172_v7  ;;  %v1452_v15 = vadd.f32 %v1450_v42, %v1448_v53  ;;  %v1794_v21 = vmul.f32 %v5310_v0, %v1769_v44  ;;  %v1100_v13 = vrot.slane %v1099_v54, 2 }
 0x184   : > { %v1771_v5 = vpop.f32.mrf.mxu1  ;;  %4056 = vpow2.f32 %v1175_v25  ;;  %v1449_v39 = vmul.f32 %v5291_v60, %v1421_v30  ;;  %v1451_v2 = vmul.f32 %v5323_v37, %v1427_v1  ;;  %v1793_v55 = vmul.f32 %v5294_v16, %v1765_v17 }
 0x185   : > { %v1453_v43 = vrot.slane %v1452_v15, 4  ;;  %v1796_v50 = vadd.f32 %v1794_v21, %v1792_v19  ;;  %v1795_v46 = vmul.f32 %v5341_v38, %v1771_v5  ;;  %v749_v59 = vrot.slane %v748_v9, 1 }
 0x186   : > { %v1459_v24 = vadd.f32 %v1451_v2, %v1449_v39  ;;  %v5468_v26 = vmul.f32 %v2502_v33, %v6089_v31  ;;  %v2516_v6 = vstv %s5442_s15  ;;  %v1432_v7 = vmul.f32 %v5300_v23, %v5382_v63  ;;  %s5667_s15 = sld [smem:[#allocation4 + $0x82]] }
 0x187   : > { %v1454_v42 = vadd.f32 %v1453_v43, %v1452_v15  ;;  %v1797_v30 = vrot.slane %v1796_v50, 4  ;;  %v1803_v25 = vadd.f32 %v1795_v46, %v1793_v55  ;;  %v1095_v53 = vrot.slane %v1094_v22, 1 }
 0x188   : > { %v756_v44 = vrot.slane %v755_v56, 1  ;;  %v5473_v17 = vadd.f32 %v1100_v13, %v1099_v54  ;;  %v1460_v1 = vrot.slane %v1459_v24, 4  ;;  %v1430_v19 = vmul.f32 %v5285_v18, %v5366_v58 }
 0x189   : > { %v1455_v21 = vrot.slane %v1454_v42, 2  ;;  %v1798_v5 = vadd.f32 %v1797_v30, %v1796_v50  ;;  %v1804_v33 = vrot.slane %v1803_v25, 4  ;;  %v5477_v39 = vadd.f32 %v749_v59, %v748_v9 }
 0x18a   : > { %v1461_v2 = vadd.f32 %v1460_v1, %v1459_v24  ;;  %v5481_v23 = vmul.f32 %v2516_v6, %v6089_v31  ;;  %v5485_v15 = vadd.f32 %v1432_v7, %v1430_v19  ;;  %v5489_v18 = vadd.f32 %v1095_v53, %v1094_v22 }
 0x18b   : > { %v5483_v63 = vpop.eup %4046  ;;  %v1456_v54 = vadd.f32 %v1455_v21, %v1454_v42  ;;  %v1799_v13 = vrot.slane %v1798_v5, 2  ;;  %v1805_v55 = vadd.f32 %v1804_v33, %v1803_v25  ;;  %v5491_v58 = vadd.f32 %v756_v44, %v755_v56 }
 0x18c   : > { %v5487_v43 = vpop.eup %4048  ;;  %v1102_v9 = vrot.slane %v5473_v17, 1  ;;  %v1462_v50 = vrot.slane %v1461_v2, 2  ;;  %v1431_v24 = vmul.f32 %v5291_v60, %v5376_v48  ;;  %v1774_v22 = vmul.f32 %v5288_v36, %v5399_v45 }
 0x18d   : > { %v5494_v46 = vpop.eup %4050  ;;  %v831_v59 = vadd.f32 %v5487_v43, %v5483_v63  ;;  %v1457_v6 = vrot.slane %v1456_v54, 1  ;;  %v1800_v7 = vadd.f32 %v1799_v13, %v1798_v5  ;;  %v1433_v56 = vmul.f32 %v5323_v37, %v5391_v47 }
 0x18e   : > { %v1463_v30 = vadd.f32 %v1462_v50, %v1461_v2  ;;  %v1806_v25 = vrot.slane %v1805_v55, 2  ;;  %v1435_v1 = vrot.slane %v5485_v15, 4  ;;  %v1776_v21 = vmul.f32 %v5310_v0, %v5426_v51 }
 0x18f   : > { %v5500_v42 = vpop.eup %4052  ;;  %v832_v44 = vadd.f32 %v5494_v46, %v831_v59  ;;  %v1458_v19 = vadd.f32 %v1457_v6, %v1456_v54  ;;  %v1801_v60 = vrot.slane %v1800_v7, 1  ;;  %v1777_v59 = vmul.f32 %v5341_v38, %v5430_v41 }
 0x190   : > { %v5506_v53 = vpop.eup %4054  ;;  %v1464_v36 = vrot.slane %v1463_v30, 1  ;;  %v1807_v45 = vadd.f32 %v1806_v25, %v1805_v55  ;;  %v1103_v29 = vadd.f32 %v1102_v9, %v5473_v17  ;;  %vm2688_vm14 = vcmp.eq.s32.totalorder %v4406_v8, %v5440_v35 }
 0x191   : > { %v1177_v48 = vadd.f32 %v5506_v53, %v5500_v42  ;;  %v5514_v5 = vpop.eup %4056  ;;  %4058 = vrcp.f32 %v832_v44  ;;  %v1476_v37 = vmul.f32 %v1458_v19, %v5253_v4  ;;  %v1490_v47 = vmul.f32 %v1458_v19, %v5261_v49 }
 0x192   : > { %v1504_v33 = vmul.f32 %v1458_v19, %v5265_v52  ;;  %v1802_v54 = vadd.f32 %v1801_v60, %v1800_v7  ;;  %v1465_v13 = vadd.f32 %v1464_v36, %v1463_v30  ;;  %v1808_v50 = vrot.slane %v1807_v45, 1 }
 0x193   : > { %v1178_v2 = vadd.f32 %v5514_v5, %v1177_v48  ;;  %v1477_v0 = vadd.f32 %v1476_v37, %v5256_v32  ;;  %v1491_v51 = vadd.f32 %v1490_v47, %v5258_v40  ;;  %v1778_v60 = vadd.f32 %v1776_v21, %v1774_v22 }
 0x194   : > { %v1505_v55 = vadd.f32 %v1504_v33, %v5271_v62  ;;  %v1820_v6 = vmul.f32 %v1802_v54, %v5253_v4  ;;  %v1834_v25 = vmul.f32 %v1802_v54, %v5261_v49  ;;  %v1848_v7 = vmul.f32 %v1802_v54, %v5265_v52  ;;  %v5530_v30 = vpop.f32.mrf.mxu0 }
 0x195   : > { %4060 = vrcp.f32 %v1178_v2  ;;  %v1480_v38 = vmul.f32 %v1465_v13, %v5274_v61  ;;  %v1494_v41 = vmul.f32 %v1465_v13, %v5277_v14  ;;  %v1508_v44 = vmul.f32 %v1465_v13, %v5282_v3 }
 0x196   : > { %v1809_v19 = vadd.f32 %v1808_v50, %v1807_v45  ;;  %v1441_v48 = vadd.f32 %v1433_v56, %v1431_v24  ;;  %v1821_v36 = vadd.f32 %v1820_v6, %v5256_v32  ;;  %v1835_v37 = vadd.f32 %v1834_v25, %v5258_v40  ;;  %v5537_v47 = vpop.f32.mrf.mxu0  ;;  %v6090_v25 = vld [vmem:[#allocation13_spill] sm:$0xff] }
 0x197   : > { %v1775_v33 = vmul.f32 %v5294_v16, %v5407_v57  ;;  %v1481_v2 = vadd.f32 %v1480_v38, %v1477_v0  ;;  %v1495_v54 = vadd.f32 %v1494_v41, %v1491_v51  ;;  %v1849_v45 = vadd.f32 %v1848_v7, %v5271_v62  ;;  %v6091_v38 = vld [vmem:[#allocation12_spill] sm:$0xff] }
 0x198   : > { %v1824_v11 = vmul.f32 %v1809_v19, %v5274_v61  ;;  %v1838_v24 = vmul.f32 %v1809_v19, %v5277_v14  ;;  %v1852_v22 = vmul.f32 %v1809_v19, %v5282_v3  ;;  %v5547_v56 = vpop.f32.mrf.mxu0  ;;  %v1509_v13 = vadd.f32 %v1508_v44, %v1505_v55 }
 0x199   : > { %v1785_v21 = vadd.f32 %v1777_v59, %v1775_v33  ;;  %v1510_v50 = vmax.f32 %v1481_v2, %v1495_v54  ;;  %v5554_v57 = vadd.f32 %v1435_v1, %v5485_v15  ;;  %v1779_v17 = vrot.slane %v1778_v60, 4 }
 0x19a   : > { %v1825_v6 = vadd.f32 %v1824_v11, %v1821_v36  ;;  %v5549_v16 = vpop.f32.mrf.mxu1  ;;  %v1442_v9 = vrot.slane %v1441_v48, 4  ;;  %v1839_v0 = vadd.f32 %v1838_v24, %v1835_v37  ;;  %v5556_v51 = vpop.f32.mrf.mxu0  ;;  %v776_v7 = vadd.f32 %v5477_v39, %v6090_v25 }
 0x19b   : > { %v777_v59 = vadd.f32 %v5491_v58, %v6091_v38  ;;  %v1511_v55 = vmax.f32 %v1510_v50, %v1509_v13  ;;  %v1122_v44 = vadd.f32 %v5489_v18, %v6090_v25  ;;  %v5568_v15 = vadd.f32 %v1103_v29, %v6091_v38 }
 0x19c   : > { %v5562_v11 = vpop.f32.mrf.mxu1  ;;  %v5570_v1 = vadd.f32 %v1852_v22, %v1849_v45  ;;  %v1854_v19 = vmax.f32 %v1825_v6, %v1839_v0  ;;  %v1786_v39 = vrot.slane %v1785_v21, 4  ;;  %v5576_v24 = vpop.f32.mrf.mxu0  ;;  %v5579_v29 = vadd.f32 %v1779_v17, %v1778_v60 }
 0x19d   : > { %v1512_v36 = vsub.f32 %v1481_v2, %v1511_v55  ;;  %v1515_v37 = vsub.f32 %v1495_v54, %v1511_v55  ;;  %v1518_v58 = vsub.f32 %v1509_v13, %v1511_v55  ;;  %v5581_v45 = vadd.f32 %v1442_v9, %v1441_v48 }
 0x19e   : > { %v5574_v33 = vpop.f32.mrf.mxu1  ;;  %v4059_v50 = vpop.eup %4058  ;;  %v1855_v22 = vmax.f32 %v1854_v19, %v5570_v1  ;;  %v1787_v9 = vadd.f32 %v1786_v39, %v1785_v21 }
 0x19f   : > { %6092 = vst [vmem:[#allocation14_spill] sm:$0xff] %v5574_v33  ;;  %v835_v41 = vmul.f32 %v4059_v50, %v5483_v63  ;;  %v838_v2 = vmul.f32 %v4059_v50, %v5487_v43  ;;  %v843_v54 = vmul.f32 %v4059_v50, %v5494_v46  ;;  %v1513_v13 = vmul.f32 1.442695, %v1512_v36  ;;  %v5598_v63 = vld [vmem:[%s4401_s4] sm:$0xff]  ;;  %s5615_s4 = sld [smem:[#allocation6 + $0x2]] }
 0x1a0   : > { %v5587_v55 = vpop.f32.mrf.mxu1  ;;  %v1516_v18 = vmul.f32 1.442695, %v1515_v37  ;;  %v1519_v33 = vmul.f32 1.442695, %v1518_v58  ;;  %v1856_v60 = vsub.f32 %v1825_v6, %v1855_v22  ;;  %v1859_v17 = vsub.f32 %v1839_v0, %v1855_v22  ;;  %6094 = vst [vmem:[#allocation12_spill] sm:$0xff] %v5598_v63  ;;  %v2109_v0 = vpop.f32.mrf.mxu0 }
 0x1a1   : > { %6093 = vst [vmem:[#allocation13_spill] sm:$0xff] %v5587_v55  ;;  %836 = vst [vmem:[%s5594_s21] sm:$0x1] %v835_v41  ;;  %v837_v43 = vmul.f32 %v5598_v63, %v835_v41  ;;  %v841_v46 = vmul.f32 %v838_v2, %v776_v7  ;;  %4062 = vpow2.f32 %v1513_v13  ;;  %v846_v58 = vmul.f32 %v843_v54, %v777_v59 }
 0x1a2   : > { %v4061_v48 = vpop.eup %4060  ;;  %3590 = vst [vmem:[%s5594_s21 + $0x8] sm:$0x1] %v838_v2  ;;  %3591 = vst [vmem:[%s5594_s21 + $0x10] sm:$0x1] %v843_v54  ;;  %v2451_v6 = vpop.f32.mrf.mxu1  ;;  %4064 = vpow2.f32 %v1516_v18  ;;  %v1857_v7 = vmul.f32 1.442695, %v1856_v60  ;;  %v6095_v60 = vstv %s5458_s19 }
 0x1a3   : > { %v1181_v19 = vmul.f32 %v4061_v48, %v5500_v42  ;;  %v1184_v36 = vmul.f32 %v4061_v48, %v5506_v53  ;;  %v1188_v37 = vmul.f32 %v4061_v48, %v5514_v5  ;;  %v842_v41 = vadd.f32 %v841_v46, %v837_v43  ;;  %v2113_v59 = vpop.f32.mrf.mxu0  ;;  %s5671_s19 = sld [smem:[#allocation4 + $0x102]] }
 0x1a4   : > { %v1860_v50 = vmul.f32 1.442695, %v1859_v17  ;;  %v2453_v21 = vpop.f32.mrf.mxu1  ;;  %4066 = vpow2.f32 %v1519_v33  ;;  %v1862_v42 = vsub.f32 %v5570_v1, %v1855_v22  ;;  %v1781_v5 = vrot.slane %v5579_v29, 2 }
 0x1a5   : > { %1182 = vst [vmem:[%s5594_s21] sm:$0x2] %v1181_v19  ;;  %v1183_v39 = vmul.f32 %v5598_v63, %v1181_v19  ;;  %3632 = vst [vmem:[%s5594_s21 + $0x8] sm:$0x2] %v1184_v36  ;;  %v1186_v2 = vmul.f32 %v1184_v36, %v1122_v44  ;;  %v847_v53 = vadd.f32 %v846_v58, %v842_v41  ;;  %v1444_v18 = vrot.slane %v5581_v45, 2 }
 0x1a6   : > { %3633 = vst [vmem:[%s5594_s21 + $0x10] sm:$0x2] %v1188_v37  ;;  %4068 = vpow2.f32 %v1857_v7  ;;  %v2457_v54 = vpop.f32.mrf.mxu1  ;;  %v1190_v1 = vmul.f32 %v1188_v37, %v5568_v15  ;;  %v1863_v33 = vmul.f32 1.442695, %v1862_v42  ;;  %v1788_v13 = vrot.slane %v1787_v9, 2  ;;  %v2115_v7 = vpop.f32.mrf.mxu0  ;;  %v6099_v42 = vld [vmem:[#allocation18_spill] sm:$0xff] }
 0x1a7   : > { %v1187_v44 = vadd.f32 %v1186_v2, %v1183_v39  ;;  %4070 = vpow2.f32 %v1860_v50  ;;  %v848_v22 = vmax.f32 %v847_v53, 0.0  ;;  %v5627_v17 = vadd.f32 %v6095_v60, %v5468_v26  ;;  %v6103_v60 = vld [vmem:[#allocation17_spill] sm:$0xff] }
 0x1a8   : > { %v5635_v48 = vsel %vm2688_vm14, 1.0, %v6081_v34  ;;  %4072 = vpow2.f32 %v1863_v33  ;;  %v5638_v15 = vstv %s5589_s23  ;;  %v6097_v46 = vstv %s5525_s20  ;;  %v2459_v50 = vpop.f32.mrf.mxu1  ;;  %s3955_s20 = smul.u32 (%p6122_p8), 6, %s4206_s27 }
 0x1a9   : > { %6096 = vst [vmem:[#allocation24_spill] sm:$0xff] %v5635_v48  ;;  %v1191_v43 = vadd.f32 %v1190_v1, %v1187_v44  ;;  %v5643_v19 = vadd.f32 %v6097_v46, %v5481_v23  ;;  %849 = vst [vmem:[%s5621_s8] sm:$0x1] %v848_v22  ;;  %v6098_v26 = vrot.slane %v5554_v57, 2  ;;  %v1445_v37 = vadd.f32 %v1444_v18, %v5581_v45  ;;  %v6100_v1 = vld [vmem:[#allocation15_spill] sm:$0xff] }
 0x1aa   : > { %v5653_v41 = vstv %s5591_s11  ;;  %v2530_v58 = vstv %s5603_s12  ;;  %v1782_v2 = vadd.f32 %v1781_v5, %v5579_v29  ;;  %v2136_v23 = vmul.f32 %v5344_v12, %v5576_v24  ;;  %v6102_v45 = vld [vmem:[#allocation19_spill] sm:$0xff]  ;;  %s3283_s17 = sadd.s32 (%p6122_p8), %s4202_s26, %s3955_s20 }
 0x1ab   : > { %v1438_v36 = vadd.f32 %v6098_v26, %v5554_v57  ;;  %v1192_v39 = vmax.f32 %v1191_v43, 0.0  ;;  %v2138_v53 = vmul.f32 %v6099_v42, %v2113_v59  ;;  %v1789_v44 = vadd.f32 %v1788_v13, %v1787_v9  ;;  %v6101_v57 = vld [vmem:[#allocation16_spill] sm:$0xff]  ;;  %s3886_s24 = sshll.u32 (%p6122_p8), %s3283_s17, 3 }
 0x1ac   : > { %v2480_v33 = vmul.f32 %v6100_v1, %v2451_v6  ;;  %v2137_v22 = vmul.f32 %v6101_v57, %v2109_v0  ;;  %v2482_v18 = vmul.f32 %v6102_v45, %v2457_v54  ;;  %v2481_v46 = vmul.f32 %v6103_v60, %v2453_v21  ;;  %s3285_s12 = scalar_lea.vmem (%p6122_p8), %s5990_s7, %s3886_s24 }
 0x1ad   : > { %1193 = vst [vmem:[%s5621_s8] sm:$0x2] %v1192_v39  ;;  %v2140_v26 = vadd.f32 %v2138_v53, %v2136_v23  ;;  %v2139_v43 = vmul.f32 %v5433_v27, %v2115_v7  ;;  %v2483_v29 = vmul.f32 %v5436_v28, %v2459_v50  ;;  %v1439_v24 = vrot.slane %v1438_v36, 1 }
 0x1ae   : > { %v2484_v5 = vadd.f32 %v2482_v18, %v2480_v33  ;;  %v2531_v9 = vmul.f32 %v2530_v58, %v6089_v31  ;;  %v2532_v6 = vstv %s5615_s4  ;;  %v5673_v0 = vpop.eup %4062  ;;  %v1446_v59 = vrot.slane %v1445_v37, 1 }
 0x1af   : > { %v2141_v21 = vrot.slane %v2140_v26, 4  ;;  %v2147_v54 = vadd.f32 %v2139_v43, %v2137_v22  ;;  %v2491_v13 = vadd.f32 %v2483_v29, %v2481_v46  ;;  %v5675_v7 = vpop.eup %4064  ;;  %v1783_v50 = vrot.slane %v1782_v2, 1 }
 0x1b0   : > { %v1790_v39 = vrot.slane %v1789_v44, 1  ;;  %v2485_v23 = vrot.slane %v2484_v5, 4  ;;  %v5678_v53 = vstv %s5629_s0  ;;  %v1521_v31 = vadd.f32 %v5675_v7, %v5673_v0 }
 0x1b1   : > { %v2142_v58 = vadd.f32 %v2141_v21, %v2140_v26  ;;  %v2148_v33 = vrot.slane %v2147_v54, 4  ;;  %v5683_v18 = vstv %s5645_s18  ;;  %v5685_v48 = vpop.eup %4066  ;;  %v1440_v34 = vadd.f32 %v1439_v24, %v1438_v36 }
 0x1b2   : > { %v2486_v28 = vadd.f32 %v2485_v23, %v2484_v5  ;;  %v5687_v22 = vadd.f32 %v2532_v6, %v2531_v9  ;;  %v2492_v46 = vrot.slane %v2491_v13, 4  ;;  %v1447_v29 = vadd.f32 %v1446_v59, %v1445_v37 }
 0x1b3   : > { %v5689_v43 = vpop.eup %4068  ;;  %v1522_v55 = vadd.f32 %v5685_v48, %v1521_v31  ;;  %v2143_v63 = vrot.slane %v2142_v58, 2  ;;  %v2149_v35 = vadd.f32 %v2148_v33, %v2147_v54  ;;  %v1784_v21 = vadd.f32 %v1783_v50, %v1782_v2 }
 0x1b4   : > { %v5692_v26 = vpop.eup %4070  ;;  %v1791_v45 = vadd.f32 %v1790_v39, %v1789_v44  ;;  %v2487_v20 = vrot.slane %v2486_v28, 2  ;;  %v2493_v8 = vadd.f32 %v2492_v46, %v2491_v13  ;;  %v5699_v59 = vstv %s5667_s15 }
 0x1b5   : > { %4074 = vrcp.f32 %v1522_v55  ;;  %v1865_v36 = vadd.f32 %v5692_v26, %v5689_v43  ;;  %v2144_v24 = vadd.f32 %v2143_v63, %v2142_v58  ;;  %v2150_v5 = vrot.slane %v2149_v35, 2  ;;  %v5696_v9 = vpop.eup %4072 }
 0x1b6   : > { %v2488_v37 = vadd.f32 %v2487_v20, %v2486_v28  ;;  %v2494_v6 = vrot.slane %v2493_v8, 2  ;;  %v5702_v23 = vstv %s5671_s19  ;;  %v5705_v54 = vadd.f32 %v1440_v34, %v6090_v25 }
 0x1b7   : > { %v1866_v2 = vadd.f32 %v5696_v9, %v1865_v36  ;;  %v2145_v44 = vrot.slane %v2144_v24, 1  ;;  %v2151_v55 = vadd.f32 %v2150_v5, %v2149_v35  ;;  %v5709_v13 = vadd.f32 %v1784_v21, %v6090_v25 }
 0x1b8   : > { %v5712_v63 = vadd.f32 %v1447_v29, %v6091_v38  ;;  %v2489_v50 = vrot.slane %v2488_v37, 1  ;;  %v2495_v28 = vadd.f32 %v2494_v6, %v2493_v8  ;;  %v5715_v20 = vadd.f32 %v1791_v45, %v6091_v38 }
 0x1b9   : > { %4076 = vrcp.f32 %v1866_v2  ;;  %v2146_v39 = vadd.f32 %v2145_v44, %v2144_v24  ;;  %v2152_v31 = vrot.slane %v2151_v55, 1  ;;  %v2118_v34 = vmul.f32 %v5344_v12, %v5530_v30 }
 0x1ba   : > { %v2120_v35 = vmul.f32 %v6099_v42, %v5547_v56  ;;  %v2490_v58 = vadd.f32 %v2489_v50, %v2488_v37  ;;  %v2496_v33 = vrot.slane %v2495_v28, 1  ;;  %v5721_v46 = vpop.f32.mrf.mxu0 }
 0x1bb   : > { %v2164_v29 = vmul.f32 %v2146_v39, %v5253_v4  ;;  %v2178_v8 = vmul.f32 %v2146_v39, %v5261_v49  ;;  %v2192_v45 = vmul.f32 %v2146_v39, %v5265_v52  ;;  %v2153_v21 = vadd.f32 %v2152_v31, %v2151_v55 }
 0x1bc   : > { %v2508_v36 = vmul.f32 %v5638_v15, %v2490_v58  ;;  %v2522_v24 = vmul.f32 %v5653_v41, %v2490_v58  ;;  %v2536_v12 = vmul.f32 %v5678_v53, %v2490_v58  ;;  %v2497_v30 = vadd.f32 %v2496_v33, %v2495_v28  ;;  %v5729_v5 = vpop.f32.mrf.mxu0 }
 0x1bd   : > { %v2165_v56 = vadd.f32 %v2164_v29, %v5256_v32  ;;  %v2179_v42 = vadd.f32 %v2178_v8, %v5258_v40  ;;  %v2193_v4 = vadd.f32 %v2192_v45, %v5271_v62  ;;  %v2168_v49 = vmul.f32 %v2153_v21, %v5274_v61 }
 0x1be   : > { %v2509_v52 = vadd.f32 %v2508_v36, %v5627_v17  ;;  %v2523_v37 = vadd.f32 %v2522_v24, %v5643_v19  ;;  %v2537_v6 = vadd.f32 %v2536_v12, %v5687_v22  ;;  %v2182_v2 = vmul.f32 %v2153_v21, %v5277_v14  ;;  %v5739_v44 = vpop.f32.mrf.mxu0  ;;  %v6107_v36 = vld [vmem:[#allocation22_spill] sm:$0xff] }
 0x1bf   : > { %v2169_v55 = vadd.f32 %v2168_v49, %v2165_v56  ;;  %v2196_v50 = vmul.f32 %v2153_v21, %v5282_v3  ;;  %v2512_v32 = vmul.f32 %v5683_v18, %v2497_v30  ;;  %v2526_v40 = vmul.f32 %v5699_v59, %v2497_v30  ;;  %v6109_v24 = vld [vmem:[#allocation14_spill] sm:$0xff]  ;;  %v6113_v49 = vld [vmem:[#allocation12_spill] sm:$0xff] }
 0x1c0   : > { %v5744_v62 = vpop.f32.mrf.mxu1  ;;  %v5746_v61 = vadd.f32 %v2120_v35, %v2118_v34  ;;  %v2121_v28 = vmul.f32 %v5433_v27, %v5556_v51  ;;  %v2183_v39 = vadd.f32 %v2182_v2, %v2179_v42  ;;  %v2540_v31 = vmul.f32 %v5702_v23, %v2497_v30  ;;  %v5751_v14 = vpop.f32.mrf.mxu0  ;;  %v6111_v42 = vld [vmem:[#allocation21_spill] sm:$0xff]  ;;  %v6115_v2 = vld [vmem:[#allocation20_spill] sm:$0xff] }
 0x1c1   : > { %6104 = vst [vmem:[#allocation18_spill] sm:$0xff] %v5744_v62  ;;  %v2462_v58 = vmul.f32 %v6100_v1, %v5549_v16  ;;  %v2119_v3 = vmul.f32 %v6101_v57, %v5537_v47  ;;  %v2513_v33 = vadd.f32 %v2512_v32, %v2509_v52  ;;  %v5757_v29 = vadd.f32 %v2526_v40, %v2523_v37  ;;  %v6106_v57 = vld [vmem:[#allocation10_spill] sm:$0xff] }
 0x1c2   : > { %v5759_v8 = vpop.f32.mrf.mxu1  ;;  %v4075_v34 = vpop.eup %4074  ;;  %v2463_v27 = vmul.f32 %v6103_v60, %v5562_v11  ;;  %v2197_v51 = vadd.f32 %v2196_v50, %v2193_v4  ;;  %v2198_v35 = vmax.f32 %v2169_v55, %v2183_v39  ;;  %v2541_v45 = vadd.f32 %v2540_v31, %v2537_v6  ;;  %v6108_v11 = vld [vmem:[#allocation23_spill] sm:$0xff]  ;;  %v6114_v6 = vld [vmem:[#allocation13_spill] sm:$0xff] }
 0x1c3   : > { %6105 = vst [vmem:[#allocation15_spill] sm:$0xff] %v5759_v8  ;;  %v1525_v21 = vmul.f32 %v4075_v34, %v5673_v0  ;;  %v1528_v16 = vmul.f32 %v4075_v34, %v5675_v7  ;;  %v1532_v47 = vmul.f32 %v4075_v34, %v5685_v48  ;;  %v2542_v1 = vmax.f32 %v2513_v33, %v5757_v29  ;;  %v5775_v0 = vpop.f32.mrf.mxu0  ;;  %v6110_v48 = vld [vmem:[#allocation19_spill] sm:$0xff] }
 0x1c4   : > { %vm3032_vm15 = vcmp.eq.s32.totalorder %v6106_v57, %v5447_v10  ;;  %vm2689_vm11 = vcmp.eq.s32.totalorder %v6106_v57, %v6107_v36  ;;  %vm3033_vm4 = vcmp.eq.s32.totalorder %v6106_v57, %v6108_v11  ;;  %v5773_v60 = vpop.f32.mrf.mxu1  ;;  %v2123_v7 = vrot.slane %v5746_v61, 4  ;;  %v6112_v4 = vld [vmem:[#allocation11_spill] sm:$0xff] }
 0x1c5   : > { %v2464_v12 = vmul.f32 %v6110_v48, %v6109_v24  ;;  %v5780_v30 = vadd.f32 %v2121_v28, %v2119_v3  ;;  %v2199_v56 = vmax.f32 %v2198_v35, %v2197_v51  ;;  %vm2690_vm12 = vcmp.eq.s32.totalorder %v6112_v4, %v6111_v42  ;;  %1526 = vst [vmem:[%s5594_s21] sm:$0x4] %v1525_v21  ;;  %v2797_v48 = vpop.f32.mrf.mxu0 }
 0x1c6   : > { %vm3034_vm10 = vcmp.eq.s32.totalorder %v6112_v4, %v5447_v10  ;;  %v1527_v52 = vmul.f32 %v6113_v49, %v1525_v21  ;;  %3674 = vst [vmem:[%s5594_s21 + $0x8] sm:$0x4] %v1528_v16  ;;  %v1530_v37 = vmul.f32 %v1528_v16, %v5705_v54  ;;  %3675 = vst [vmem:[%s5594_s21 + $0x10] sm:$0x4] %v1532_v47  ;;  %v5797_v40 = vpop.f32.mrf.mxu1  ;;  %v4077_v28 = vpop.eup %4076 }
 0x1c7   : > { %v2465_v50 = vmul.f32 %v6115_v2, %v6114_v6  ;;  %v2543_v32 = vmax.f32 %v2542_v1, %v2541_v45  ;;  %vm2691_vm8 = vcmp.eq.s32.totalorder %v6112_v4, %v6107_v36  ;;  %vm3035_vm5 = vcmp.eq.s32.totalorder %v6112_v4, %v6108_v11  ;;  %6116 = vst [vmem:[#allocation16_spill] sm:$0xff] %v5797_v40 }
 0x1c8   : > { %v1534_v31 = vmul.f32 %v1532_v47, %v5712_v63  ;;  %v2200_v3 = vsub.f32 %v2169_v55, %v2199_v56  ;;  %v2203_v54 = vsub.f32 %v2183_v39, %v2199_v56  ;;  %v2206_v34 = vsub.f32 %v2197_v51, %v2199_v56  ;;  %v3139_v24 = vpop.f32.mrf.mxu1 }
 0x1c9   : > { %v1531_v35 = vadd.f32 %v1530_v37, %v1527_v52  ;;  %v1869_v21 = vmul.f32 %v4077_v28, %v5689_v43  ;;  %v1872_v16 = vmul.f32 %v4077_v28, %v5692_v26  ;;  %v1876_v1 = vmul.f32 %v4077_v28, %v5696_v9  ;;  %v2801_v52 = vpop.f32.mrf.mxu0 }
 0x1ca   : > { %v2201_v6 = vmul.f32 1.442695, %v2200_v3  ;;  %v2204_v2 = vmul.f32 1.442695, %v2203_v54  ;;  %v2207_v8 = vmul.f32 1.442695, %v2206_v34  ;;  %v2544_v40 = vsub.f32 %v2513_v33, %v2543_v32  ;;  %v3141_v43 = vpop.f32.mrf.mxu1 }
 0x1cb   : > { %v1535_v62 = vadd.f32 %v1534_v31, %v1531_v35  ;;  %1870 = vst [vmem:[%s5594_s21] sm:$0x8] %v1869_v21  ;;  %v1871_v63 = vmul.f32 %v6113_v49, %v1869_v21  ;;  %3716 = vst [vmem:[%s5594_s21 + $0x8] sm:$0x8] %v1872_v16  ;;  %v1874_v55 = vmul.f32 %v1872_v16, %v5709_v13  ;;  %v6118_v34 = vld [vmem:[#allocation24_spill] sm:$0xff] }
 0x1cc   : > { %3717 = vst [vmem:[%s5594_s21 + $0x10] sm:$0x8] %v1876_v1  ;;  %v2466_v39 = vadd.f32 %v2464_v12, %v2462_v58  ;;  %4078 = vpow2.f32 %v2201_v6  ;;  %v2545_v26 = vmul.f32 1.442695, %v2544_v40  ;;  %v2547_v9 = vsub.f32 %v5757_v29, %v2543_v32  ;;  %v3145_v13 = vpop.f32.mrf.mxu1 }
 0x1cd   : > { %v2550_v51 = vsub.f32 %v2541_v45, %v2543_v32  ;;  %v1536_v47 = vmax.f32 %v1535_v62, 0.0  ;;  %v1875_v56 = vadd.f32 %v1874_v55, %v1871_v63  ;;  %v1878_v33 = vmul.f32 %v1876_v1, %v5715_v20 }
 0x1ce   : > { %4080 = vpow2.f32 %v2204_v2  ;;  %v2473_v37 = vadd.f32 %v2465_v50, %v2463_v27  ;;  %v2548_v28 = vmul.f32 1.442695, %v2547_v9  ;;  %v2124_v12 = vadd.f32 %v2123_v7, %v5746_v61  ;;  %v2803_v50 = vpop.f32.mrf.mxu0  ;;  %v3147_v3 = vpop.f32.mrf.mxu1 }
 0x1cf   : > { %4082 = vpow2.f32 %v2207_v8  ;;  %v2551_v31 = vmul.f32 1.442695, %v2550_v51  ;;  %1537 = vst [vmem:[%s5621_s8] sm:$0x4] %v1536_v47  ;;  %v1879_v58 = vadd.f32 %v1878_v33, %v1875_v56  ;;  %v2130_v40 = vrot.slane %v5780_v30, 4 }
 0x1d0   : > { %4084 = vpow2.f32 %v2545_v26  ;;  %v6117_v62 = vmov 0.0   ;;  %v2467_v27 = vrot.slane %v2466_v39, 4  ;;  %v2474_v32 = vrot.slane %v2473_v37, 4 }
 0x1d1   : > { %4086 = vpow2.f32 %v2548_v28  ;;  %v5817_v20 = vsel %vm3032_vm15, 1.0, %v6117_v62  ;;  %v5823_v29 = vsel %vm2689_vm11, 1.0, %v6117_v62  ;;  %v5829_v61 = vsel %vm3033_vm4, 1.0, %v6117_v62 }
 0x1d2   : > { %v1880_v8 = vmax.f32 %v1879_v58, 0.0  ;;  %v5835_v45 = vsel %vm2690_vm12, 1.0, %v6117_v62  ;;  %v5841_v7 = vsel %vm3034_vm10, 1.0, %v6117_v62  ;;  %4088 = vpow2.f32 %v2551_v31 }
 0x1d3   : > { %v5847_v57 = vsel %vm2691_vm8, 1.0, %v6117_v62  ;;  %v5853_v42 = vsel %vm3035_vm5, 1.0, %v6117_v62  ;;  %v2125_v10 = vrot.slane %v2124_v12, 2  ;;  %v2131_v54 = vadd.f32 %v2130_v40, %v5780_v30 }
 0x1d4   : > { %1881 = vst [vmem:[%s5621_s8] sm:$0x8] %v1880_v8  ;;  %v2824_v35 = vmul.f32 %v6118_v34, %v5775_v0  ;;  %v2826_v21 = vmul.f32 %v5835_v45, %v2801_v52  ;;  %v3168_v36 = vmul.f32 %v5817_v20, %v3139_v24  ;;  %v2825_v16 = vmul.f32 %v5823_v29, %v2797_v48 }
 0x1d5   : > { %v3170_v1 = vmul.f32 %v5841_v7, %v3145_v13  ;;  %v2827_v11 = vmul.f32 %v5847_v57, %v2803_v50  ;;  %v2468_v4 = vadd.f32 %v2467_v27, %v2466_v39  ;;  %v3169_v6 = vmul.f32 %v5829_v61, %v3141_v43 }
 0x1d6   : > { %v2828_v2 = vadd.f32 %v2826_v21, %v2824_v35  ;;  %v3171_v63 = vmul.f32 %v5853_v42, %v3147_v3  ;;  %v2475_v30 = vadd.f32 %v2474_v32, %v2473_v37  ;;  %v2126_v51 = vadd.f32 %v2125_v10, %v2124_v12 }
 0x1d7   : > { %v3172_v55 = vadd.f32 %v3170_v1, %v3168_v36  ;;  %v2835_v26 = vadd.f32 %v2827_v11, %v2825_v16  ;;  %v2132_v47 = vrot.slane %v2131_v54, 2  ;;  %v2469_v33 = vrot.slane %v2468_v4, 2 }
 0x1d8   : > { %v2829_v0 = vrot.slane %v2828_v2, 4  ;;  %v3179_v9 = vadd.f32 %v3171_v63, %v3169_v6  ;;  %v2476_v43 = vrot.slane %v2475_v30, 2  ;;  %v2127_v8 = vrot.slane %v2126_v51, 1 }
 0x1d9   : > { %v3173_v24 = vrot.slane %v3172_v55, 4  ;;  %v2836_v56 = vrot.slane %v2835_v26, 4  ;;  %v5866_v48 = vpop.eup %4078  ;;  %v2133_v27 = vadd.f32 %v2132_v47, %v2131_v54  ;;  %v2470_v10 = vadd.f32 %v2469_v33, %v2468_v4 }
 0x1da   : > { %v2830_v52 = vadd.f32 %v2829_v0, %v2828_v2  ;;  %v3180_v28 = vrot.slane %v3179_v9, 4  ;;  %v2477_v16 = vadd.f32 %v2476_v43, %v2475_v30 }
 0x1db   : > { %v5868_v39 = vpop.eup %4080  ;;  %v3174_v31 = vadd.f32 %v3173_v24, %v3172_v55  ;;  %v2837_v13 = vadd.f32 %v2836_v56, %v2835_v26  ;;  %v2128_v55 = vadd.f32 %v2127_v8, %v2126_v51  ;;  %v2134_v47 = vrot.slane %v2133_v27, 1 }
 0x1dc   : > { %v5870_v58 = vpop.eup %4082  ;;  %v2209_v37 = vadd.f32 %v5868_v39, %v5866_v48  ;;  %v2831_v40 = vrot.slane %v2830_v52, 2  ;;  %v3181_v12 = vadd.f32 %v3180_v28, %v3179_v9  ;;  %v2471_v9 = vrot.slane %v2470_v10, 1 }
 0x1dd   : > { %v5874_v62 = vpop.eup %4084  ;;  %v3175_v50 = vrot.slane %v3174_v31, 2  ;;  %v2838_v32 = vrot.slane %v2837_v13, 2  ;;  %v2478_v30 = vrot.slane %v2477_v16, 1 }
 0x1de   : > { %v5876_v3 = vpop.eup %4086  ;;  %v2210_v35 = vadd.f32 %v5870_v58, %v2209_v37  ;;  %v2832_v21 = vadd.f32 %v2831_v40, %v2830_v52  ;;  %v3182_v36 = vrot.slane %v3181_v12, 2 }
 0x1df   : > { %v2553_v1 = vadd.f32 %v5876_v3, %v5874_v62  ;;  %v3176_v11 = vadd.f32 %v3175_v50, %v3174_v31  ;;  %v2839_v6 = vadd.f32 %v2838_v32, %v2837_v13  ;;  %v5881_v2 = vpop.eup %4088 }
 0x1e0   : > { %4090 = vrcp.f32 %v2210_v35  ;;  %v2833_v63 = vrot.slane %v2832_v21, 1  ;;  %v3183_v54 = vadd.f32 %v3182_v36, %v3181_v12 }
 0x1e1   : > { %v2554_v26 = vadd.f32 %v5881_v2, %v2553_v1  ;;  %v3177_v0 = vrot.slane %v3176_v11, 1  ;;  %v2840_v4 = vrot.slane %v2839_v6, 1 }
 0x1e2   : > { %v2834_v24 = vadd.f32 %v2833_v63, %v2832_v21  ;;  %v3184_v56 = vrot.slane %v3183_v54, 1  ;;  %v2135_v21 = vadd.f32 %v2134_v47, %v2133_v27  ;;  %v2472_v63 = vadd.f32 %v2471_v9, %v2470_v10 }
 0x1e3   : > { %4092 = vrcp.f32 %v2554_v26  ;;  %v3178_v33 = vadd.f32 %v3177_v0, %v3176_v11  ;;  %v2841_v52 = vadd.f32 %v2840_v4, %v2839_v6 }
 0x1e4   : > { %v2852_v28 = vmul.f32 %v2834_v24, %v5638_v15  ;;  %v2866_v43 = vmul.f32 %v2834_v24, %v5653_v41  ;;  %v2880_v31 = vmul.f32 %v2834_v24, %v5678_v53  ;;  %v3185_v13 = vadd.f32 %v3184_v56, %v3183_v54 }
 0x1e5   : > { %v3196_v51 = vmul.f32 %v3178_v33, %v5638_v15  ;;  %v3210_v37 = vmul.f32 %v3178_v33, %v5653_v41  ;;  %v3224_v40 = vmul.f32 %v3178_v33, %v5678_v53  ;;  %v2856_v12 = vmul.f32 %v2841_v52, %v5683_v18 }
 0x1e6   : > { %v2853_v8 = vadd.f32 %v2852_v28, %v5627_v17  ;;  %v2867_v50 = vadd.f32 %v2866_v43, %v5643_v19  ;;  %v2881_v32 = vadd.f32 %v2880_v31, %v5687_v22  ;;  %v2870_v35 = vmul.f32 %v2841_v52, %v5699_v59 }
 0x1e7   : > { %v3197_v36 = vadd.f32 %v3196_v51, %v5627_v17  ;;  %v3211_v1 = vadd.f32 %v3210_v37, %v5643_v19  ;;  %v2884_v15 = vmul.f32 %v2841_v52, %v5702_v23  ;;  %v3200_v53 = vmul.f32 %v3185_v13, %v5683_v18 }
 0x1e8   : > { %v2857_v41 = vadd.f32 %v2856_v12, %v2853_v8  ;;  %v2871_v11 = vadd.f32 %v2870_v35, %v2867_v50  ;;  %v3214_v6 = vmul.f32 %v3185_v13, %v5699_v59  ;;  %v2479_v54 = vadd.f32 %v2478_v30, %v2477_v16 }
 0x1e9   : > { %v3225_v26 = vadd.f32 %v3224_v40, %v5687_v22  ;;  %v3228_v0 = vmul.f32 %v3185_v13, %v5702_v23  ;;  %v2885_v4 = vadd.f32 %v2884_v15, %v2881_v32  ;;  %v3201_v47 = vadd.f32 %v3200_v53, %v3197_v36 }
 0x1ea   : > { %v2886_v27 = vmax.f32 %v2857_v41, %v2871_v11  ;;  %v3215_v17 = vadd.f32 %v3214_v6, %v3211_v1  ;;  %v2154_v19 = vadd.f32 %v2128_v55, %v6090_v25  ;;  %v2498_v18 = vadd.f32 %v2472_v63, %v6090_v25 }
 0x1eb   : > { %v2155_v59 = vadd.f32 %v2135_v21, %v6091_v38  ;;  %v2499_v22 = vadd.f32 %v2479_v54, %v6091_v38  ;;  %v3229_v10 = vadd.f32 %v3228_v0, %v3225_v26  ;;  %v2806_v30 = vmul.f32 %v6118_v34, %v5721_v46  ;;  %v6119_v54 = vld [vmem:[#allocation18_spill] sm:$0xff]  ;;  %v6120_v0 = vld [vmem:[#allocation16_spill] sm:$0xff] }
 0x1ec   : > { %v2887_v24 = vmax.f32 %v2886_v27, %v2885_v4  ;;  %v3230_v56 = vmax.f32 %v3201_v47, %v3215_v17  ;;  %v2808_v35 = vmul.f32 %v5835_v45, %v5739_v44  ;;  %v2807_v44 = vmul.f32 %v5823_v29, %v5729_v5 }
 0x1ed   : > { %v4091_v33 = vpop.eup %4090  ;;  %v3150_v26 = vmul.f32 %v5817_v20, %v6119_v54 }
 0x1ee   : > { %v2213_v23 = vmul.f32 %v4091_v33, %v5866_v48  ;;  %v2216_v16 = vmul.f32 %v4091_v33, %v5868_v39  ;;  %v2220_v9 = vmul.f32 %v4091_v33, %v5870_v58  ;;  %v2888_v55 = vsub.f32 %v2857_v41, %v2887_v24 }
 0x1ef   : > { %v2891_v52 = vsub.f32 %v2871_v11, %v2887_v24  ;;  %v2894_v28 = vsub.f32 %v2885_v4, %v2887_v24  ;;  %v3231_v43 = vmax.f32 %v3230_v56, %v3229_v10  ;;  %v2810_v45 = vadd.f32 %v2808_v35, %v2806_v30 }
 0x1f0   : > { %v4093_v31 = vpop.eup %4092  ;;  %2214 = vst [vmem:[%s5594_s21] sm:$0x10] %v2213_v23  ;;  %v2215_v13 = vmul.f32 %v6113_v49, %v2213_v23  ;;  %3758 = vst [vmem:[%s5594_s21 + $0x8] sm:$0x10] %v2216_v16  ;;  %v2218_v51 = vmul.f32 %v2216_v16, %v2154_v19  ;;  %v2222_v48 = vmul.f32 %v2220_v9, %v2155_v59  ;;  %v2889_v39 = vmul.f32 1.442695, %v2888_v55 }
 0x1f1   : > { %3759 = vst [vmem:[%s5594_s21 + $0x10] sm:$0x10] %v2220_v9  ;;  %v2557_v58 = vmul.f32 %v4093_v31, %v5874_v62  ;;  %v2560_v37 = vmul.f32 %v4093_v31, %v5876_v3  ;;  %v2564_v46 = vmul.f32 %v4093_v31, %v5881_v2  ;;  %v2892_v34 = vmul.f32 1.442695, %v2891_v52 }
 0x1f2   : > { %v2219_v40 = vadd.f32 %v2218_v51, %v2215_v13  ;;  %4094 = vpow2.f32 %v2889_v39  ;;  %v2895_v12 = vmul.f32 1.442695, %v2894_v28  ;;  %v3232_v8 = vsub.f32 %v3201_v47, %v3231_v43  ;;  %v6121_v47 = vld [vmem:[#allocation15_spill] sm:$0xff] }
 0x1f3   : > { %2558 = vst [vmem:[%s5594_s21] sm:$0x20] %v2557_v58  ;;  %v2559_v50 = vmul.f32 %v6113_v49, %v2557_v58  ;;  %3800 = vst [vmem:[%s5594_s21 + $0x8] sm:$0x20] %v2560_v37  ;;  %v2562_v32 = vmul.f32 %v2560_v37, %v2498_v18  ;;  %4096 = vpow2.f32 %v2892_v34  ;;  %v2809_v3 = vmul.f32 %v5847_v57, %v5751_v14 }
 0x1f4   : > { %3801 = vst [vmem:[%s5594_s21 + $0x10] sm:$0x20] %v2564_v46  ;;  %v2223_v62 = vadd.f32 %v2222_v48, %v2219_v40  ;;  %v3233_v2 = vmul.f32 1.442695, %v3232_v8  ;;  %v3235_v21 = vsub.f32 %v3215_v17, %v3231_v43  ;;  %v2566_v1 = vmul.f32 %v2564_v46, %v2499_v22 }
 0x1f5   : > { %v2563_v36 = vadd.f32 %v2562_v32, %v2559_v50  ;;  %4098 = vpow2.f32 %v2895_v12  ;;  %v3238_v15 = vsub.f32 %v3229_v10, %v3231_v43  ;;  %v3152_v14 = vmul.f32 %v5841_v7, %v5773_v60 }
 0x1f6   : > { %v2224_v41 = vmax.f32 %v2223_v62, 0.0  ;;  %4100 = vpow2.f32 %v3233_v2  ;;  %v3236_v11 = vmul.f32 1.442695, %v3235_v21  ;;  %v2817_v63 = vadd.f32 %v2809_v3, %v2807_v44 }
 0x1f7   : > { %v2567_v53 = vadd.f32 %v2566_v1, %v2563_v36  ;;  %v3239_v6 = vmul.f32 1.442695, %v3238_v15  ;;  %v3153_v4 = vmul.f32 %v5853_v42, %v6120_v0  ;;  %v2811_v27 = vrot.slane %v2810_v45, 4 }
 0x1f8   : > { %2225 = vst [vmem:[%s5621_s8] sm:$0x10] %v2224_v41  ;;  %4102 = vpow2.f32 %v3236_v11  ;;  %v3151_v5 = vmul.f32 %v5829_v61, %v6121_v47  ;;  %v3154_v29 = vadd.f32 %v3152_v14, %v3150_v26  ;;  %v2818_v17 = vrot.slane %v2817_v63, 4 }
 0x1f9   : > { %v2568_v57 = vmax.f32 %v2567_v53, 0.0  ;;  %4104 = vpow2.f32 %v3239_v6  ;;  %v2812_v60 = vadd.f32 %v2811_v27, %v2810_v45 }
 0x1fa   : > { %v3161_v19 = vadd.f32 %v3153_v4, %v3151_v5  ;;  %v3155_v56 = vrot.slane %v3154_v29, 4  ;;  %v2819_v33 = vadd.f32 %v2818_v17, %v2817_v63 }
 0x1fb   : > { %2569 = vst [vmem:[%s5621_s8] sm:$0x20] %v2568_v57  ;;  %v2813_v10 = vrot.slane %v2812_v60, 2 }
 0x1fc   : > { %v3162_v20 = vrot.slane %v3161_v19, 4  ;;  %v3156_v23 = vadd.f32 %v3155_v56, %v3154_v29  ;;  %v2820_v9 = vrot.slane %v2819_v33, 2 }
 0x1fd   : > { %v2814_v52 = vadd.f32 %v2813_v10, %v2812_v60 }
 0x1fe   : > { %v3163_v55 = vadd.f32 %v3162_v20, %v3161_v19  ;;  %v3157_v28 = vrot.slane %v3156_v23, 2  ;;  %v2821_v31 = vadd.f32 %v2820_v9, %v2819_v33 }
 0x1ff   : > { %v4095_v24 = vpop.eup %4094  ;;  %v2815_v51 = vrot.slane %v2814_v52, 1 }
 0x200   : > { %v4097_v7 = vpop.eup %4096  ;;  %v3164_v13 = vrot.slane %v3163_v55, 2  ;;  %v3158_v48 = vadd.f32 %v3157_v28, %v3156_v23  ;;  %v2822_v39 = vrot.slane %v2821_v31, 1 }
 0x201   : > { %v2897_v18 = vadd.f32 %v4097_v7, %v4095_v24  ;;  %v2816_v37 = vadd.f32 %v2815_v51, %v2814_v52 }
 0x202   : > { %v4099_v59 = vpop.eup %4098  ;;  %v3165_v58 = vadd.f32 %v3164_v13, %v3163_v55  ;;  %v3159_v46 = vrot.slane %v3158_v48, 1  ;;  %v2823_v34 = vadd.f32 %v2822_v39, %v2821_v31 }
 0x203   : > { %v4101_v22 = vpop.eup %4100  ;;  %v2898_v42 = vadd.f32 %v4099_v59, %v2897_v18  ;;  %v2842_v8 = vadd.f32 %v2816_v37, %v6090_v25 }
 0x204   : > { %v3166_v12 = vrot.slane %v3165_v58, 1  ;;  %v3160_v62 = vadd.f32 %v3159_v46, %v3158_v48  ;;  %v2843_v3 = vadd.f32 %v2823_v34, %v6091_v38 }
 0x205   : > { %v4103_v16 = vpop.eup %4102  ;;  %4106 = vrcp.f32 %v2898_v42 }
 0x206   : > { %v3241_v61 = vadd.f32 %v4103_v16, %v4101_v22  ;;  %v4105_v30 = vpop.eup %4104  ;;  %v3167_v36 = vadd.f32 %v3166_v12, %v3165_v58  ;;  %v3186_v11 = vadd.f32 %v3160_v62, %v6090_v25 }
 0x208   : > { %v3242_v43 = vadd.f32 %v4105_v30, %v3241_v61  ;;  %v3187_v14 = vadd.f32 %v3167_v36, %v6091_v38 }
 0x20a   : > { %4108 = vrcp.f32 %v3242_v43 }
 0x212   : > { %v4107_v40 = vpop.eup %4106 }
 0x213   : > { %v2901_v50 = vmul.f32 %v4107_v40, %v4095_v24  ;;  %v2904_v32 = vmul.f32 %v4107_v40, %v4097_v7  ;;  %v2908_v35 = vmul.f32 %v4107_v40, %v4099_v59 }
 0x215   : > { %2902 = vst [vmem:[%s5594_s21] sm:$0x40] %v2901_v50  ;;  %v2903_v2 = vmul.f32 %v6113_v49, %v2901_v50  ;;  %3842 = vst [vmem:[%s5594_s21 + $0x8] sm:$0x40] %v2904_v32  ;;  %v2906_v21 = vmul.f32 %v2904_v32, %v2842_v8  ;;  %v2910_v41 = vmul.f32 %v2908_v35, %v2843_v3 }
 0x216   : > { %3843 = vst [vmem:[%s5594_s21 + $0x10] sm:$0x40] %v2908_v35 }
 0x217   : > { %v4109_v1 = vpop.eup %4108  ;;  %v2907_v15 = vadd.f32 %v2906_v21, %v2903_v2 }
 0x218   : > { %v3245_v53 = vmul.f32 %v4109_v1, %v4101_v22  ;;  %v3248_v44 = vmul.f32 %v4109_v1, %v4103_v16  ;;  %v3252_v45 = vmul.f32 %v4109_v1, %v4105_v30 }
 0x219   : > { %v2911_v6 = vadd.f32 %v2910_v41, %v2907_v15 }
 0x21a   : > { %3246 = vst [vmem:[%s5594_s21] sm:$0x80] %v3245_v53  ;;  %v3247_v57 = vmul.f32 %v6113_v49, %v3245_v53  ;;  %3884 = vst [vmem:[%s5594_s21 + $0x8] sm:$0x80] %v3248_v44  ;;  %v3250_v63 = vmul.f32 %v3248_v44, %v3186_v11  ;;  %v3254_v0 = vmul.f32 %v3252_v45, %v3187_v14 }
 0x21b   : > { %3885 = vst [vmem:[%s5594_s21 + $0x10] sm:$0x80] %v3252_v45  ;;  %v2912_v54 = vmax.f32 %v2911_v6, 0.0 }
 0x21c   : > { %v3251_v26 = vadd.f32 %v3250_v63, %v3247_v57 }
 0x21d   : > { %2913 = vst [vmem:[%s5621_s8] sm:$0x40] %v2912_v54 }
 0x21e   : > { %v3255_v4 = vadd.f32 %v3254_v0, %v3251_v26  ;;  %3279 = sbr.rel (!%p6122_p8) target bundleno = 548 (0x224), region = 64 }
 0x220   : > { %v3256_v27 = vmax.f32 %v3255_v4, 0.0 }
 0x221   : > { %v3318_v25 = vld [vmem:[%s5594_s21] sm:$0xff] (%p6122_p8)  ;;  %v3320_v38 = vld [vmem:[%s5594_s21 + $0x8] sm:$0xff] (%p6122_p8) }
 0x222   : > { %3257 = vst [vmem:[%s5621_s8] sm:$0x80] %v3256_v27  ;;  %v3322_v49 = vld [vmem:[%s5594_s21 + $0x10] sm:$0xff] (%p6122_p8)  ;;  %3319 = vst [vmem:[%s3285_s12] sm:$0xff] (%p6122_p8), %v3318_v25 }
 0x223   : > { %3321 = vst [vmem:[%s3285_s12 + $0x10] sm:$0xff] %v3320_v38  ;;  %3323 = vst [vmem:[%s3285_s12 + $0x20] sm:$0xff] %v3322_v49 }
 0x224 PF: > { %s20_s30 = sadd.s32 1, %s4218_s30   ;;  %s6123_s24 = smov %s4198_s25 }
 0x225   : > { %p17_p11 = scmp.ge.s32.totalorder %s20_s30, 6   ;;  %s6124_s25 = smov %s4342_s22 }
 0x226   : > { %s6125_s26 = smov %s4210_s28  ;;  %s6126_s27 = smov %s4214_s29 }
 0x227   : > { %s6127_s28 = smov %s6130_s9  ;;  %s6128_s29 = smov %s6134_s10 }
 0x228   :  { %19 = sbr.rel (!%p17_p11) target bundleno = 8 (0x8), region = 152 }
 0x22d   :  { %3354 = vsyncpa [#allocation3], 1 }
 0x22e   :  { %3356 = vsyncpa [#allocation3 + $0x1], 1 }
 0x22f   :  { %3357 = vsyncpa [#allocation5], 1 }

</bundles_post_ra>
